<compile_context>
chip_gen: v7x
topology: tpu7x:2x2x1
jax: 0.10.0
libtpu: 0.0.40
codegen_flags: <defaults>
</compile_context>

<pallas_src>
import jax
import jax.numpy as jnp
from jax.experimental import pallas as pl
from jax.experimental.pallas import tpu as pltpu

# ----------------------------- config (small, module-consistent) -----------
VOCAB = 1000
BATCH = 2
SEQ = 128
EMB_DIM = 768      # embedding_dim from the module
PROJ_DIM = 512     # nn.Linear(embedding_dim, 512)


# ----------------------------- Pallas kernel --------------------------------
def encoder_tail_pool_proj_kernel(h_ref, mask_ref, ln_g_ref, ln_b_ref,
                                  w_ref, b_ref, out_ref):
    """Fused LayerNorm + masked mean-pooling + linear projection.

    h_ref   : (B, S, D)  bf16  pre-LayerNorm encoder hidden states
    mask_ref: (B, S)     f32   attention mask
    ln_g_ref: (1, 1, D)  f32   LayerNorm gamma
    ln_b_ref: (1, 1, D)  f32   LayerNorm beta
    w_ref   : (D, P)     bf16  projection weight (transposed vs torch Linear)
    b_ref   : (1, P)     f32   projection bias
    out_ref : (B, P)     f32   projected (un-normalized) embeddings
    """
    # --- encoder tail: LayerNorm over the hidden (lane) axis, f32 VPU math --
    h = h_ref[...].astype(jnp.float32)                          # (B, S, D)
    mu = jnp.mean(h, axis=-1, keepdims=True)                    # (B, S, 1)
    xc = h - mu
    var = jnp.mean(xc * xc, axis=-1, keepdims=True)             # (B, S, 1)
    h_ln = xc * jax.lax.rsqrt(var + 1e-12)                      # (B, S, D)
    h_ln = h_ln * ln_g_ref[...] + ln_b_ref[...]                 # (B, S, D)

    # --- masked mean pooling; clamp+reciprocal on the EUP, folded into mask -
    mask = mask_ref[...]                                        # (B, S) f32
    inv = pl.reciprocal(
        jnp.maximum(jnp.sum(mask, axis=1, keepdims=True), 1e-9),
        approx=True)                                            # (B, 1)
    mask_scaled = mask * inv                                    # (B, S)
    pooled = jnp.sum(h_ln * mask_scaled[:, :, None], axis=1)    # (B, D) f32

    # --- projection: bf16 operands on the MXU, f32 accumulation --------------
    proj = jnp.dot(pooled.astype(jnp.bfloat16), w_ref[...],
                   preferred_element_type=jnp.float32) + b_ref[...]   # (B, P)

    # NOTE: the reference module computes F.normalize but returns the
    # un-normalized projection; we match that and return `proj` as-is.
    out_ref[...] = proj


def pool_and_project(h, mask, ln_g, ln_b, w, b):
    B, S, D = h.shape
    P = w.shape[1]
    vmem = pl.BlockSpec(memory_space=pltpu.MemorySpace.VMEM)
    return pl.pallas_call(
        encoder_tail_pool_proj_kernel,
        out_shape=jax.ShapeDtypeStruct((B, P), jnp.float32),
        in_specs=[vmem] * 6,
        out_specs=vmem,
    )(h, mask, ln_g, ln_b, w, b)


# ----------------------------- synthetic encoder body (glue, plain JAX) -----
def synthetic_encoder_pre_ln(input_ids, params):
    """Deterministic stand-in for the pretrained DistilBERT body: embedding
    gather + position add.  The final LayerNorm is fused into the Pallas
    kernel; the activation is emitted in bf16 so it crosses HBM once at
    half width."""
    # TODO(synk): full DistilBERT transformer stack.
    tok = jnp.take(params["tok_emb"], input_ids, axis=0)        # (B, S, D)
    pos = params["pos_emb"][None, : input_ids.shape[1], :]      # (1, S, D)
    return (tok + pos).astype(jnp.bfloat16)


def contrastive_model_forward(input_ids, attention_mask, params):
    h = synthetic_encoder_pre_ln(input_ids, params)             # (B, S, D) bf16
    mask_f = attention_mask.astype(jnp.float32)                 # (B, S) f32
    return pool_and_project(
        h, mask_f,
        params["ln_g"].reshape(1, 1, EMB_DIM),
        params["ln_b"].reshape(1, 1, EMB_DIM),
        params["proj_w"],          # bf16 (D, P), stored pre-cast (weight-stationary)
        params["proj_b"],          # f32  (1, P)
    )                                                           # (B, 512) f32


# ----------------------------- deterministic param init ---------------------
def init_params(key):
    k1, k2, k3, k4 = jax.random.split(key, 4)
    proj_w_f32 = (jax.random.normal(k3, (EMB_DIM, PROJ_DIM), jnp.float32)
                  * (1.0 / jnp.sqrt(EMB_DIM)))
    return {
        "tok_emb": jax.random.normal(k1, (VOCAB, EMB_DIM), jnp.float32) * 0.02,
        "pos_emb": jax.random.normal(k2, (SEQ, EMB_DIM), jnp.float32) * 0.02,
        "ln_g": jnp.ones((EMB_DIM,), jnp.float32),
        "ln_b": jnp.zeros((EMB_DIM,), jnp.float32),
        # nn.Linear(768, 512): weight [512, 768] -> stored transposed [768, 512]
        # and pre-cast to bf16 once (the MXU's native operand dtype).
        "proj_w": proj_w_f32.astype(jnp.bfloat16),
        "proj_b": jax.random.normal(k4, (1, PROJ_DIM), jnp.float32) * 0.01,
    }


# ----------------------------- reference (pure JAX, f32) for sanity ---------
def reference_forward(input_ids, attention_mask, params):
    tok = jnp.take(params["tok_emb"], input_ids, axis=0)
    pos = params["pos_emb"][None, : input_ids.shape[1], :]
    h = (tok + pos).astype(jnp.float32)
    mu = jnp.mean(h, axis=-1, keepdims=True)
    var = jnp.mean((h - mu) ** 2, axis=-1, keepdims=True)
    h = (h - mu) / jnp.sqrt(var + 1e-12)
    h = h * params["ln_g"] + params["ln_b"]
    m = attention_mask.astype(jnp.float32)[:, :, None]
    sum_emb = jnp.sum(h * m, axis=1)
    sum_mask = jnp.clip(jnp.sum(m, axis=1), 1e-9, None)
    pooled = sum_emb / sum_mask
    return pooled @ params["proj_w"].astype(jnp.float32) + params["proj_b"]


if __name__ == "__main__":
    key = jax.random.PRNGKey(0)
    params = init_params(key)

    # test inputs mirroring: torch.randint(0, 1000, (2, 128)), ones mask
    k_ids = jax.random.fold_in(key, 123)
    input_ids = jax.random.randint(k_ids, (BATCH, SEQ), 0, VOCAB, dtype=jnp.int32)
    attention_mask = jnp.ones((BATCH, SEQ), dtype=jnp.int32)

    out = contrastive_model_forward(input_ids, attention_mask, params)
    out = jax.block_until_ready(out)

    ref = reference_forward(input_ids, attention_mask, params)
    assert out.shape == (BATCH, PROJ_DIM), out.shape
    # bf16 activation stream + approx reciprocal -> slightly loosened tolerance
    max_err = float(jnp.max(jnp.abs(out - ref)))
    assert jnp.allclose(out, ref, atol=1e-2, rtol=1e-2), f"mismatch, max_err={max_err}"

    print("KERNEL_OK")
</pallas_src>

<mosaic_0001>
module attributes {stable_mosaic.version = 11 : i64} {
  func.func @encoder_tail_pool_proj_kernel(%arg0: memref<2x128x768xbf16, #tpu.memory_space<vmem>>, %arg1: memref<2x128xf32, #tpu.memory_space<vmem>>, %arg2: memref<1x1x768xf32, #tpu.memory_space<vmem>>, %arg3: memref<1x1x768xf32, #tpu.memory_space<vmem>>, %arg4: memref<768x512xbf16, #tpu.memory_space<vmem>>, %arg5: memref<1x512xf32, #tpu.memory_space<vmem>>, %arg6: memref<2x512xf32, #tpu.memory_space<vmem>>) attributes {dimension_semantics = [], scalar_prefetch = 0 : i64, scratch_operands = 0 : i64, tpu.core_type = #tpu.core_type<tc>} {
    %c0 = arith.constant 0 : index
    %c0_0 = arith.constant 0 : index
    %c0_1 = arith.constant 0 : index
    %0 = vector.load %arg0[%c0, %c0_0, %c0_1] : memref<2x128x768xbf16, #tpu.memory_space<vmem>>, vector<2x128x768xbf16>
    %1 = arith.extf %0 : vector<2x128x768xbf16> to vector<2x128x768xf32>
    %cst = arith.constant dense<0.000000e+00> : vector<2x128xf32>
    %2 = vector.multi_reduction <add>, %1, %cst [2] : vector<2x128x768xf32> to vector<2x128xf32>
    %3 = vector.shape_cast %2 : vector<2x128xf32> to vector<2x128x1xf32>
    %cst_2 = arith.constant 7.680000e+02 : f32
    %4 = vector.broadcast %cst_2 : f32 to vector<2x128x1xf32>
    %5 = arith.divf %3, %4 : vector<2x128x1xf32>
    %6 = vector.broadcast %5 : vector<2x128x1xf32> to vector<2x128x768xf32>
    %7 = arith.subf %1, %6 : vector<2x128x768xf32>
    %8 = arith.mulf %7, %7 : vector<2x128x768xf32>
    %cst_3 = arith.constant dense<0.000000e+00> : vector<2x128xf32>
    %9 = vector.multi_reduction <add>, %8, %cst_3 [2] : vector<2x128x768xf32> to vector<2x128xf32>
    %10 = vector.shape_cast %9 : vector<2x128xf32> to vector<2x128x1xf32>
    %cst_4 = arith.constant 7.680000e+02 : f32
    %11 = vector.broadcast %cst_4 : f32 to vector<2x128x1xf32>
    %12 = arith.divf %10, %11 : vector<2x128x1xf32>
    %cst_5 = arith.constant 9.99999996E-13 : f32
    %13 = vector.broadcast %cst_5 : f32 to vector<2x128x1xf32>
    %14 = arith.addf %12, %13 : vector<2x128x1xf32>
    %15 = math.rsqrt %14 : vector<2x128x1xf32>
    %16 = vector.broadcast %15 : vector<2x128x1xf32> to vector<2x128x768xf32>
    %17 = arith.mulf %7, %16 : vector<2x128x768xf32>
    %c0_6 = arith.constant 0 : index
    %c0_7 = arith.constant 0 : index
    %c0_8 = arith.constant 0 : index
    %18 = vector.load %arg2[%c0_6, %c0_7, %c0_8] : memref<1x1x768xf32, #tpu.memory_space<vmem>>, vector<1x1x768xf32>
    %19 = vector.broadcast %18 : vector<1x1x768xf32> to vector<2x128x768xf32>
    %20 = arith.mulf %17, %19 : vector<2x128x768xf32>
    %c0_9 = arith.constant 0 : index
    %c0_10 = arith.constant 0 : index
    %c0_11 = arith.constant 0 : index
    %21 = vector.load %arg3[%c0_9, %c0_10, %c0_11] : memref<1x1x768xf32, #tpu.memory_space<vmem>>, vector<1x1x768xf32>
    %22 = vector.broadcast %21 : vector<1x1x768xf32> to vector<2x128x768xf32>
    %23 = arith.addf %20, %22 : vector<2x128x768xf32>
    %c0_12 = arith.constant 0 : index
    %c0_13 = arith.constant 0 : index
    %24 = vector.load %arg1[%c0_12, %c0_13] : memref<2x128xf32, #tpu.memory_space<vmem>>, vector<2x128xf32>
    %cst_14 = arith.constant dense<0.000000e+00> : vector<2xf32>
    %25 = vector.multi_reduction <add>, %24, %cst_14 [1] : vector<2x128xf32> to vector<2xf32>
    %26 = vector.shape_cast %25 : vector<2xf32> to vector<2x1xf32>
    %cst_15 = arith.constant 9.99999971E-10 : f32
    %27 = vector.broadcast %cst_15 : f32 to vector<2x1xf32>
    %28 = arith.maximumf %26, %27 : vector<2x1xf32>
    %29 = tpu.reciprocal %28 {approx = true} : vector<2x1xf32> -> vector<2x1xf32>
    %30 = vector.broadcast %29 : vector<2x1xf32> to vector<2x128xf32>
    %31 = arith.mulf %24, %30 : vector<2x128xf32>
    %32 = vector.shape_cast %31 : vector<2x128xf32> to vector<2x128x1xf32>
    %33 = vector.broadcast %32 : vector<2x128x1xf32> to vector<2x128x768xf32>
    %34 = arith.mulf %23, %33 : vector<2x128x768xf32>
    %cst_16 = arith.constant dense<0.000000e+00> : vector<2x768xf32>
    %35 = vector.multi_reduction <add>, %34, %cst_16 [1] : vector<2x128x768xf32> to vector<2x768xf32>
    %36 = arith.truncf %35 : vector<2x768xf32> to vector<2x768xbf16>
    %c0_17 = arith.constant 0 : index
    %c0_18 = arith.constant 0 : index
    %37 = vector.load %arg4[%c0_17, %c0_18] : memref<768x512xbf16, #tpu.memory_space<vmem>>, vector<768x512xbf16>
    %cst_19 = arith.constant dense<0.000000e+00> : vector<2x512xf32>
    %38 = tpu.matmul %36, %37, %cst_19 {dimension_numbers = #tpu.dot_dimension_numbers<[1], [0], [0], [1], [0, 0, 1, 1], [], []>} : vector<2x768xbf16>, vector<768x512xbf16>, vector<2x512xf32> -> vector<2x512xf32>
    %c0_20 = arith.constant 0 : index
    %c0_21 = arith.constant 0 : index
    %39 = vector.load %arg5[%c0_20, %c0_21] : memref<1x512xf32, #tpu.memory_space<vmem>>, vector<1x512xf32>
    %40 = vector.broadcast %39 : vector<1x512xf32> to vector<2x512xf32>
    %41 = arith.addf %38, %40 : vector<2x512xf32>
    %c0_22 = arith.constant 0 : index
    %c0_23 = arith.constant 0 : index
    %42 = vector.load %arg6[%c0_22, %c0_23] : memref<2x512xf32, #tpu.memory_space<vmem>>, vector<2x512xf32>
    tpu.vector_store %arg6[%c0_22, %c0_23], %41 {strides = array<i32>} : memref<2x512xf32, #tpu.memory_space<vmem>>, vector<2x512xf32>,
    return
  }
}

</mosaic_0001>

<bundles_post_ra>
// kernel: tpu_custom_call.1
= control target key start
LH: loop header
LB: loop body
LE: loop exit
PB: predicated region body
PF: predicated region fallthrough
CT: control target
= control target key end

     0   :  { %11 = vsyncpa [#allocation3], 0  ;;  %s9145_s0 = inlined_call_operand.hbm [shape: bf16[2,128,768], index: 0, kind: input, shape index: {}]   ;;  %s9146_s1 = inlined_call_operand.hbm [shape: f32[2,128], index: 1, kind: input, shape index: {}]   ;;  %s9147_s2 = inlined_call_operand.vmem [shape: f32[1,1,768], index: 2, kind: input, shape index: {}]   ;;  %s9148_s3 = inlined_call_operand.hbm [shape: f32[1,1,768], index: 3, kind: input, shape index: {}]   ;;  %s9149_s4 = inlined_call_operand.hbm [shape: bf16[768,512], index: 4, kind: input, shape index: {}]   ;;  %s9150_s5 = inlined_call_operand.vmem [shape: f32[1,512], index: 5, kind: input, shape index: {}]   ;;  %s9151_s6 = inlined_call_operand.hbm [shape: f32[2,512], index: 6, kind: output, shape index: {}]  }
   0x1   :  { %12 = vsyncpa [#allocation6], 0 }
   0x2   :  { %13 = vsyncpa [#allocation9], 0 }
   0x3   :  { %14 = vsyncpa [#allocation4], 0  ;;  %s4759_s21 = smov [#allocation5]   ;;  %s4760_s23 = smov [#allocation2]  }
   0x4   :  { %s33_s22 = sshll.u32 %s4759_s21, 4  ;;  %s20_s24 = sshll.u32 %s4760_s23, 4  ;;  %s34_s22 = int_to_ptr.vmem [resolvable:$true] %s33_s22  ;;  %s4804_s24 = int_to_ptr.vmem [resolvable:$true] %s20_s24 }
   0x5   :  { %s4641_s27 = scalar_lea.hbm %s9146_s1, 32 }
   0x6   :  { %p4642_p0 = scmp.ne.s32.totalorder %s9146_s1, %s4641_s27  ;;  %p4645_p1 = scmp.lt.u32.totalorder %s4641_s27, %s9146_s1 }
   0x8   :  { %p4647_p2 = pnand %p4645_p1, %p4642_p0 }
   0xa   :  { %4650 = shalt.err (!%p4647_p2)
}
   0xb   :  { %s4651_s8 = scalar_lea.vmem %s34_s22, 32  ;;  %p4656_p4 = scmp.lt.s32.totalorder %s34_s22, %s34_s22 }
   0xc   :  { %p4652_p3 = scmp.ne.s32.totalorder %s34_s22, %s4651_s8  ;;  %p4657_p5 = scmp.lt.s32.totalorder %s4651_s8, %s4651_s8 }
   0xe   :  { %p4658_p6 = por %p4657_p5, %p4656_p4 }
  0x10   :  { %p4659_p7 = pnand %p4658_p6, %p4652_p3 }
  0x12   :  { %4662 = shalt.err (!%p4659_p7)
}
  0x13   :  { %36 = dma.hbm_to_vmem [thread:$0]  %s9146_s1, 32, %s34_s22, [#allocation6]  }
  0x14   :  { %s4663_s13 = scalar_lea.hbm %s9145_s0, 12288 }
  0x15   :  { %p4664_p8 = scmp.ne.s32.totalorder %s9145_s0, %s4663_s13  ;;  %p4667_p9 = scmp.lt.u32.totalorder %s4663_s13, %s9145_s0 }
  0x17   :  { %p4669_p10 = pnand %p4667_p9, %p4664_p8 }
  0x19   :  { %4672 = shalt.err (!%p4669_p10)
}
  0x1a   :  { %s4673_s18 = scalar_lea.vmem %s4804_s24, 12288  ;;  %p4678_p12 = scmp.lt.s32.totalorder %s4804_s24, %s4804_s24 }
  0x1b   :  { %p4674_p11 = scmp.ne.s32.totalorder %s4804_s24, %s4673_s18  ;;  %p4679_p13 = scmp.lt.s32.totalorder %s4673_s18, %s4673_s18 }
  0x1d   :  { %p4680_p0 = por %p4679_p13, %p4678_p12 }
  0x1f   :  { %p4681_p1 = pnand %p4680_p0, %p4674_p11 }
  0x21   :  { %4684 = shalt.err (!%p4681_p1)
}
  0x22   :  { %s4761_s1 = smov 384   ;;  %s4762_s19 = smov 24  }
  0x23   :  { %26 = dma.hbm_to_vmem [thread:$0]  %s9145_s0, 12288, %s4804_s24, [#allocation3], %s4761_s1, %s4761_s1, %s4762_s19  }
  0x24   :  { %s4763_s22 = smov [#allocation7]   ;;  %s4764_s25 = smov [#allocation8]  }
  0x25   :  { %s45_s23 = sshll.u32 %s4763_s22, 4  ;;  %s54_s26 = sshll.u32 %s4764_s25, 4  ;;  %s46_s23 = int_to_ptr.vmem [resolvable:$true] %s45_s23  ;;  %s4835_s26 = int_to_ptr.vmem [resolvable:$true] %s54_s26 }
  0x26   :  { %s4685_s29 = scalar_lea.hbm %s9148_s3, 96 }
  0x27   :  { %p4686_p2 = scmp.ne.s32.totalorder %s9148_s3, %s4685_s29  ;;  %p4689_p3 = scmp.lt.u32.totalorder %s4685_s29, %s9148_s3 }
  0x29   :  { %p4691_p4 = pnand %p4689_p3, %p4686_p2 }
  0x2b   :  { %4694 = shalt.err (!%p4691_p4)
}
  0x2c   :  { %s4695_s0 = scalar_lea.vmem %s46_s23, 96  ;;  %p4700_p6 = scmp.lt.s32.totalorder %s46_s23, %s46_s23 }
  0x2d   :  { %p4696_p5 = scmp.ne.s32.totalorder %s46_s23, %s4695_s0  ;;  %p4701_p7 = scmp.lt.s32.totalorder %s4695_s0, %s4695_s0 }
  0x2f   :  { %p4702_p8 = por %p4701_p7, %p4700_p6 }
  0x31   :  { %p4703_p9 = pnand %p4702_p8, %p4696_p5 }
  0x33   :  { %4706 = shalt.err (!%p4703_p9)
}
  0x34   :  { %48 = dma.hbm_to_vmem [thread:$0]  %s9148_s3, 96, %s46_s23, [#allocation6]  }
  0x35   :  { %s4707_s13 = scalar_lea.hbm %s9149_s4, 24576 }
  0x36   :  { %p4708_p10 = scmp.ne.s32.totalorder %s9149_s4, %s4707_s13  ;;  %p4711_p11 = scmp.lt.u32.totalorder %s4707_s13, %s9149_s4 }
  0x38   :  { %p4713_p12 = pnand %p4711_p11, %p4708_p10 }
  0x3a   :  { %4716 = shalt.err (!%p4713_p12)
}
  0x3b   :  { %s4717_s18 = scalar_lea.vmem %s4835_s26, 24576  ;;  %p4722_p0 = scmp.lt.s32.totalorder %s4835_s26, %s4835_s26 }
  0x3c   :  { %p4718_p13 = scmp.ne.s32.totalorder %s4835_s26, %s4717_s18  ;;  %p4723_p1 = scmp.lt.s32.totalorder %s4717_s18, %s4717_s18 }
  0x3e   :  { %p4724_p2 = por %p4723_p1, %p4722_p0 }
  0x40   :  { %p4725_p3 = pnand %p4724_p2, %p4718_p13 }
  0x42   :  { %4728 = shalt.err (!%p4725_p3)
}
  0x43   :  { %s4765_s3 = smov 256   ;;  %s4766_s1 = smov 16  }
  0x44   :  { %60 = dma.hbm_to_vmem [thread:$0]  %s9149_s4, 24576, %s4835_s26, [#allocation9], %s4765_s3, %s4765_s3, %s4766_s1  }
  0x45   :  { %4751 = dma.done.wait [#allocation3], 12288  }
  0x46   :  { %4752 = vsyncadd [#allocation3], 4294955008 }
  0x47   :  { %4753 = dma.done.wait [#allocation6], 128  }
  0x48   :  { %4754 = vsyncadd [#allocation6], 4294967168 }
  0x49   :  { %4755 = dma.done.wait [#allocation9], 24576  }
  0x4a   :  { %4756 = vsyncadd [#allocation9], 4294942720  ;;  %v4866_v0 = vld [vmem:[#allocation2] sm:$0xff]  ;;  %v4868_v1 = vld [vmem:[#allocation2 + $0x8] sm:$0xff]  ;;  %vm1965_vm0 = vcmask 1041408   ;;  %vm2800_vm1 = vcmask 1041409  }
  0x4b   :  { %v4870_v2 = vld [vmem:[#allocation2 + $0x10] sm:$0xff]  ;;  %v9208_v3 = vunpack.c.l.bf16 %v4866_v0  ;;  %v9206_v4 = vunpack.c.h.bf16 %v4866_v0  ;;  %v9201_v5 = vunpack.c.l.bf16 %v4868_v1  ;;  %v4875_v6 = vld [vmem:[#allocation2 + $0x18] sm:$0xff]  ;;  %v4877_v7 = vld [vmem:[#allocation2 + $0x20] sm:$0xff]  ;;  %v9198_v13 = vunpack.c.h.bf16 %v4868_v1 }
  0x4c   :  { %v4879_v8 = vld [vmem:[#allocation2 + $0x28] sm:$0xff]  ;;  %v9204_v9 = vunpack.c.l.bf16 %v4875_v6  ;;  %v9202_v10 = vunpack.c.h.bf16 %v4875_v6  ;;  %v4883_v11 = vld [vmem:[#allocation2 + $0x30] sm:$0xff]  ;;  %v4885_v12 = vld [vmem:[#allocation2 + $0x38] sm:$0xff]  ;;  %v9193_v14 = vunpack.c.l.bf16 %v4870_v2  ;;  %v9188_v16 = vunpack.c.l.bf16 %v4877_v7 }
  0x4d   :  { %v363_v15 = vadd.f32 %v9206_v4, %v9208_v3  ;;  %v4894_v17 = vld [vmem:[#allocation2 + $0x48] sm:$0xff]  ;;  %v9187_v18 = vunpack.c.h.bf16 %v4877_v7  ;;  %v9186_v20 = vunpack.c.l.bf16 %v4883_v11  ;;  %v9183_v21 = vunpack.c.h.bf16 %v4883_v11  ;;  %v4903_v22 = vld [vmem:[#allocation2 + $0x50] sm:$0xff]  ;;  %v4909_v26 = vld [vmem:[#allocation2 + $0x40] sm:$0xff] }
  0x4e   :  { %v370_v19 = vadd.f32 %v9202_v10, %v9204_v9  ;;  %v9192_v23 = vunpack.c.h.bf16 %v4870_v2  ;;  %v9179_v25 = vunpack.c.l.bf16 %v4879_v8  ;;  %v9167_v27 = vunpack.c.l.bf16 %v4885_v12  ;;  %v4920_v32 = vld [vmem:[#allocation2 + $0x60] sm:$0xff]  ;;  %v4927_v37 = vld [vmem:[#allocation2 + $0x68] sm:$0xff]  ;;  %v4934_v41 = vld [vmem:[#allocation2 + $0x58] sm:$0xff] }
  0x4f   :  { %v364_v24 = vadd.f32 %v363_v15, %v9201_v5  ;;  %v9164_v29 = vunpack.c.h.bf16 %v4885_v12  ;;  %v377_v30 = vadd.f32 %v9183_v21, %v9186_v20  ;;  %v9175_v31 = vunpack.c.l.bf16 %v4894_v17  ;;  %v4945_v47 = vld [vmem:[#allocation2 + $0x78] sm:$0xff]  ;;  %v4952_v51 = vld [vmem:[#allocation2 + $0x80] sm:$0xff]  ;;  %v4968_v60 = vld [vmem:[#allocation2 + $0x90] sm:$0xff] }
  0x50   :  { %v371_v28 = vadd.f32 %v370_v19, %v9188_v16  ;;  %v9178_v34 = vunpack.c.h.bf16 %v4879_v8  ;;  %v9174_v35 = vunpack.c.h.bf16 %v4894_v17  ;;  %v9156_v36 = vunpack.c.l.bf16 %v4903_v22  ;;  %v4974_v63 = vld [vmem:[#allocation2 + $0x70] sm:$0xff]  ;;  %v5075_v21 = vld [vmem:[#allocation2 + $0xe8] sm:$0xff]  ;;  %v5087_v20 = vld [vmem:[#allocation2 + $0x120] sm:$0xff] }
  0x51   :  { %v365_v33 = vadd.f32 %v364_v24, %v9198_v13  ;;  %v9163_v39 = vunpack.c.l.bf16 %v4909_v26  ;;  %v378_v40 = vadd.f32 %v377_v30, %v9167_v27  ;;  %v9152_v42 = vunpack.c.h.bf16 %v4903_v22  ;;  %v4978_v24 = vld [vmem:[#allocation2 + $0x98] sm:$0xff]  ;;  %9659 = vst [vmem:[#allocation20_spill] sm:$0xff] %v5075_v21  ;;  %9661 = vst [vmem:[#allocation22_spill] sm:$0xff] %v5087_v20 }
  0x52   :  { %v372_v38 = vadd.f32 %v371_v28, %v9187_v18  ;;  %v384_v44 = vadd.f32 %v9174_v35, %v9175_v31  ;;  %v9172_v45 = vunpack.c.l.bf16 %v4920_v32  ;;  %v9170_v46 = vunpack.c.h.bf16 %v4920_v32 }
  0x53   :  { %v366_v43 = vadd.f32 %v365_v33, %v9193_v14  ;;  %v379_v49 = vadd.f32 %v378_v40, %v9164_v29  ;;  %v9155_v50 = vunpack.c.l.bf16 %v4927_v37  ;;  %v9157_v53 = vunpack.c.h.bf16 %v4909_v26  ;;  %v5031_v29 = vld [vmem:[#allocation2 + $0xd8] sm:$0xff]  ;;  %v5100_v14 = vld [vmem:[#allocation2 + $0x100] sm:$0xff] }
  0x54   :  { %v373_v48 = vadd.f32 %v372_v38, %v9179_v25  ;;  %v9160_v54 = vunpack.c.l.bf16 %v4934_v41  ;;  %v385_v55 = vadd.f32 %v384_v44, %v9156_v36  ;;  %v9159_v57 = vunpack.c.h.bf16 %v4927_v37  ;;  %v4991_v44 = vld [vmem:[#allocation2 + $0xb0] sm:$0xff]  ;;  %9654 = vst [vmem:[#allocation15_spill] sm:$0xff] %v5031_v29  ;;  %v5068_v25 = vld [vmem:[#allocation2 + $0x108] sm:$0xff]  ;;  %9662 = vst [vmem:[#allocation23_spill] sm:$0xff] %v5100_v14 }
  0x55   :  { %v367_v52 = vadd.f32 %v366_v43, %v9192_v23  ;;  %v380_v56 = vadd.f32 %v379_v49, %v9163_v39  ;;  %v391_v58 = vadd.f32 %v9170_v46, %v9172_v45  ;;  %v9154_v59 = vunpack.c.l.bf16 %v4945_v47  ;;  %v4989_v43 = vld [vmem:[#allocation2 + $0xa8] sm:$0xff]  ;;  %v5051_v45 = vld [vmem:[#allocation2 + $0xf0] sm:$0xff]  ;;  %9658 = vst [vmem:[#allocation19_spill] sm:$0xff] %v5068_v25 }
  0x56   :  { %v374_v61 = vadd.f32 %v373_v48, %v9178_v34  ;;  %v386_v62 = vadd.f32 %v385_v55, %v9152_v42  ;;  %v9153_v15 = vunpack.c.h.bf16 %v4945_v47  ;;  %v9158_v19 = vunpack.c.l.bf16 %v4952_v51  ;;  %v4997_v55 = vld [vmem:[#allocation2 + $0x88] sm:$0xff]  ;;  %9656 = vst [vmem:[#allocation17_spill] sm:$0xff] %v5051_v45 }
  0x57   :  { %368 = vadd.xlane.f32.xlu0 %v367_v52  ;;  %v392_v28 = vadd.f32 %v391_v58, %v9155_v50  ;;  %v9165_v30 = vunpack.c.h.bf16 %v4952_v51  ;;  %v9162_v38 = vunpack.c.l.bf16 %v4968_v60  ;;  %v9161_v40 = vunpack.c.h.bf16 %v4968_v60  ;;  %v5010_v50 = vld [vmem:[#allocation2 + $0xc0] sm:$0xff] }
  0x58   :  { %v398_v33 = vadd.f32 %v9153_v15, %v9154_v59  ;;  %v381_v48 = vadd.f32 %v380_v56, %v9157_v53  ;;  %v9171_v49 = vunpack.c.h.bf16 %v4934_v41  ;;  %v9173_v52 = vunpack.c.l.bf16 %v4974_v63 }
  0x59   :  { %v9166_v58 = vunpack.c.l.bf16 %v4978_v24  ;;  %v387_v42 = vadd.f32 %v386_v62, %v9160_v54  ;;  %v393_v15 = vadd.f32 %v392_v28, %v9159_v57  ;;  %v405_v56 = vadd.f32 %v9161_v40, %v9162_v38  ;;  %v5028_v38 = vld [vmem:[#allocation2 + $0xc8] sm:$0xff] }
  0x5a   :  { %v399_v59 = vadd.f32 %v398_v33, %v9158_v19  ;;  %v9177_v36 = vunpack.c.h.bf16 %v4978_v24  ;;  %v9168_v53 = vunpack.c.h.bf16 %v4989_v43  ;;  %v9176_v62 = vunpack.c.l.bf16 %v4991_v44  ;;  %v5019_v19 = vld [vmem:[#allocation2 + $0xa0] sm:$0xff] }
  0x5b   :  { %375 = vadd.xlane.f32.xlu0 %v374_v61  ;;  %v9169_v61 = vunpack.c.l.bf16 %v4989_v43  ;;  %v9180_v28 = vunpack.c.l.bf16 %v4997_v55  ;;  %v406_v57 = vadd.f32 %v405_v56, %v9166_v58  ;;  %v9184_v54 = vunpack.c.h.bf16 %v4991_v44  ;;  %v5038_v58 = vld [vmem:[#allocation2 + $0xb8] sm:$0xff] }
  0x5c   :  { %v400_v33 = vadd.f32 %v399_v59, %v9165_v30  ;;  %v9182_v39 = vunpack.c.l.bf16 %v5010_v50  ;;  %v388_v59 = vadd.f32 %v387_v42, %v9171_v49  ;;  %v9185_v30 = vunpack.c.h.bf16 %v4974_v63  ;;  %v5049_v49 = vld [vmem:[#allocation2 + $0xd0] sm:$0xff] }
  0x5d   :  { %v412_v40 = vadd.f32 %v9168_v53, %v9169_v61  ;;  %v394_v56 = vadd.f32 %v393_v15, %v9173_v52  ;;  %v9181_v27 = vunpack.c.h.bf16 %v5010_v50  ;;  %v5041_v53 = vld [vmem:[#allocation2 + $0xe0] sm:$0xff]  ;;  %v9194_v61 = vunpack.c.h.bf16 %v4997_v55  ;;  %v5053_v15 = vld [vmem:[#allocation2 + $0xf8] sm:$0xff] }
  0x5e   :  { %9655 = vst [vmem:[#allocation16_spill] sm:$0xff] %v5041_v53  ;;  %v9189_v46 = vunpack.c.l.bf16 %v5019_v19  ;;  %9657 = vst [vmem:[#allocation18_spill] sm:$0xff] %v5053_v15  ;;  %v401_v52 = vadd.f32 %v400_v33, %v9180_v28  ;;  %v9195_v35 = vunpack.c.l.bf16 %v5028_v38  ;;  %v9197_v34 = vunpack.c.l.bf16 %v5041_v53 }
  0x5f   :  { %382 = vadd.xlane.f32.xlu0 %v381_v48  ;;  %v407_v48 = vadd.f32 %v406_v57, %v9177_v36  ;;  %v413_v42 = vadd.f32 %v412_v40, %v9176_v62  ;;  %v419_v31 = vadd.f32 %v9181_v27, %v9182_v39  ;;  %v9191_v57 = vunpack.c.l.bf16 %v5031_v29 }
  0x60   :  { %v9196_v40 = vunpack.c.l.bf16 %v5038_v58  ;;  %v9190_v36 = vunpack.c.h.bf16 %v5031_v29  ;;  %v395_v33 = vadd.f32 %v394_v56, %v9185_v30  ;;  %v9203_v28 = vunpack.c.h.bf16 %v5019_v19  ;;  %v5085_v30 = vld [vmem:[#allocation2 + $0x110] sm:$0xff]  ;;  %v5320_v29 = vld [vmem:[#allocation2 + $0x1f8] sm:$0xff] }
  0x61   :  { %v414_v62 = vadd.f32 %v413_v42, %v9184_v54  ;;  %v9212_v27 = vunpack.c.h.bf16 %v5038_v58  ;;  %v9207_v39 = vunpack.c.h.bf16 %v5028_v38  ;;  %v408_v42 = vadd.f32 %v407_v48, %v9189_v46  ;;  %9660 = vst [vmem:[#allocation21_spill] sm:$0xff] %v5085_v30  ;;  %9713 = vst [vmem:[#allocation45_spill] sm:$0xff] %v5320_v29 }
  0x62   :  { %v426_v54 = vadd.f32 %v9190_v36, %v9191_v57  ;;  %v9199_v56 = vunpack.c.h.bf16 %v5051_v45  ;;  %v402_v18 = vadd.f32 %v401_v52, %v9194_v61  ;;  %v9219_v16 = vunpack.c.l.bf16 %v5049_v49  ;;  %v5106_v61 = vld [vmem:[#allocation2 + $0x128] sm:$0xff] }
  0x63   :  { %389 = vadd.xlane.f32.xlu0 %v388_v59  ;;  %v9200_v59 = vunpack.c.l.bf16 %v5051_v45  ;;  %v420_v48 = vadd.f32 %v419_v31, %v9195_v35  ;;  %v9205_v46 = vunpack.c.l.bf16 %v5053_v15  ;;  %v415_v36 = vadd.f32 %v414_v62, %v9196_v40  ;;  %9663 = vst [vmem:[#allocation24_spill] sm:$0xff] %v5106_v61 }
  0x64   :  { %v9211_v57 = vunpack.c.h.bf16 %v5041_v53  ;;  %v427_v23 = vadd.f32 %v426_v54, %v9197_v34  ;;  %v9214_v31 = vunpack.c.h.bf16 %v5053_v15  ;;  %v9210_v35 = vunpack.c.l.bf16 %v5068_v25  ;;  %v5169_v34 = vld [vmem:[#allocation2 + $0x148] sm:$0xff]  ;;  %v5286_v15 = vld [vmem:[#allocation2 + $0x1d0] sm:$0xff] }
  0x65   :  { %v433_v52 = vadd.f32 %v9199_v56, %v9200_v59  ;;  %v9209_v62 = vunpack.c.h.bf16 %v5068_v25  ;;  %v9213_v40 = vunpack.c.l.bf16 %v5085_v30  ;;  %v409_v54 = vadd.f32 %v408_v42, %v9203_v28  ;;  %v5118_v59 = vld [vmem:[#allocation2 + $0x118] sm:$0xff]  ;;  %v5129_v28 = vld [vmem:[#allocation2 + $0x130] sm:$0xff]  ;;  %9670 = vst [vmem:[#allocation31_spill] sm:$0xff] %v5169_v34  ;;  %9704 = vst [vmem:[#allocation43_spill] sm:$0xff] %v5286_v15 }
  0x66   :  { %v9218_v13 = vunpack.c.l.bf16 %v5075_v21  ;;  %9664 = vst [vmem:[#allocation25_spill] sm:$0xff] %v5118_v59  ;;  %v421_v5 = vadd.f32 %v420_v48, %v9207_v39  ;;  %v9217_v10 = vunpack.c.h.bf16 %v5085_v30  ;;  %9666 = vst [vmem:[#allocation27_spill] sm:$0xff] %v5129_v28  ;;  %v9216_v9 = vunpack.c.l.bf16 %v5087_v20  ;;  %v5137_v39 = vld [vmem:[#allocation2 + $0x140] sm:$0xff]  ;;  %v5205_v30 = vld [vmem:[#allocation2 + $0x178] sm:$0xff] }
  0x67   :  { %396 = vadd.xlane.f32.xlu0 %v395_v33  ;;  %v434_v56 = vadd.f32 %v433_v52, %v9205_v46  ;;  %v5120_v33 = vld [vmem:[#allocation2 + $0x138] sm:$0xff]  ;;  %v440_v42 = vadd.f32 %v9209_v62, %v9210_v35  ;;  %v428_v46 = vadd.f32 %v427_v23, %v9211_v57  ;;  %v9215_v4 = vunpack.c.h.bf16 %v5087_v20  ;;  %9667 = vst [vmem:[#allocation28_spill] sm:$0xff] %v5137_v39  ;;  %v5243_v25 = vld [vmem:[#allocation2 + $0x1b0] sm:$0xff] }
  0x68   :  { %9665 = vst [vmem:[#allocation26_spill] sm:$0xff] %v5120_v33  ;;  %v9220_v48 = vunpack.c.l.bf16 %v5106_v61  ;;  %v416_v3 = vadd.f32 %v415_v36, %v9212_v27  ;;  %v9221_v62 = vunpack.c.l.bf16 %v5100_v14  ;;  %v5153_v36 = vld [vmem:[#allocation2 + $0x150] sm:$0xff]  ;;  %v5155_v27 = vld [vmem:[#allocation2 + $0x158] sm:$0xff]  ;;  %9682 = vst [vmem:[#allocation35_spill] sm:$0xff] %v5205_v30 }
  0x69   :  { %v435_v35 = vadd.f32 %v434_v56, %v9214_v31  ;;  %v441_v52 = vadd.f32 %v440_v42, %v9213_v40  ;;  %9668 = vst [vmem:[#allocation29_spill] sm:$0xff] %v5153_v36  ;;  %9669 = vst [vmem:[#allocation30_spill] sm:$0xff] %v5155_v27  ;;  %v422_v56 = vadd.f32 %v421_v5, %v9219_v16  ;;  %v9222_v40 = vunpack.c.h.bf16 %v5120_v33  ;;  %v5171_v5 = vld [vmem:[#allocation2 + $0x168] sm:$0xff]  ;;  %v5186_v31 = vld [vmem:[#allocation2 + $0x160] sm:$0xff] }
  0x6a   :  { %v429_v57 = vadd.f32 %v428_v46, %v9218_v13  ;;  %9671 = vst [vmem:[#allocation32_spill] sm:$0xff] %v5171_v5  ;;  %9675 = vst [vmem:[#allocation33_spill] sm:$0xff] %v5186_v31  ;;  %v9677_v16 = vunpack.c.l.bf16 %v5137_v39  ;;  %v5209_v13 = vld [vmem:[#allocation2 + $0x188] sm:$0xff] }
  0x6b   :  { %403 = vadd.xlane.f32.xlu0 %v402_v18  ;;  %v447_v18 = vadd.f32 %v9215_v4, %v9216_v9  ;;  %v442_v42 = vadd.f32 %v441_v52, %v9217_v10  ;;  %v436_v52 = vadd.f32 %v435_v35, %v9221_v62  ;;  %v9672_v10 = vunpack.c.l.bf16 %v5120_v33  ;;  %v5189_v62 = vld [vmem:[#allocation2 + $0x180] sm:$0xff]  ;;  %9683 = vst [vmem:[#allocation36_spill] sm:$0xff] %v5209_v13 }
  0x6c   :  { %v9674_v4 = vunpack.c.h.bf16 %v5106_v61  ;;  %v9678_v33 = vunpack.c.l.bf16 %v5153_v36  ;;  %9694 = vst [vmem:[#allocation40_spill] sm:$0xff] %v5243_v25 }
  0x6d   :  { %v448_v23 = vadd.f32 %v447_v18, %v9220_v48  ;;  %v454_v46 = vadd.f32 %v9222_v40, %v9672_v10  ;;  %v9673_v18 = vunpack.c.l.bf16 %v5118_v59  ;;  %v9676_v10 = vunpack.c.h.bf16 %v5049_v49 }
  0x6f   :  { %410 = vadd.xlane.f32.xlu0 %v409_v54  ;;  %v443_v48 = vadd.f32 %v442_v42, %v9673_v18  ;;  %v449_v54 = vadd.f32 %v448_v23, %v9674_v4  ;;  %v423_v40 = vadd.f32 %v422_v56, %v9676_v10  ;;  %v455_v9 = vadd.f32 %v454_v46, %v9677_v16  ;;  %v5200_v4 = vld [vmem:[#allocation2 + $0x170] sm:$0xff] }
  0x70   :  { %v9679_v42 = vunpack.c.h.bf16 %v5153_v36  ;;  %9680 = vst [vmem:[#allocation34_spill] sm:$0xff] %v5200_v4  ;;  %v9681_v23 = vunpack.c.h.bf16 %v5075_v21  ;;  %v9684_v16 = vunpack.c.h.bf16 %v5100_v14  ;;  %v5225_v14 = vld [vmem:[#allocation2 + $0x190] sm:$0xff]  ;;  %v9699_v10 = vunpack.c.l.bf16 %v5169_v34  ;;  %v5301_v21 = vld [vmem:[#allocation2 + $0x1d8] sm:$0xff] }
  0x71   :  { %9688 = vst [vmem:[#allocation37_spill] sm:$0xff] %v5225_v14 }
  0x72   :  { %v461_v18 = vadd.f32 %v9679_v42, %v9678_v33  ;;  %v430_v35 = vadd.f32 %v429_v57, %v9681_v23  ;;  %v437_v46 = vadd.f32 %v436_v52, %v9684_v16  ;;  %v9685_v33 = vunpack.c.l.bf16 %v5129_v28  ;;  %v5227_v52 = vld [vmem:[#allocation2 + $0x198] sm:$0xff]  ;;  %v5264_v57 = vld [vmem:[#allocation2 + $0x1c8] sm:$0xff] }
  0x73   :  { %417 = vadd.xlane.f32.xlu0 %v416_v3  ;;  %v9686_v23 = vunpack.c.h.bf16 %v5118_v59  ;;  %v9687_v3 = vunpack.c.l.bf16 %v5155_v27  ;;  %9689 = vst [vmem:[#allocation38_spill] sm:$0xff] %v5227_v52  ;;  %v9691_v16 = vunpack.c.h.bf16 %v5137_v39  ;;  %9698 = vst [vmem:[#allocation42_spill] sm:$0xff] %v5264_v57  ;;  %v9701_v59 = vunpack.c.l.bf16 %v5200_v4 }
  0x74   :  { %v450_v42 = vadd.f32 %v449_v54, %v9685_v33  ;;  %v5229_v54 = vld [vmem:[#allocation2 + $0x1a0] sm:$0xff]  ;;  %v9702_v39 = vunpack.c.l.bf16 %v5227_v52 }
  0x75   :  { %v5219_v61 = vadd.f32 %v443_v48, %v9686_v23  ;;  %v462_v20 = vadd.f32 %v461_v18, %v9687_v3  ;;  %9690 = vst [vmem:[#allocation39_spill] sm:$0xff] %v5229_v54  ;;  %v456_v33 = vadd.f32 %v455_v9, %v9691_v16  ;;  %v9244_v48 = vunpack.c.l.bf16 %v5189_v62 }
  0x76   :  { %v9243_v23 = vunpack.c.h.bf16 %v5189_v62  ;;  %v9692_v18 = vunpack.c.l.bf16 %v5171_v5  ;;  %v9693_v3 = vunpack.c.h.bf16 %v5171_v5  ;;  %v9695_v9 = vunpack.c.h.bf16 %v5129_v28  ;;  %v5255_v5 = vld [vmem:[#allocation2 + $0x1a8] sm:$0xff] }
  0x77   :  { %424 = vadd.xlane.f32.xlu0 %v423_v40  ;;  %9696 = vst [vmem:[#allocation41_spill] sm:$0xff] %v5255_v5  ;;  %v5268_v28 = vadd.f32 %v456_v33, %v9699_v10  ;;  %v5274_v40 = vld [vmem:[#allocation2 + $0x1c0] sm:$0xff]  ;;  %v9703_v10 = vunpack.c.h.bf16 %v5227_v52  ;;  %v9718_v53 = vunpack.c.l.bf16 %v5255_v5 }
  0x78   :  { %v468_v56 = vadd.f32 %v9693_v3, %v9692_v18  ;;  %v5247_v16 = vadd.f32 %v450_v42, %v9695_v9  ;;  %v475_v36 = vadd.f32 %v9243_v23, %v9244_v48  ;;  %v9697_v18 = vunpack.c.h.bf16 %v5155_v27  ;;  %v5262_v9 = vld [vmem:[#allocation2 + $0x1b8] sm:$0xff] }
  0x79   :  { %v482_v33 = vadd.f32 %v9703_v10, %v9702_v39  ;;  %v9706_v27 = vunpack.c.l.bf16 %v5186_v31  ;;  %v9707_v10 = vunpack.c.l.bf16 %v5229_v54  ;;  %v9265_v39 = vunpack.c.l.bf16 %v5264_v57 }
  0x7a   :  { %v463_v3 = vadd.f32 %v462_v20, %v9697_v18  ;;  %v9700_v20 = vunpack.c.l.bf16 %v5209_v13  ;;  %v5278_v42 = vadd.f32 %v468_v56, %v9701_v59  ;;  %v9710_v59 = vunpack.c.l.bf16 %v5243_v25 }
  0x7b   :  { %431 = vadd.xlane.f32.xlu0 %v430_v35  ;;  %v483_v23 = vadd.f32 %v482_v33, %v9707_v10  ;;  %v9712_v35 = vunpack.c.h.bf16 %v5229_v54  ;;  %v9716_v10 = vunpack.c.h.bf16 %v5264_v57 }
  0x7c   :  { %v476_v18 = vadd.f32 %v475_v36, %v9700_v20  ;;  %v9705_v20 = vunpack.c.h.bf16 %v5209_v13  ;;  %v5295_v45 = vadd.f32 %v463_v3, %v9706_v27  ;;  %v5303_v36 = vld [vmem:[#allocation2 + $0x1e0] sm:$0xff]  ;;  %v9711_v27 = vunpack.c.h.bf16 %v5243_v25  ;;  %v5355_v25 = vld [vmem:[#allocation2 + $0x208] sm:$0xff] }
  0x7d   :  { %9708 = vst [vmem:[#allocation44_spill] sm:$0xff] %v5303_v36  ;;  %v484_v13 = vadd.f32 %v483_v23, %v9712_v35  ;;  %v496_v23 = vadd.f32 %v9716_v10, %v9265_v39  ;;  %v5331_v35 = vld [vmem:[#allocation2 + $0x1f0] sm:$0xff]  ;;  %v9721_v10 = vunpack.c.h.bf16 %v5262_v9  ;;  %v9724_v57 = vunpack.c.l.bf16 %v5303_v36  ;;  %9726 = vst [vmem:[#allocation49_spill] sm:$0xff] %v5355_v25 }
  0x7e   :  { %v477_v48 = vadd.f32 %v476_v18, %v9705_v20  ;;  %v5305_v18 = vld [vmem:[#allocation2 + $0x1e8] sm:$0xff]  ;;  %v9709_v20 = vunpack.c.l.bf16 %v5225_v14  ;;  %v489_v3 = vadd.f32 %v9711_v27, %v9710_v59  ;;  %v9715_v59 = vunpack.c.l.bf16 %v5262_v9  ;;  %9717 = vst [vmem:[#allocation46_spill] sm:$0xff] %v5331_v35 }
  0x7f   :  { %438 = vadd.xlane.f32.xlu0 %v437_v46  ;;  %v485_v52 = vadd.f32 %v484_v13, %v9718_v53  ;;  %v9722_v13 = vunpack.c.l.bf16 %v5286_v15  ;;  %v9723_v46 = vunpack.c.h.bf16 %v5255_v5  ;;  %v5374_v5 = vld [vmem:[#allocation2 + $0x230] sm:$0xff] }
  0x80   :  { %v478_v56 = vadd.f32 %v477_v48, %v9709_v20  ;;  %v9714_v48 = vunpack.c.h.bf16 %v5225_v14  ;;  %v490_v27 = vadd.f32 %v489_v3, %v9715_v59  ;;  %v5340_v3 = vld [vmem:[#allocation2 + $0x210] sm:$0xff]  ;;  %v9725_v14 = vunpack.c.h.bf16 %v5303_v36  ;;  %9732 = vst [vmem:[#allocation52_spill] sm:$0xff] %v5374_v5 }
  0x81   :  { %9720 = vst [vmem:[#allocation48_spill] sm:$0xff] %v5340_v3  ;;  %v497_v53 = vadd.f32 %v496_v23, %v9722_v13  ;;  %v486_v54 = vadd.f32 %v485_v52, %v9723_v46  ;;  %v9728_v23 = vunpack.c.l.bf16 %v5274_v40  ;;  %v9729_v52 = vunpack.c.h.bf16 %v5286_v15  ;;  %v5390_v15 = vld [vmem:[#allocation2 + $0x220] sm:$0xff] }
  0x82   :  { %v479_v20 = vadd.f32 %v478_v56, %v9714_v48  ;;  %v5338_v48 = vld [vmem:[#allocation2 + $0x200] sm:$0xff]  ;;  %v491_v39 = vadd.f32 %v490_v27, %v9721_v10  ;;  %v5358_v27 = vld [vmem:[#allocation2 + $0x218] sm:$0xff]  ;;  %v9278_v13 = vunpack.c.h.bf16 %v5320_v29  ;;  %v9730_v59 = vunpack.c.l.bf16 %v5305_v18  ;;  %9738 = vst [vmem:[#allocation53_spill] sm:$0xff] %v5390_v15 }
  0x83   :  { %9719 = vst [vmem:[#allocation47_spill] sm:$0xff] %v5338_v48  ;;  %9727 = vst [vmem:[#allocation50_spill] sm:$0xff] %v5358_v27  ;;  %445 = vadd.xlane.f32.xlu0 %v5219_v61  ;;  %v498_v46 = vadd.f32 %v497_v53, %v9729_v52  ;;  %v5372_v61 = vld [vmem:[#allocation2 + $0x228] sm:$0xff]  ;;  %v9737_v56 = vunpack.c.h.bf16 %v5305_v18 }
  0x84   :  { %480 = vadd.xlane.f32.xlu1 %v479_v20  ;;  %v503_v20 = vadd.f32 %v9725_v14, %v9724_v57  ;;  %v492_v10 = vadd.f32 %v491_v39, %v9728_v23  ;;  %9731 = vst [vmem:[#allocation51_spill] sm:$0xff] %v5372_v61  ;;  %v9733_v39 = vunpack.c.h.bf16 %v5274_v40  ;;  %v9734_v23 = vunpack.c.l.bf16 %v5301_v21 }
  0x85   :  { %v9735_v14 = vunpack.c.l.bf16 %v5320_v29  ;;  %v5429_v29 = vld [vmem:[#allocation2 + $0x238] sm:$0xff] }
  0x86   :  { %v504_v33 = vadd.f32 %v503_v20, %v9730_v59  ;;  %v493_v53 = vadd.f32 %v492_v10, %v9733_v39  ;;  %v499_v52 = vadd.f32 %v498_v46, %v9734_v23  ;;  %v9285_v59 = vunpack.c.l.bf16 %v5340_v3  ;;  %v5394_v39 = vld [vmem:[#allocation2 + $0x240] sm:$0xff]  ;;  %9751 = vst [vmem:[#allocation57_spill] sm:$0xff] %v5429_v29 }
  0x87   :  { %v510_v57 = vadd.f32 %v9278_v13, %v9735_v14  ;;  %v9736_v20 = vunpack.c.h.bf16 %v5200_v4  ;;  %9739 = vst [vmem:[#allocation54_spill] sm:$0xff] %v5394_v39  ;;  %452 = vadd.xlane.f32.xlu0 %v5247_v16  ;;  %v9740_v14 = vunpack.c.h.bf16 %v5169_v34  ;;  %v9743_v10 = vunpack.c.l.bf16 %v5331_v35 }
  0x88   :  { %487 = vadd.xlane.f32.xlu1 %v486_v54  ;;  %v505_v54 = vadd.f32 %v504_v33, %v9737_v56  ;;  %v9741_v33 = vunpack.c.l.bf16 %v5338_v48  ;;  %v9744_v16 = vunpack.c.h.bf16 %v5340_v3  ;;  %v9748_v3 = vunpack.c.h.bf16 %v5186_v31 }
  0x89   :  { %v470_v36 = vadd.f32 %v5278_v42, %v9736_v20  ;;  %v458_v23 = vadd.f32 %v5268_v28, %v9740_v14  ;;  %v5404_v20 = vld [vmem:[#allocation2 + $0x248] sm:$0xff]  ;;  %v5414_v14 = vld [vmem:[#allocation2 + $0x258] sm:$0xff]  ;;  %v9746_v42 = vunpack.c.h.bf16 %v5301_v21  ;;  %v9750_v34 = vunpack.c.l.bf16 %v5358_v27 }
  0x8a   :  { %v511_v56 = vadd.f32 %v510_v57, %v9741_v33  ;;  %9742 = vst [vmem:[#allocation55_spill] sm:$0xff] %v5404_v20  ;;  %v506_v46 = vadd.f32 %v505_v54, %v9743_v10  ;;  %v517_v4 = vadd.f32 %v9744_v16, %v9285_v59  ;;  %9745 = vst [vmem:[#allocation56_spill] sm:$0xff] %v5414_v14  ;;  %v9747_v33 = vunpack.c.h.bf16 %v5338_v48 }
  0x8b   :  { %v500_v57 = vadd.f32 %v499_v52, %v9746_v42  ;;  %v465_v16 = vadd.f32 %v5295_v45, %v9748_v3  ;;  %v9749_v59 = vunpack.c.l.bf16 %v5205_v30  ;;  %v9752_v52 = vunpack.c.l.bf16 %v5372_v61  ;;  %459 = vadd.xlane.f32.xlu0 %v458_v23 }
  0x8c   :  { %494 = vadd.xlane.f32.xlu1 %v493_v53  ;;  %v512_v13 = vadd.f32 %v511_v56, %v9747_v33  ;;  %v518_v53 = vadd.f32 %v517_v4, %v9750_v34  ;;  %v9753_v42 = vunpack.c.h.bf16 %v5372_v61  ;;  %v5435_v33 = vld [vmem:[#allocation2 + $0x260] sm:$0xff]  ;;  %v9756_v34 = vunpack.c.h.bf16 %v5331_v35 }
  0x8d   :  { %v471_v28 = vadd.f32 %v470_v36, %v9749_v59  ;;  %9754 = vst [vmem:[#allocation58_spill] sm:$0xff] %v5435_v33  ;;  %v5441_v59 = vld [vmem:[#allocation2 + $0x270] sm:$0xff]  ;;  %v9757_v54 = vunpack.c.l.bf16 %v5355_v25  ;;  %v9759_v10 = vunpack.c.l.bf16 %v5374_v5  ;;  %v9760_v36 = vunpack.c.l.bf16 %v5394_v39 }
  0x8e   :  { %v524_v56 = vadd.f32 %v9753_v42, %v9752_v52  ;;  %9755 = vst [vmem:[#allocation59_spill] sm:$0xff] %v5441_v59  ;;  %v507_v4 = vadd.f32 %v506_v46, %v9756_v34  ;;  %v9758_v42 = vunpack.c.h.bf16 %v5358_v27  ;;  %v9761_v61 = vunpack.c.h.bf16 %v5394_v39  ;;  %v5458_v34 = vld [vmem:[#allocation5] sm:$0x3]  ;;  %v5472_v52 = vld [vmem:[#allocation2 + $0x250] sm:$0xff] }
  0x8f   :  { %v513_v31 = vadd.f32 %v512_v13, %v9757_v54  ;;  %v9301_v46 = vunpack.c.l.bf16 %v5414_v14  ;;  %v9300_v13 = vunpack.c.h.bf16 %v5414_v14  ;;  %466 = vadd.xlane.f32.xlu0 %v465_v16  ;;  %9766 = vst [vmem:[#allocation62_spill] sm:$0xff] %v5472_v52  ;;  %v9308_v39 = vunpack.c.h.bf16 %v5441_v59  ;;  %v5487_v16 = vld [vmem:[#allocation2 + $0x268] sm:$0xff]  ;;  %v5513_v27 = vld [vmem:[#allocation2 + $0x280] sm:$0xff] }
  0x90   :  { %501 = vadd.xlane.f32.xlu1 %v500_v57  ;;  %v519_v45 = vadd.f32 %v518_v53, %v9758_v42  ;;  %v525_v3 = vadd.f32 %v524_v56, %v9759_v10  ;;  %v531_v35 = vadd.f32 %v9761_v61, %v9760_v36  ;;  %v9762_v57 = vunpack.c.h.bf16 %v5205_v30  ;;  %v5466_v42 = vld [vmem:[#allocation2 + $0x278] sm:$0xff]  ;;  %v5468_v61 = vld [vmem:[#allocation2 + $0x288] sm:$0xff]  ;;  %9770 = vst [vmem:[#allocation63_spill] sm:$0xff] %v5487_v16 }
  0x91   :  { %9763 = vst [vmem:[#allocation60_spill] sm:$0xff] %v5466_v42  ;;  %9764 = vst [vmem:[#allocation61_spill] sm:$0xff] %v5468_v61  ;;  %v9765_v36 = vunpack.c.h.bf16 %v5355_v25  ;;  %v9767_v10 = vunpack.c.l.bf16 %v5390_v15  ;;  %v9768_v56 = vunpack.c.h.bf16 %v5374_v5  ;;  %v5489_v25 = vld [vmem:[#allocation2 + $0x290] sm:$0xff]  ;;  %v9775_v14 = vunpack.c.l.bf16 %v5429_v29 }
  0x92   :  { %v472_v54 = vadd.f32 %v471_v28, %v9762_v57  ;;  %v538_v28 = vadd.f32 %v9300_v13, %v9301_v46  ;;  %v9309_v57 = vunpack.c.l.bf16 %v5441_v59  ;;  %9771 = vst [vmem:[#allocation64_spill] sm:$0xff] %v5489_v25  ;;  %v1966_v13 = vsel %vm1965_vm0, %v5458_v34, 0.0  ;;  %9777 = vst [vmem:[#allocation66_spill] sm:$0xff] %v5513_v27 }
  0x93   :  { %v514_v23 = vadd.f32 %v513_v31, %v9765_v36  ;;  %v520_v53 = vadd.f32 %v519_v45, %v9767_v10  ;;  %v526_v30 = vadd.f32 %v525_v3, %v9768_v56  ;;  %v9769_v31 = vunpack.c.l.bf16 %v5404_v20  ;;  %v5497_v56 = vld [vmem:[#allocation2 + $0x2a0] sm:$0xff] }
  0x94   :  { %508 = vadd.xlane.f32.xlu1 %v507_v4  ;;  %473 = vadd.xlane.f32.xlu0 %v472_v54  ;;  %v9772_v10 = vunpack.c.l.bf16 %v5435_v33  ;;  %9773 = vst [vmem:[#allocation65_spill] sm:$0xff] %v5497_v56  ;;  %v9312_v54 = vunpack.c.l.bf16 %v5468_v61  ;;  %v9774_v4 = vunpack.c.h.bf16 %v5390_v15 }
  0x95   :  { %v532_v36 = vadd.f32 %v531_v35, %v9769_v31  ;;  %v545_v31 = vadd.f32 %v9308_v39, %v9309_v57  ;;  %v9776_v35 = vunpack.c.h.bf16 %v5404_v20  ;;  %v9778_v57 = vunpack.c.h.bf16 %v5435_v33  ;;  %v5553_v33 = vld [vmem:[#allocation2 + $0x2c0] sm:$0xff] }
  0x96   :  { %v539_v3 = vadd.f32 %v538_v28, %v9772_v10  ;;  %v521_v45 = vadd.f32 %v520_v53, %v9774_v4  ;;  %v527_v28 = vadd.f32 %v526_v30, %v9775_v14  ;;  %v5520_v4 = vld [vmem:[#allocation2 + $0x2a8] sm:$0xff]  ;;  %v9780_v30 = vunpack.c.l.bf16 %v5466_v42  ;;  %v5530_v10 = vld [vmem:[#allocation2 + $0x2b8] sm:$0xff]  ;;  %9791 = vst [vmem:[#allocation70_spill] sm:$0xff] %v5553_v33 }
  0x97   :  { %v533_v5 = vadd.f32 %v532_v36, %v9776_v35  ;;  %9779 = vst [vmem:[#allocation67_spill] sm:$0xff] %v5520_v4  ;;  %v9781_v36 = vunpack.c.h.bf16 %v5468_v61  ;;  %9782 = vst [vmem:[#allocation68_spill] sm:$0xff] %v5530_v10  ;;  %v9800_v53 = vunpack.c.h.bf16 %v5530_v10 }
  0x98   :  { %515 = vadd.xlane.f32.xlu1 %v514_v23  ;;  %1967 = vadd.xlane.f32.xlu0 %v1966_v13  ;;  %v540_v46 = vadd.f32 %v539_v3, %v9778_v57  ;;  %v546_v14 = vadd.f32 %v545_v31, %v9780_v30  ;;  %v9783_v57 = vunpack.c.h.bf16 %v5429_v29  ;;  %v9784_v23 = vunpack.c.l.bf16 %v5472_v52  ;;  %v5537_v30 = vld [vmem:[#allocation2 + $0x298] sm:$0xff] }
  0x99   :  { %v552_v35 = vadd.f32 %v9781_v36, %v9312_v54  ;;  %9785 = vst [vmem:[#allocation69_spill] sm:$0xff] %v5537_v30  ;;  %v9786_v36 = vunpack.c.l.bf16 %v5487_v16 }
  0x9a   :  { %v528_v3 = vadd.f32 %v527_v28, %v9783_v57  ;;  %v534_v31 = vadd.f32 %v533_v5, %v9784_v23  ;;  %v9788_v28 = vunpack.c.l.bf16 %v5489_v25  ;;  %v9789_v5 = vunpack.c.l.bf16 %v5497_v56 }
  0x9b   :  { %v541_v54 = vadd.f32 %v540_v46, %v9786_v36  ;;  %v9790_v23 = vunpack.c.h.bf16 %v5497_v56  ;;  %v5555_v46 = vld [vmem:[#allocation2 + $0x2d0] sm:$0xff]  ;;  %v9793_v36 = vunpack.c.h.bf16 %v5472_v52 }
  0x9c   :  { %522 = vadd.xlane.f32.xlu1 %v521_v45  ;;  %v9787_v45 = vunpack.c.h.bf16 %v5466_v42  ;;  %v553_v57 = vadd.f32 %v552_v35, %v9788_v28  ;;  %9792 = vst [vmem:[#allocation71_spill] sm:$0xff] %v5555_v46  ;;  %v5561_v35 = vld [vmem:[#allocation2 + $0x2b0] sm:$0xff]  ;;  %v9799_v28 = vunpack.c.l.bf16 %v5530_v10  ;;  %v5579_v42 = vld [vmem:[#allocation2 + $0x2d8] sm:$0xff] }
  0x9d   :  { %v559_v61 = vadd.f32 %v9790_v23, %v9789_v5  ;;  %v535_v13 = vadd.f32 %v534_v31, %v9793_v36  ;;  %9794 = vst [vmem:[#allocation72_spill] sm:$0xff] %v5561_v35  ;;  %v9795_v23 = vunpack.c.h.bf16 %v5487_v16  ;;  %v9797_v31 = vunpack.c.h.bf16 %v5489_v25  ;;  %9801 = vst [vmem:[#allocation73_spill] sm:$0xff] %v5579_v42  ;;  %v5603_v16 = vld [vmem:[#allocation2 + $0x2f0] sm:$0xff] }
  0x9e   :  { %v547_v59 = vadd.f32 %v546_v14, %v9787_v45  ;;  %v9798_v14 = vunpack.c.l.bf16 %v5520_v4  ;;  %v566_v5 = vadd.f32 %v9800_v53, %v9799_v28  ;;  %v9805_v53 = vunpack.c.l.bf16 %v5537_v30  ;;  %9810 = vst [vmem:[#allocation76_spill] sm:$0xff] %v5603_v16 }
  0x9f   :  { %v542_v39 = vadd.f32 %v541_v54, %v9795_v23  ;;  %v554_v36 = vadd.f32 %v553_v57, %v9797_v31  ;;  %v5583_v23 = vld [vmem:[#allocation2 + $0x2e8] sm:$0xff]  ;;  %v9806_v54 = vunpack.c.h.bf16 %v5520_v4  ;;  %v9807_v57 = vunpack.c.l.bf16 %v5553_v33 }
  0xa0   :  { %529 = vadd.xlane.f32.xlu1 %v528_v3  ;;  %v9796_v3 = vunpack.c.l.bf16 %v5513_v27  ;;  %v560_v45 = vadd.f32 %v559_v61, %v9798_v14  ;;  %9802 = vst [vmem:[#allocation74_spill] sm:$0xff] %v5583_v23  ;;  %v9808_v61 = vunpack.c.l.bf16 %v5555_v46  ;;  %v9809_v25 = vunpack.c.h.bf16 %v5555_v46 }
  0xa1   :  { %v555_v28 = vadd.f32 %v554_v36, %v9805_v53  ;;  %v567_v10 = vadd.f32 %v566_v5, %v9807_v57  ;;  %v9813_v5 = vunpack.c.l.bf16 %v5561_v35  ;;  %v9815_v46 = vunpack.c.l.bf16 %v5583_v23 }
  0xa2   :  { %v548_v56 = vadd.f32 %v547_v59, %v9796_v3  ;;  %v9804_v3 = vunpack.c.h.bf16 %v5513_v27  ;;  %v561_v52 = vadd.f32 %v560_v45, %v9806_v54  ;;  %v9331_v59 = vunpack.c.l.bf16 %v5579_v42  ;;  %v5608_v45 = vld [vmem:[#allocation2 + $0x2e0] sm:$0xff] }
  0xa3   :  { %v573_v14 = vadd.f32 %v9809_v25, %v9808_v61  ;;  %9811 = vst [vmem:[#allocation77_spill] sm:$0xff] %v5608_v45  ;;  %v9814_v61 = vunpack.c.h.bf16 %v5553_v33  ;;  %v9337_v25 = vunpack.c.h.bf16 %v5603_v16 }
  0xa4   :  { %536 = vadd.xlane.f32.xlu1 %v535_v13  ;;  %v5587_v13 = vld [vmem:[#allocation2 + $0x2c8] sm:$0xff]  ;;  %v549_v31 = vadd.f32 %v548_v56, %v9804_v3  ;;  %v562_v57 = vadd.f32 %v561_v52, %v9813_v5  ;;  %v9334_v3 = vunpack.c.l.bf16 %v5603_v16  ;;  %v9335_v5 = vunpack.c.l.bf16 %v5608_v45 }
  0xa5   :  { %9803 = vst [vmem:[#allocation75_spill] sm:$0xff] %v5587_v13  ;;  %v9341_v53 = vunpack.c.l.bf16 %v5587_v13  ;;  %v568_v56 = vadd.f32 %v567_v10, %v9814_v61  ;;  %v574_v36 = vadd.f32 %v573_v14, %v9331_v59  ;;  %v9336_v52 = vunpack.c.h.bf16 %v5587_v13 }
  0xa6   :  { %v9818_v61 = vunpack.c.h.bf16 %v5579_v42  ;;  %v1518_v42 = vlaneseq  ;;  %v9824_v13 = vunpack.c.l.bf16 %v4875_v6 }
  0xa7   :  { %v569_v14 = vadd.f32 %v568_v56, %v9341_v53 }
  0xa8   :  { %543 = vadd.xlane.f32.xlu1 %v542_v39  ;;  %v9812_v39 = vunpack.c.h.bf16 %v5537_v30  ;;  %v575_v59 = vadd.f32 %v574_v36, %v9818_v61  ;;  %v9829_v30 = vunpack.c.l.bf16 %v4868_v1  ;;  %v5695_v27 = vshrl.u32 %v1518_v42, 7 }
  0xaa   :  { %v556_v54 = vadd.f32 %v555_v28, %v9812_v39  ;;  %v9816_v28 = vunpack.c.h.bf16 %v5583_v23  ;;  %9831 = vst [vmem:[#allocation85_spill] sm:$0xff] %v5695_v27 }
  0xac   :  { %550 = vadd.xlane.f32.xlu1 %v549_v31  ;;  %v580_v39 = vadd.f32 %v9816_v28, %v9815_v46  ;;  %v9817_v31 = vunpack.c.h.bf16 %v5561_v35  ;;  %v5636_v46 = vld [vmem:[#allocation2 + $0x2f8] sm:$0xff]  ;;  %v9338_v28 = vunpack.c.h.bf16 %v5608_v45 }
  0xad   :  { %9819 = vst [vmem:[#allocation78_spill] sm:$0xff] %v5636_v46 }
  0xae   :  { %v563_v10 = vadd.f32 %v562_v57, %v9817_v31  ;;  %v581_v23 = vadd.f32 %v580_v39, %v9334_v3  ;;  %v576_v57 = vadd.f32 %v575_v59, %v9335_v5  ;;  %v9340_v31 = vunpack.c.l.bf16 %v5636_v46 }
  0xaf   :  { %v9339_v39 = vunpack.c.h.bf16 %v5636_v46  ;;  %v9822_v46 = vunpack.c.h.bf16 %v4866_v0 }
  0xb0   :  { %557 = vadd.xlane.f32.xlu1 %v556_v54  ;;  %v570_v54 = vadd.f32 %v569_v14, %v9336_v52  ;;  %v582_v56 = vadd.f32 %v581_v23, %v9337_v25  ;;  %v577_v36 = vadd.f32 %v576_v57, %v9338_v28 }
  0xb4   :  { %564 = vadd.xlane.f32.xlu1 %v563_v10  ;;  %v583_v10 = vadd.f32 %v582_v56, %v9340_v31  ;;  %v9820_v31 = vunpack.c.l.bf16 %v4866_v0 }
  0xb6   :  { %v584_v14 = vadd.f32 %v583_v10, %v9339_v39 }
  0xb8   :  { %571 = vadd.xlane.f32.xlu1 %v570_v54 }
  0xbc   :  { %578 = vadd.xlane.f32.xlu1 %v577_v36 }
  0xc0   :  { %585 = vadd.xlane.f32.xlu1 %v584_v14 }
  0xe4   :  { %v369_v59 = vpop.xlane.xlu0 %368 }
  0xe5   :  { %v588_v10 = vmul.f32 0.0013020834, %v369_v59  ;;  %v9826_v59 = vunpack.c.h.bf16 %v4875_v6 }
  0xe7   :  { %v5669_v53 = vsub.f32 %v9820_v31, %v588_v10  ;;  %v5673_v16 = vsub.f32 %v9822_v46, %v588_v10  ;;  %v5693_v4 = vsub.f32 %v9829_v30, %v588_v10  ;;  %v9836_v30 = vunpack.c.h.bf16 %v4870_v2 }
  0xe8   :  { %v376_v61 = vpop.xlane.xlu0 %375 }
  0xe9   :  { %v589_v39 = vmul.f32 0.0013020834, %v376_v61  ;;  %9821 = vst [vmem:[#allocation79_spill] sm:$0xff] %v5669_v53  ;;  %9823 = vst [vmem:[#allocation80_spill] sm:$0xff] %v5673_v16  ;;  %v812_v61 = vmul.f32 %v5669_v53, %v5669_v53  ;;  %v813_v31 = vmul.f32 %v5673_v16, %v5673_v16  ;;  %v9832_v53 = vunpack.c.h.bf16 %v4868_v1 }
  0xea   :  { %9830 = vst [vmem:[#allocation84_spill] sm:$0xff] %v5693_v4  ;;  %v5711_v29 = vsub.f32 %v9836_v30, %v588_v10  ;;  %v814_v1 = vmul.f32 %v5693_v4, %v5693_v4  ;;  %v9846_v30 = vunpack.c.h.bf16 %v4883_v11  ;;  %v9849_v4 = vunpack.c.l.bf16 %v4879_v8 }
  0xeb   :  { %v5679_v33 = vsub.f32 %v9824_v13, %v589_v39  ;;  %v5683_v35 = vsub.f32 %v9826_v59, %v589_v39  ;;  %v1004_v59 = vadd.f32 %v813_v31, %v812_v61  ;;  %v5703_v20 = vsub.f32 %v9832_v53, %v588_v10 }
  0xec   :  { %v383_v3 = vpop.xlane.xlu0 %382  ;;  %9837 = vst [vmem:[#allocation88_spill] sm:$0xff] %v5711_v29  ;;  %v9841_v61 = vunpack.c.h.bf16 %v4877_v7  ;;  %v9843_v53 = vunpack.c.l.bf16 %v4883_v11  ;;  %v817_v11 = vmul.f32 %v5711_v29, %v5711_v29  ;;  %v9853_v29 = vunpack.c.l.bf16 %v4894_v17 }
  0xed   :  { %9825 = vst [vmem:[#allocation81_spill] sm:$0xff] %v5679_v33  ;;  %9827 = vst [vmem:[#allocation82_spill] sm:$0xff] %v5683_v35  ;;  %v590_v0 = vmul.f32 0.0013020834, %v383_v3  ;;  %v818_v6 = vmul.f32 %v5679_v33, %v5679_v33  ;;  %v819_v13 = vmul.f32 %v5683_v35, %v5683_v35  ;;  %v9834_v3 = vunpack.c.l.bf16 %v4870_v2 }
  0xee   :  { %9833 = vst [vmem:[#allocation86_spill] sm:$0xff] %v5703_v20  ;;  %v9839_v33 = vunpack.c.l.bf16 %v4877_v7  ;;  %v5721_v31 = vsub.f32 %v9841_v61, %v589_v39  ;;  %v5739_v7 = vsub.s32 1, %v5695_v27 }
  0xef   :  { %v5707_v16 = vsub.f32 %v9834_v3, %v588_v10  ;;  %v5727_v3 = vsub.f32 %v9843_v53, %v590_v0  ;;  %v5730_v10 = vsub.s32 0, %v5695_v27  ;;  %v5734_v35 = vsub.f32 %v9846_v30, %v590_v0 }
  0xf0   :  { %v390_v5 = vpop.xlane.xlu0 %389  ;;  %v5717_v15 = vsub.f32 %v9839_v33, %v589_v39  ;;  %9842 = vst [vmem:[#allocation91_spill] sm:$0xff] %v5721_v31  ;;  %9848 = vst [vmem:[#allocation95_spill] sm:$0xff] %v5739_v7  ;;  %v1011_v61 = vadd.f32 %v819_v13, %v818_v6  ;;  %v9851_v30 = vunpack.c.h.bf16 %v4879_v8  ;;  %v9855_v8 = vunpack.c.h.bf16 %v4894_v17 }
  0xf1   :  { %9835 = vst [vmem:[#allocation87_spill] sm:$0xff] %v5707_v16  ;;  %9844 = vst [vmem:[#allocation92_spill] sm:$0xff] %v5727_v3  ;;  %v591_v2 = vmul.f32 0.0013020834, %v390_v5  ;;  %v815_v5 = vmul.f32 %v5703_v20, %v5703_v20  ;;  %v816_v53 = vmul.f32 %v5707_v16, %v5707_v16  ;;  %v824_v13 = vmul.f32 %v5727_v3, %v5727_v3 }
  0xf2   :  { %9840 = vst [vmem:[#allocation90_spill] sm:$0xff] %v5717_v15  ;;  %9845 = vst [vmem:[#allocation93_spill] sm:$0xff] %v5730_v10  ;;  %v5753_v27 = vsub.f32 %v9851_v30, %v589_v39  ;;  %v820_v6 = vmul.f32 %v5717_v15, %v5717_v15  ;;  %v9863_v17 = vunpack.c.h.bf16 %v4885_v12 }
  0xf3   :  { %9847 = vst [vmem:[#allocation94_spill] sm:$0xff] %v5734_v35  ;;  %v5765_v16 = vsub.f32 %v9853_v29, %v591_v2  ;;  %v9861_v29 = vunpack.c.l.bf16 %v4885_v12 }
  0xf4   :  { %v397_v52 = vpop.xlane.xlu0 %396  ;;  %9852 = vst [vmem:[#allocation97_spill] sm:$0xff] %v5753_v27  ;;  %v1012_v30 = vadd.f32 %v1011_v61, %v820_v6  ;;  %v823_v6 = vmul.f32 %v5753_v27, %v5753_v27 }
  0xf5   :  { %v5736_v33 = vmul.f32 0.0013020834, %v397_v52  ;;  %9854 = vst [vmem:[#allocation98_spill] sm:$0xff] %v5765_v16 }
  0xf8   :  { %v404_v23 = vpop.xlane.xlu0 %403 }
  0xfc   :  { %v5653_v54 = vpop.xlane.xlu0 %410 }
  0xfd   :  { %v5806_v12 = vmul.f32 0.0013020834, %v5653_v54 }
 0x100   :  { %v5655_v25 = vpop.xlane.xlu0 %417 }
 0x104   :  { %v5657_v57 = vpop.xlane.xlu0 %424 }
 0x108   :  { %v5659_v28 = vpop.xlane.xlu0 %431 }
 0x10c   :  { %v5661_v56 = vpop.xlane.xlu0 %438 }
 0x110   :  { %v5663_v36 = vpop.xlane.xlu0 %445 }
 0x114   :  { %v5665_v14 = vpop.xlane.xlu0 %452 }
 0x118   :  { %v5675_v45 = vpop.xlane.xlu0 %459 }
 0x11c   :  { %v5689_v46 = vpop.xlane.xlu0 %466 }
 0x11d   :  { %9828 = vst [vmem:[#allocation83_spill] sm:$0xff] %v5689_v46  ;;  %v5743_v46 = vsub.f32 %v9849_v4, %v589_v39  ;;  %v821_v4 = vmul.f32 %v5721_v31, %v5721_v31  ;;  %v5769_v39 = vsub.f32 %v9855_v8, %v591_v2  ;;  %v9857_v31 = vunpack.c.l.bf16 %v4920_v32 }
 0x11e   :  { %v5787_v8 = vsub.f32 %v9863_v17, %v590_v0 }
 0x11f   :  { %9850 = vst [vmem:[#allocation96_spill] sm:$0xff] %v5743_v46  ;;  %9856 = vst [vmem:[#allocation99_spill] sm:$0xff] %v5769_v39  ;;  %v5774_v15 = vsub.f32 %v9857_v31, %v5736_v33  ;;  %v5793_v31 = vmul.f32 0.0013020834, %v404_v23  ;;  %v830_v23 = vmul.f32 %v5765_v16, %v5765_v16  ;;  %v831_v17 = vmul.f32 %v5769_v39, %v5769_v39 }
 0x120   :  { %9864 = vst [vmem:[#allocation103_spill] sm:$0xff] %v5787_v8  ;;  %v827_v54 = vmul.f32 %v5787_v8, %v5787_v8 }
 0x121   :  { %v5713_v42 = vpop.xlane.xlu0 %473  ;;  %9858 = vst [vmem:[#allocation100_spill] sm:$0xff] %v5774_v15  ;;  %v1025_v16 = vadd.f32 %v831_v17, %v830_v23  ;;  %v5864_v23 = vmul.f32 0.0013020834, %v5655_v25 }
 0x122   :  { %9838 = vst [vmem:[#allocation89_spill] sm:$0xff] %v5713_v42  ;;  %v1005_v42 = vadd.f32 %v1004_v59, %v814_v1  ;;  %v825_v1 = vmul.f32 %v5734_v35, %v5734_v35  ;;  %v5783_v35 = vsub.f32 %v9861_v29, %v590_v0 }
 0x124   :  { %v1006_v20 = vadd.f32 %v1005_v42, %v815_v5  ;;  %9862 = vst [vmem:[#allocation102_spill] sm:$0xff] %v5783_v35  ;;  %v9865_v42 = vunpack.c.l.bf16 %v4909_v26  ;;  %v5795_v5 = vpop.xlane.xlu1 %480  ;;  %v1018_v29 = vadd.f32 %v825_v1, %v824_v13  ;;  %v9869_v1 = vunpack.c.l.bf16 %v4903_v22 }
 0x125   :  { %v1968_v52 = vpop.xlane.xlu0 %1967 }
 0x126   :  { %v1969_v59 = vmax.f32 %v1968_v52, 1e-09  ;;  %v9859_v52 = vunpack.c.h.bf16 %v4920_v32  ;;  %v5791_v61 = vsub.f32 %v9865_v42, %v590_v0  ;;  %v822_v32 = vmul.f32 %v5743_v46, %v5743_v46 }
 0x127   :  { %v1013_v42 = vadd.f32 %v1012_v30, %v821_v4  ;;  %v1007_v48 = vadd.f32 %v1006_v20, %v816_v53  ;;  %v836_v46 = vmul.f32 %v5774_v15, %v5774_v15  ;;  %v9871_v53 = vunpack.c.l.bf16 %v4927_v37 }
 0x128   :  { %v5779_v3 = vsub.f32 %v9859_v52, %v5736_v33  ;;  %4575 = vrcp.f32 %v1969_v59  ;;  %9866 = vst [vmem:[#allocation104_spill] sm:$0xff] %v5791_v61  ;;  %v9867_v59 = vunpack.c.h.bf16 %v4909_v26  ;;  %v828_v13 = vmul.f32 %v5791_v61, %v5791_v61 }
 0x129   :  { %v5833_v4 = vsub.f32 %v9871_v53, %v5736_v33  ;;  %v9873_v30 = vunpack.c.l.bf16 %v4945_v47  ;;  %v9875_v15 = vunpack.c.h.bf16 %v4945_v47  ;;  %v9879_v53 = vunpack.c.h.bf16 %v4968_v60 }
 0x12a   :  { %9860 = vst [vmem:[#allocation101_spill] sm:$0xff] %v5779_v3  ;;  %v5803_v52 = vsub.f32 %v9867_v59, %v590_v0  ;;  %v837_v26 = vmul.f32 %v5779_v3, %v5779_v3  ;;  %v826_v0 = vmul.f32 %v5783_v35, %v5783_v35  ;;  %v5824_v59 = vsub.f32 %v9869_v1, %v591_v2  ;;  %v5855_v35 = vpop.xlane.xlu1 %487 }
 0x12b   :  { %9872 = vst [vmem:[#allocation107_spill] sm:$0xff] %v5833_v4  ;;  %v5838_v3 = vsub.f32 %v9873_v30, %v5793_v31  ;;  %v5843_v39 = vsub.f32 %v9875_v15, %v5793_v31  ;;  %v5853_v8 = vsub.f32 %v9879_v53, %v5806_v12  ;;  %v1014_v30 = vadd.f32 %v1013_v42, %v822_v32 }
 0x12c   :  { %9868 = vst [vmem:[#allocation105_spill] sm:$0xff] %v5803_v52  ;;  %9870 = vst [vmem:[#allocation106_spill] sm:$0xff] %v5824_v59  ;;  %v5828_v20 = vmul.f32 %v5803_v52, %v5803_v52  ;;  %v1019_v1 = vadd.f32 %v1018_v29, %v826_v0  ;;  %v9877_v52 = vunpack.c.l.bf16 %v4968_v60  ;;  %v5857_v27 = vadd.f32 %v1007_v48, %v817_v11 }
 0x12d   :  { %9874 = vst [vmem:[#allocation108_spill] sm:$0xff] %v5838_v3  ;;  %9876 = vst [vmem:[#allocation109_spill] sm:$0xff] %v5843_v39  ;;  %v9881_v47 = vunpack.c.h.bf16 %v4903_v22  ;;  %v1032_v29 = vadd.f32 %v837_v26, %v836_v46  ;;  %v9885_v60 = vunpack.c.h.bf16 %v4934_v41  ;;  %v832_v48 = vmul.f32 %v5824_v59, %v5824_v59 }
 0x12e   :  { %v5848_v61 = vsub.f32 %v9877_v52, %v5806_v12  ;;  %9880 = vst [vmem:[#allocation111_spill] sm:$0xff] %v5853_v8  ;;  %v9883_v52 = vunpack.c.l.bf16 %v4934_v41  ;;  %v9887_v22 = vunpack.c.h.bf16 %v4927_v37  ;;  %v838_v25 = vmul.f32 %v5833_v4, %v5833_v4 }
 0x12f   :  { %v5861_v15 = vsub.f32 %v9881_v47, %v591_v2  ;;  %v5872_v0 = vsub.f32 %v9885_v60, %v591_v2  ;;  %v842_v46 = vmul.f32 %v5838_v3, %v5838_v3  ;;  %v843_v32 = vmul.f32 %v5843_v39, %v5843_v39 }
 0x130   :  { %9878 = vst [vmem:[#allocation110_spill] sm:$0xff] %v5848_v61  ;;  %v5868_v17 = vsub.f32 %v9883_v52, %v591_v2  ;;  %v5879_v11 = vsub.f32 %v9887_v22, %v5736_v33  ;;  %v1020_v2 = vadd.f32 %v1019_v1, %v827_v54  ;;  %v1026_v42 = vadd.f32 %v1025_v16, %v832_v48 }
 0x131   :  { %9882 = vst [vmem:[#allocation112_spill] sm:$0xff] %v5861_v15  ;;  %9886 = vst [vmem:[#allocation114_spill] sm:$0xff] %v5872_v0  ;;  %v848_v26 = vmul.f32 %v5848_v61, %v5848_v61  ;;  %v849_v37 = vmul.f32 %v5853_v8, %v5853_v8  ;;  %v5892_v47 = vadd.f32 %v1014_v30, %v823_v6  ;;  %v9889_v60 = vunpack.c.l.bf16 %v4952_v51 }
 0x132   :  { %9884 = vst [vmem:[#allocation113_spill] sm:$0xff] %v5868_v17  ;;  %9888 = vst [vmem:[#allocation115_spill] sm:$0xff] %v5879_v11  ;;  %v4576_v41 = vpop.eup %4575  ;;  %v1033_v52 = vadd.f32 %v1032_v29, %v838_v25  ;;  %v833_v54 = vmul.f32 %v5861_v15, %v5861_v15  ;;  %v9891_v16 = vunpack.c.l.bf16 %v4978_v24  ;;  %v9893_v48 = vunpack.c.l.bf16 %v4989_v43  ;;  %v5919_v25 = vpop.xlane.xlu1 %494 }
 0x133   :  { %v1971_v53 = vmul.f32 %v4576_v41, %v5458_v34  ;;  %v5897_v22 = vsub.f32 %v9889_v60, %v5793_v31  ;;  %v9895_v6 = vunpack.c.h.bf16 %v4989_v43  ;;  %v9898_v41 = vunpack.c.l.bf16 %v4974_v63 }
 0x134   :  { %v5904_v1 = vsub.f32 %v9891_v16, %v5806_v12  ;;  %v5909_v34 = vsub.f32 %v9893_v48, %v5864_v23  ;;  %v839_v16 = vmul.f32 %v5879_v11, %v5879_v11  ;;  %v1039_v48 = vadd.f32 %v843_v32, %v842_v46 }
 0x135   :  { %9890 = vst [vmem:[#allocation116_spill] sm:$0xff] %v5897_v22  ;;  %v5914_v30 = vsub.f32 %v9895_v6, %v5864_v23  ;;  %v5917_v29 = vrot.slane %v1971_v53, %v5730_v10  ;;  %v5924_v60 = vsub.f32 %v9898_v41, %v5736_v33  ;;  %v1021_v8 = vadd.f32 %v1020_v2, %v828_v13 }
 0x136   :  { %9892 = vst [vmem:[#allocation117_spill] sm:$0xff] %v5904_v1  ;;  %9894 = vst [vmem:[#allocation118_spill] sm:$0xff] %v5909_v34  ;;  %v834_v43 = vmul.f32 %v5868_v17, %v5868_v17  ;;  %v1027_v6 = vadd.f32 %v1026_v42, %v833_v54  ;;  %v1046_v61 = vadd.f32 %v849_v37, %v848_v26  ;;  %v9900_v3 = vunpack.c.h.bf16 %v4952_v51 }
 0x137   :  { %9896 = vst [vmem:[#allocation119_spill] sm:$0xff] %v5914_v30  ;;  %9897 = vst [vmem:[#allocation120_spill] sm:$0xff] %v5917_v29  ;;  %1981 = vbcast.lane.b32.xlu0 %v5917_v29, 264  ;;  %1977 = vbcast.lane.b32.xlu1 %v5917_v29, 256  ;;  %v1034_v39 = vadd.f32 %v1033_v52, %v839_v16  ;;  %v844_v11 = vmul.f32 %v5897_v22, %v5897_v22  ;;  %v9902_v13 = vunpack.c.h.bf16 %v4978_v24 }
 0x138   :  { %9899 = vst [vmem:[#allocation121_spill] sm:$0xff] %v5924_v60  ;;  %v5935_v41 = vsub.f32 %v9900_v3, %v5793_v31  ;;  %v850_v32 = vmul.f32 %v5904_v1, %v5904_v1  ;;  %v854_v2 = vmul.f32 %v5909_v34, %v5909_v34  ;;  %v855_v42 = vmul.f32 %v5914_v30, %v5914_v30  ;;  %v9967_v1 = vld [vmem:[#allocation37_spill] sm:$0xff] }
 0x139   :  { %v5942_v46 = vsub.f32 %v9902_v13, %v5806_v12  ;;  %v5951_v51 = vrot.slane %v1971_v53, %v5739_v7  ;;  %v9905_v3 = vunpack.c.h.bf16 %v4974_v63  ;;  %v840_v24 = vmul.f32 %v5924_v60, %v5924_v60 }
 0x13a   :  { %9901 = vst [vmem:[#allocation122_spill] sm:$0xff] %v5935_v41  ;;  %v1040_v37 = vadd.f32 %v1039_v48, %v844_v11  ;;  %v1028_v52 = vadd.f32 %v1027_v6, %v834_v43  ;;  %v9907_v54 = vunpack.c.l.bf16 %v4997_v55  ;;  %v1047_v13 = vadd.f32 %v1046_v61, %v850_v32 }
 0x13b   :  { %9903 = vst [vmem:[#allocation123_spill] sm:$0xff] %v5942_v46  ;;  %9904 = vst [vmem:[#allocation124_spill] sm:$0xff] %v5951_v51  ;;  %v5956_v26 = vsub.f32 %v9905_v3, %v5736_v33  ;;  %v9909_v53 = vunpack.c.l.bf16 %v4991_v44  ;;  %v596_v63 = vmul.f32 0.0013020834, %v5657_v57  ;;  %2052 = vbcast.lane.b32.xlu0 %v5951_v51, 272  ;;  %2044 = vbcast.lane.b32.xlu1 %v5951_v51, 256  ;;  %v5973_v33 = vpop.xlane.xlu1 %501  ;;  %v9911_v48 = vunpack.c.h.bf16 %v4997_v55 }
 0x13c   :  { %v5963_v16 = vsub.f32 %v9907_v54, %v5793_v31  ;;  %v835_v11 = vmul.f32 %v5872_v0, %v5872_v0  ;;  %v845_v43 = vmul.f32 %v5935_v41, %v5935_v41  ;;  %v1035_v6 = vadd.f32 %v1034_v39, %v840_v24 }
 0x13d   :  { %9906 = vst [vmem:[#allocation125_spill] sm:$0xff] %v5956_v26  ;;  %v5968_v30 = vsub.f32 %v9909_v53, %v5864_v23  ;;  %v5980_v61 = vsub.f32 %v9911_v48, %v5793_v31  ;;  %v9913_v57 = vunpack.c.l.bf16 %v5019_v19  ;;  %v851_v3 = vmul.f32 %v5942_v46, %v5942_v46  ;;  %v9964_v46 = vld [vmem:[#allocation20_spill] sm:$0xff] }
 0x13e   :  { %9908 = vst [vmem:[#allocation126_spill] sm:$0xff] %v5963_v16  ;;  %v1053_v54 = vadd.f32 %v855_v42, %v854_v2  ;;  %v5992_v53 = vadd.f32 %v1021_v8, %v5828_v20  ;;  %v841_v55 = vmul.f32 %v5956_v26, %v5956_v26  ;;  %v1041_v31 = vadd.f32 %v1040_v37, %v845_v43 }
 0x13f   :  { %9910 = vst [vmem:[#allocation127_spill] sm:$0xff] %v5968_v30  ;;  %9912 = vst [vmem:[#allocation128_spill] sm:$0xff] %v5980_v61  ;;  %v5987_v32 = vsub.f32 %v9913_v57, %v5806_v12  ;;  %v9915_v48 = vunpack.c.h.bf16 %v4991_v44  ;;  %v6001_v24 = vadd.f32 %v1028_v52, %v835_v11  ;;  %v846_v57 = vmul.f32 %v5963_v16, %v5963_v16 }
 0x140   :  { %v1048_v34 = vadd.f32 %v1047_v13, %v851_v3  ;;  %v856_v2 = vmul.f32 %v5968_v30, %v5968_v30  ;;  %2056 = vbcast.lane.b32.xlu0 %v5951_v51, 280  ;;  %2048 = vbcast.lane.b32.xlu1 %v5951_v51, 264  ;;  %v847_v8 = vmul.f32 %v5980_v61, %v5980_v61  ;;  %v9917_v44 = vunpack.c.l.bf16 %v5010_v50 }
 0x141   :  { %9914 = vst [vmem:[#allocation129_spill] sm:$0xff] %v5987_v32  ;;  %v5999_v39 = vsub.f32 %v9915_v48, %v5864_v23  ;;  %v9919_v42 = vunpack.c.h.bf16 %v5010_v50  ;;  %v6019_v52 = vadd.f32 %v1035_v6, %v841_v55  ;;  %v9921_v13 = vunpack.c.h.bf16 %v5019_v19  ;;  %v6028_v48 = vpop.xlane.xlu1 %508 }
 0x142   :  { %v6013_v20 = vsub.f32 %v9917_v44, %v596_v63  ;;  %v852_v43 = vmul.f32 %v5987_v32, %v5987_v32  ;;  %v1054_v3 = vadd.f32 %v1053_v54, %v856_v2  ;;  %v1042_v30 = vadd.f32 %v1041_v31, %v846_v57 }
 0x143   :  { %9916 = vst [vmem:[#allocation130_spill] sm:$0xff] %v5999_v39  ;;  %v6017_v37 = vsub.f32 %v9919_v42, %v596_v63  ;;  %v6024_v11 = vsub.f32 %v9921_v13, %v5806_v12  ;;  %v9923_v44 = vunpack.c.l.bf16 %v5038_v58  ;;  %v9925_v6 = vunpack.c.h.bf16 %v5038_v58 }
 0x144   :  { %9918 = vst [vmem:[#allocation131_spill] sm:$0xff] %v6013_v20  ;;  %v857_v19 = vmul.f32 %v5999_v39, %v5999_v39  ;;  %v1049_v12 = vadd.f32 %v1048_v34, %v852_v43  ;;  %v9927_v42 = vunpack.c.l.bf16 %v5028_v38  ;;  %v9929_v31 = vunpack.c.h.bf16 %v5028_v38  ;;  %2060 = vbcast.lane.b32.xlu0 %v5951_v51, 288  ;;  %1985 = vbcast.lane.b32.xlu1 %v5917_v29, 272 }
 0x145   :  { %9920 = vst [vmem:[#allocation132_spill] sm:$0xff] %v6017_v37  ;;  %9922 = vst [vmem:[#allocation133_spill] sm:$0xff] %v6024_v11  ;;  %v6033_v50 = vsub.f32 %v9923_v44, %v5864_v23  ;;  %v6038_v55 = vsub.f32 %v9925_v6, %v5864_v23  ;;  %v9931_v2 = vunpack.c.l.bf16 %v5049_v49  ;;  %v9933_v58 = vunpack.c.h.bf16 %v5049_v49 }
 0x146   :  { %v6044_v54 = vsub.f32 %v9927_v42, %v596_v63  ;;  %v6048_v57 = vsub.f32 %v9929_v31, %v596_v63  ;;  %v860_v34 = vmul.f32 %v6013_v20, %v6013_v20  ;;  %v861_v38 = vmul.f32 %v6017_v37, %v6017_v37 }
 0x147   :  { %9924 = vst [vmem:[#allocation134_spill] sm:$0xff] %v6033_v50  ;;  %9926 = vst [vmem:[#allocation135_spill] sm:$0xff] %v6038_v55  ;;  %v6052_v13 = vsub.f32 %v9931_v2, %v596_v63  ;;  %v6058_v23 = vsub.f32 %v9933_v58, %v596_v63  ;;  %v6065_v43 = vmul.f32 0.0013020834, %v5659_v28  ;;  %v604_v44 = vmul.f32 0.0013020834, %v5795_v5 }
 0x148   :  { %9928 = vst [vmem:[#allocation136_spill] sm:$0xff] %v6044_v54  ;;  %9930 = vst [vmem:[#allocation137_spill] sm:$0xff] %v6048_v57  ;;  %v853_v6 = vmul.f32 %v6024_v11, %v6024_v11  ;;  %v1055_v42 = vadd.f32 %v1054_v3, %v857_v19  ;;  %v6071_v31 = vmul.f32 0.0013020834, %v5855_v35  ;;  %v6073_v49 = vadd.f32 %v1042_v30, %v847_v8  ;;  %v516_v30 = vpop.xlane.xlu1 %515 }
 0x149   :  { %9932 = vst [vmem:[#allocation138_spill] sm:$0xff] %v6052_v13  ;;  %9934 = vst [vmem:[#allocation139_spill] sm:$0xff] %v6058_v23  ;;  %v858_v63 = vmul.f32 %v6033_v50, %v6033_v50  ;;  %v859_v2 = vmul.f32 %v6038_v55, %v6038_v55  ;;  %v6080_v28 = vmul.f32 0.0013020834, %v5919_v25  ;;  %v862_v5 = vmul.f32 %v6044_v54, %v6044_v54  ;;  %v9942_v55 = vld [vmem:[#allocation38_spill] sm:$0xff] }
 0x14a   :  { %v6082_v58 = vadd.f32 %v1049_v12, %v853_v6  ;;  %v6088_v35 = vmul.f32 %v6048_v57, %v6048_v57  ;;  %2064 = vbcast.lane.b32.xlu0 %v5951_v51, 296  ;;  %1989 = vbcast.lane.b32.xlu1 %v5917_v29, 280  ;;  %v6094_v8 = vmul.f32 %v6052_v13, %v6052_v13  ;;  %v9935_v19 = vunpack.c.l.bf16 %v5189_v62  ;;  %v9937_v57 = vld [vmem:[#allocation15_spill] sm:$0xff] }
 0x14b   :  { %v6098_v25 = vmul.f32 %v6058_v23, %v6058_v23  ;;  %v1060_v3 = vadd.f32 %v861_v38, %v860_v34  ;;  %v1056_v6 = vadd.f32 %v1055_v42, %v858_v63  ;;  %v9938_v54 = vunpack.c.l.bf16 %v9937_v57 }
 0x14c   :  { %v6102_v12 = vsub.f32 %v9935_v19, %v604_v44  ;;  %v9940_v20 = vunpack.c.h.bf16 %v9937_v57  ;;  %v9943_v23 = vunpack.c.l.bf16 %v9942_v55  ;;  %v9945_v34 = vunpack.c.h.bf16 %v9942_v55  ;;  %v523_v60 = vpop.xlane.xlu1 %522 }
 0x14d   :  { %v6107_v37 = vsub.f32 %v9938_v54, %v6065_v43  ;;  %v9947_v42 = vunpack.c.h.bf16 %v5189_v62  ;;  %v9949_v54 = vld [vmem:[#allocation16_spill] sm:$0xff]  ;;  %v9970_v16 = vunpack.c.h.bf16 %v9967_v1  ;;  %v6179_v22 = vadd.f32 %v1056_v6, %v859_v2 }
 0x14e   :  { %9936 = vst [vmem:[#allocation140_spill] sm:$0xff] %v6102_v12  ;;  %v6112_v13 = vsub.f32 %v9940_v20, %v6065_v43  ;;  %v6117_v50 = vsub.f32 %v9943_v23, %v6071_v31  ;;  %v6122_v38 = vsub.f32 %v9945_v34, %v6071_v31  ;;  %v9950_v19 = vunpack.c.l.bf16 %v9949_v54  ;;  %v9952_v23 = vld [vmem:[#allocation40_spill] sm:$0xff]  ;;  %2068 = vbcast.lane.b32.xlu0 %v5951_v51, 304 }
 0x14f   :  { %9939 = vst [vmem:[#allocation15_spill] sm:$0xff] %v6107_v37  ;;  %v6126_v63 = vsub.f32 %v9947_v42, %v604_v44  ;;  %v6134_v20 = vmul.f32 0.0013020834, %v5973_v33  ;;  %v9953_v39 = vunpack.c.l.bf16 %v9952_v23  ;;  %v9955_v55 = vunpack.c.h.bf16 %v9952_v23  ;;  %1993 = vbcast.lane.b32.xlu1 %v5917_v29, 288  ;;  %v9959_v33 = vld [vmem:[#allocation36_spill] sm:$0xff] }
 0x150   :  { %9941 = vst [vmem:[#allocation141_spill] sm:$0xff] %v6112_v13  ;;  %9944 = vst [vmem:[#allocation38_spill] sm:$0xff] %v6117_v50  ;;  %v6131_v57 = vsub.f32 %v9950_v19, %v6065_v43  ;;  %v9957_v62 = vunpack.c.h.bf16 %v9949_v54  ;;  %v6152_v19 = vmul.f32 0.0013020834, %v5661_v56  ;;  %v9962_v23 = vunpack.c.h.bf16 %v9959_v33 }
 0x151   :  { %9946 = vst [vmem:[#allocation142_spill] sm:$0xff] %v6122_v38  ;;  %9948 = vst [vmem:[#allocation143_spill] sm:$0xff] %v6126_v63  ;;  %v6139_v11 = vsub.f32 %v9953_v39, %v6080_v28  ;;  %v6144_v34 = vsub.f32 %v9955_v55, %v6080_v28  ;;  %v9960_v39 = vunpack.c.l.bf16 %v9959_v33  ;;  %v9965_v54 = vunpack.c.l.bf16 %v9964_v46  ;;  %v9972_v33 = vld [vmem:[#allocation39_spill] sm:$0xff] }
 0x152   :  { %9951 = vst [vmem:[#allocation16_spill] sm:$0xff] %v6131_v57  ;;  %v6149_v42 = vsub.f32 %v9957_v62, %v6065_v43  ;;  %v6162_v55 = vsub.f32 %v9962_v23, %v604_v44  ;;  %v9968_v56 = vunpack.c.l.bf16 %v9967_v1  ;;  %v6175_v41 = vsub.f32 %v9970_v16, %v604_v44  ;;  %2072 = vbcast.lane.b32.xlu0 %v5951_v51, 312 }
 0x153   :  { %9954 = vst [vmem:[#allocation40_spill] sm:$0xff] %v6139_v11  ;;  %9956 = vst [vmem:[#allocation144_spill] sm:$0xff] %v6144_v34  ;;  %v6158_v32 = vsub.f32 %v9960_v39, %v604_v44  ;;  %v6167_v62 = vsub.f32 %v9965_v54, %v6065_v43  ;;  %v908_v39 = vmul.f32 %v6102_v12, %v6102_v12  ;;  %v9973_v23 = vunpack.c.l.bf16 %v9972_v33 }
 0x154   :  { %9958 = vst [vmem:[#allocation145_spill] sm:$0xff] %v6149_v42  ;;  %9963 = vst [vmem:[#allocation146_spill] sm:$0xff] %v6162_v55  ;;  %v6171_v61 = vsub.f32 %v9968_v56, %v604_v44  ;;  %v914_v54 = vmul.f32 %v6117_v50, %v6117_v50  ;;  %v915_v56 = vmul.f32 %v6122_v38, %v6122_v38  ;;  %v9975_v16 = vunpack.c.l.bf16 %v5262_v9 }
 0x155   :  { %9961 = vst [vmem:[#allocation36_spill] sm:$0xff] %v6158_v32  ;;  %9966 = vst [vmem:[#allocation20_spill] sm:$0xff] %v6167_v62  ;;  %v6184_v26 = vsub.f32 %v9973_v23, %v6071_v31  ;;  %v909_v1 = vmul.f32 %v6126_v63, %v6126_v63  ;;  %v920_v2 = vmul.f32 %v6139_v11, %v6139_v11  ;;  %v9977_v23 = vld [vmem:[#allocation42_spill] sm:$0xff]  ;;  %1997 = vbcast.lane.b32.xlu1 %v5917_v29, 296 }
 0x156   :  { %9969 = vst [vmem:[#allocation37_spill] sm:$0xff] %v6171_v61  ;;  %9971 = vst [vmem:[#allocation147_spill] sm:$0xff] %v6175_v41  ;;  %v6195_v44 = vsub.f32 %v9975_v16, %v6080_v28  ;;  %v921_v6 = vmul.f32 %v6144_v34, %v6144_v34  ;;  %v9978_v4 = vunpack.c.l.bf16 %v9977_v23  ;;  %v6209_v17 = vmul.f32 0.0013020834, %v6028_v48  ;;  %2076 = vbcast.lane.b32.xlu0 %v5951_v51, 320 }
 0x157   :  { %9974 = vst [vmem:[#allocation39_spill] sm:$0xff] %v6184_v26  ;;  %v9980_v16 = vunpack.c.h.bf16 %v9977_v23  ;;  %v910_v59 = vmul.f32 %v6158_v32, %v6158_v32  ;;  %v6220_v63 = vmul.f32 %v6162_v55, %v6162_v55  ;;  %v6229_v48 = vmul.f32 %v6171_v61, %v6171_v61  ;;  %v9984_v32 = vld [vmem:[#allocation41_spill] sm:$0xff] }
 0x158   :  { %9976 = vst [vmem:[#allocation148_spill] sm:$0xff] %v6195_v44  ;;  %v6204_v0 = vsub.f32 %v9978_v4, %v6134_v20  ;;  %v9982_v4 = vunpack.c.h.bf16 %v9972_v33  ;;  %v6233_v23 = vmul.f32 %v6175_v41, %v6175_v41  ;;  %v9985_v34 = vunpack.c.l.bf16 %v9984_v32 }
 0x159   :  { %v6214_v15 = vsub.f32 %v9980_v16, %v6134_v20  ;;  %v6235_v16 = vadd.f32 %v1060_v3, %v862_v5  ;;  %v916_v33 = vmul.f32 %v6184_v26, %v6184_v26  ;;  %v9987_v11 = vunpack.c.h.bf16 %v5262_v9  ;;  %v9989_v5 = vld [vmem:[#allocation43_spill] sm:$0xff]  ;;  %2001 = vbcast.lane.b32.xlu1 %v5917_v29, 304  ;;  %v530_v9 = vpop.xlane.xlu1 %529 }
 0x15a   :  { %9979 = vst [vmem:[#allocation42_spill] sm:$0xff] %v6204_v0  ;;  %v6225_v12 = vsub.f32 %v9982_v4, %v6071_v31  ;;  %v6240_v55 = vsub.f32 %v9985_v34, %v6071_v31  ;;  %v1123_v4 = vadd.f32 %v915_v56, %v914_v54  ;;  %v922_v41 = vmul.f32 %v6195_v44, %v6195_v44  ;;  %v9992_v54 = vld [vmem:[#allocation44_spill] sm:$0xff] }
 0x15b   :  { %9981 = vst [vmem:[#allocation149_spill] sm:$0xff] %v6214_v15  ;;  %v6247_v61 = vsub.f32 %v9987_v11, %v6080_v28  ;;  %v1130_v38 = vadd.f32 %v921_v6, %v920_v2  ;;  %v9990_v3 = vunpack.c.l.bf16 %v9989_v5  ;;  %v926_v34 = vmul.f32 %v6204_v0, %v6204_v0 }
 0x15c   :  { %9983 = vst [vmem:[#allocation150_spill] sm:$0xff] %v6225_v12  ;;  %9986 = vst [vmem:[#allocation41_spill] sm:$0xff] %v6240_v55  ;;  %v6259_v26 = vmul.f32 0.0013020834, %v5663_v36  ;;  %v927_v11 = vmul.f32 %v6214_v15, %v6214_v15  ;;  %v9993_v56 = vunpack.c.l.bf16 %v9992_v54  ;;  %v9995_v6 = vunpack.c.h.bf16 %v9992_v54 }
 0x15d   :  { %9988 = vst [vmem:[#allocation151_spill] sm:$0xff] %v6247_v61  ;;  %v6254_v50 = vsub.f32 %v9990_v3, %v6134_v20  ;;  %v6276_v36 = vmul.f32 0.0013020834, %v5665_v14  ;;  %v6278_v0 = vmul.f32 0.0013020834, %v516_v30  ;;  %v9997_v44 = vunpack.c.h.bf16 %v9984_v32  ;;  %2005 = vbcast.lane.b32.xlu1 %v5917_v29, 312 }
 0x15e   :  { %v6268_v2 = vsub.f32 %v9993_v56, %v6209_v17  ;;  %v6273_v3 = vsub.f32 %v9995_v6, %v6209_v17  ;;  %v1116_v15 = vadd.f32 %v909_v1, %v908_v39  ;;  %v917_v56 = vmul.f32 %v6225_v12, %v6225_v12 }
 0x15f   :  { %9991 = vst [vmem:[#allocation43_spill] sm:$0xff] %v6254_v50  ;;  %v6283_v7 = vsub.f32 %v9997_v44, %v6071_v31  ;;  %v918_v10 = vmul.f32 %v6240_v55, %v6240_v55  ;;  %v1124_v54 = vadd.f32 %v1123_v4, %v916_v33  ;;  %v9999_v6 = vunpack.c.l.bf16 %v5274_v40 }
 0x160   :  { %9994 = vst [vmem:[#allocation44_spill] sm:$0xff] %v6268_v2  ;;  %9996 = vst [vmem:[#allocation152_spill] sm:$0xff] %v6273_v3  ;;  %v923_v30 = vmul.f32 %v6247_v61, %v6247_v61  ;;  %v1131_v51 = vadd.f32 %v1130_v38, %v922_v41  ;;  %v10001_v32 = vunpack.c.h.bf16 %v9989_v5  ;;  %v928_v39 = vmul.f32 %v6254_v50, %v6254_v50 }
 0x161   :  { %9998 = vst [vmem:[#allocation153_spill] sm:$0xff] %v6283_v7  ;;  %v6292_v14 = vsub.f32 %v9999_v6, %v6080_v28  ;;  %v1137_v1 = vadd.f32 %v927_v11, %v926_v34  ;;  %v10003_v44 = vunpack.c.l.bf16 %v5305_v18  ;;  %v932_v4 = vmul.f32 %v6268_v2, %v6268_v2  ;;  %v10007_v34 = vld [vmem:[#allocation45_spill] sm:$0xff]  ;;  %2009 = vbcast.lane.b32.xlu1 %v5917_v29, 320 }
 0x162   :  { %v6299_v31 = vsub.f32 %v10001_v32, %v6134_v20  ;;  %v933_v41 = vmul.f32 %v6273_v3, %v6273_v3  ;;  %v919_v38 = vmul.f32 %v6283_v7, %v6283_v7  ;;  %v10005_v5 = vunpack.c.h.bf16 %v5274_v40 }
 0x163   :  { %10000 = vst [vmem:[#allocation154_spill] sm:$0xff] %v6292_v14  ;;  %v6307_v33 = vsub.f32 %v10003_v44, %v6209_v17  ;;  %v10008_v11 = vunpack.c.l.bf16 %v10007_v34  ;;  %v10010_v44 = vunpack.c.h.bf16 %v10007_v34  ;;  %v6331_v3 = vmul.f32 0.0013020834, %v5675_v45 }
 0x164   :  { %10002 = vst [vmem:[#allocation155_spill] sm:$0xff] %v6299_v31  ;;  %v6318_v6 = vsub.f32 %v10005_v5, %v6080_v28  ;;  %v1125_v50 = vadd.f32 %v1124_v54, %v917_v56  ;;  %v10012_v61 = vunpack.c.l.bf16 %v5301_v21  ;;  %v537_v28 = vpop.xlane.xlu1 %536  ;;  %v1117_v5 = vadd.f32 %v1116_v15, %v910_v59 }
 0x165   :  { %10004 = vst [vmem:[#allocation156_spill] sm:$0xff] %v6307_v33  ;;  %v6323_v32 = vsub.f32 %v10008_v11, %v6278_v0  ;;  %v6328_v2 = vsub.f32 %v10010_v44, %v6278_v0  ;;  %v6338_v7 = vmul.f32 0.0013020834, %v523_v60  ;;  %v924_v11 = vmul.f32 %v6292_v14, %v6292_v14 }
 0x166   :  { %10006 = vst [vmem:[#allocation157_spill] sm:$0xff] %v6318_v6  ;;  %v6336_v40 = vsub.f32 %v10012_v61, %v6134_v20  ;;  %v1132_v55 = vadd.f32 %v1131_v51, %v923_v30  ;;  %v929_v34 = vmul.f32 %v6299_v31, %v6299_v31  ;;  %v1138_v45 = vadd.f32 %v1137_v1, %v928_v39  ;;  %v10016_v51 = vld [vmem:[#allocation47_spill] sm:$0xff]  ;;  %v10022_v31 = vld [vmem:[#allocation46_spill] sm:$0xff] }
 0x167   :  { %10009 = vst [vmem:[#allocation45_spill] sm:$0xff] %v6323_v32  ;;  %10011 = vst [vmem:[#allocation158_spill] sm:$0xff] %v6328_v2  ;;  %v10014_v56 = vunpack.c.h.bf16 %v5305_v18  ;;  %v934_v59 = vmul.f32 %v6307_v33, %v6307_v33  ;;  %v1144_v15 = vadd.f32 %v933_v41, %v932_v4  ;;  %v925_v60 = vmul.f32 %v6318_v6, %v6318_v6  ;;  %v10019_v1 = vld [vmem:[#allocation83_spill] sm:$0xff] }
 0x168   :  { %10013 = vst [vmem:[#allocation159_spill] sm:$0xff] %v6336_v40  ;;  %v10017_v61 = vunpack.c.l.bf16 %v10016_v51  ;;  %v938_v39 = vmul.f32 %v6323_v32, %v6323_v32  ;;  %v939_v18 = vmul.f32 %v6328_v2, %v6328_v2  ;;  %v6364_v44 = vmul.f32 0.0013020834, %v10019_v1  ;;  %v10025_v2 = vld [vmem:[#allocation48_spill] sm:$0xff] }
 0x169   :  { %v6348_v54 = vsub.f32 %v10014_v56, %v6209_v17  ;;  %v1126_v56 = vadd.f32 %v1125_v50, %v918_v10  ;;  %v10020_v4 = vunpack.c.h.bf16 %v5301_v21  ;;  %v930_v33 = vmul.f32 %v6336_v40, %v6336_v40 }
 0x16a   :  { %v6357_v30 = vsub.f32 %v10017_v61, %v6278_v0  ;;  %v1133_v61 = vadd.f32 %v1132_v55, %v924_v11  ;;  %v10023_v6 = vunpack.c.l.bf16 %v10022_v31  ;;  %v10026_v14 = vunpack.c.l.bf16 %v10025_v2 }
 0x16b   :  { %10015 = vst [vmem:[#allocation160_spill] sm:$0xff] %v6348_v54  ;;  %v6369_v41 = vsub.f32 %v10020_v4, %v6134_v20  ;;  %v10028_v10 = vunpack.c.h.bf16 %v10025_v2  ;;  %v1139_v50 = vadd.f32 %v1138_v45, %v929_v34  ;;  %v935_v20 = vmul.f32 %v6348_v54, %v6348_v54  ;;  %v544_v4 = vpop.xlane.xlu1 %543 }
 0x16c   :  { %10018 = vst [vmem:[#allocation47_spill] sm:$0xff] %v6357_v30  ;;  %v6376_v32 = vsub.f32 %v10023_v6, %v6209_v17  ;;  %v6381_v1 = vsub.f32 %v10026_v14, %v6338_v7  ;;  %v1145_v55 = vadd.f32 %v1144_v15, %v934_v59  ;;  %v1118_v11 = vadd.f32 %v1117_v5, %v6220_v63  ;;  %v10030_v6 = vld [vmem:[#allocation89_spill] sm:$0xff] }
 0x16d   :  { %10021 = vst [vmem:[#allocation83_spill] sm:$0xff] %v6369_v41  ;;  %v6386_v21 = vsub.f32 %v10028_v10, %v6338_v7  ;;  %v6392_v40 = vmul.f32 0.0013020834, %v10030_v6  ;;  %v10032_v14 = vunpack.c.h.bf16 %v10016_v51  ;;  %v940_v2 = vmul.f32 %v6357_v30, %v6357_v30  ;;  %v10036_v51 = vld [vmem:[#allocation50_spill] sm:$0xff] }
 0x16e   :  { %10024 = vst [vmem:[#allocation46_spill] sm:$0xff] %v6376_v32  ;;  %10027 = vst [vmem:[#allocation48_spill] sm:$0xff] %v6381_v1  ;;  %v1151_v10 = vadd.f32 %v939_v18, %v938_v39  ;;  %v6401_v34 = vadd.f32 %v1126_v56, %v919_v38  ;;  %v611_v45 = vmul.f32 0.0013020834, %v530_v9  ;;  %v931_v59 = vmul.f32 %v6369_v41, %v6369_v41 }
 0x16f   :  { %10029 = vst [vmem:[#allocation161_spill] sm:$0xff] %v6386_v21  ;;  %10031 = vst [vmem:[#allocation89_spill] sm:$0xff] %v6392_v40  ;;  %v6397_v12 = vsub.f32 %v10032_v14, %v6278_v0  ;;  %v10034_v63 = vunpack.c.h.bf16 %v10022_v31  ;;  %v6410_v15 = vadd.f32 %v1133_v61, %v925_v60  ;;  %v10037_v6 = vunpack.c.l.bf16 %v10036_v51  ;;  %v10039_v60 = vld [vmem:[#allocation49_spill] sm:$0xff] }
 0x170   :  { %v944_v38 = vmul.f32 %v6381_v1, %v6381_v1  ;;  %v945_v9 = vmul.f32 %v6386_v21, %v6386_v21  ;;  %v1140_v39 = vadd.f32 %v1139_v50, %v930_v33  ;;  %v936_v18 = vmul.f32 %v6376_v32, %v6376_v32 }
 0x171   :  { %10033 = vst [vmem:[#allocation162_spill] sm:$0xff] %v6397_v12  ;;  %v6408_v5 = vsub.f32 %v10034_v63, %v6209_v17  ;;  %v6415_v14 = vsub.f32 %v10037_v6, %v6338_v7  ;;  %v1146_v31 = vadd.f32 %v1145_v55, %v935_v20  ;;  %v1119_v17 = vadd.f32 %v1118_v11, %v6229_v48  ;;  %v551_v48 = vpop.xlane.xlu1 %550  ;;  %v10044_v55 = vld [vmem:[#allocation51_spill] sm:$0xff] }
 0x172   :  { %v10040_v56 = vunpack.c.l.bf16 %v10039_v60  ;;  %v10042_v63 = vunpack.c.h.bf16 %v10039_v60  ;;  %v941_v21 = vmul.f32 %v6397_v12, %v6397_v12  ;;  %v1152_v33 = vadd.f32 %v1151_v10, %v940_v2 }
 0x173   :  { %10035 = vst [vmem:[#allocation163_spill] sm:$0xff] %v6408_v5  ;;  %10038 = vst [vmem:[#allocation50_spill] sm:$0xff] %v6415_v14  ;;  %v6436_v50 = vmul.f32 0.0013020834, %v537_v28  ;;  %v937_v20 = vmul.f32 %v6408_v5, %v6408_v5  ;;  %v10045_v11 = vunpack.c.l.bf16 %v10044_v55  ;;  %v10049_v60 = vunpack.c.h.bf16 %v10036_v51 }
 0x174   :  { %v6427_v61 = vsub.f32 %v10040_v56, %v6278_v0  ;;  %v6432_v6 = vsub.f32 %v10042_v63, %v6278_v0  ;;  %v10047_v56 = vunpack.c.h.bf16 %v10044_v55  ;;  %v6448_v0 = vmul.f32 0.0013020834, %v544_v4  ;;  %v10051_v55 = vld [vmem:[#allocation53_spill] sm:$0xff] }
 0x175   :  { %v6442_v1 = vsub.f32 %v10045_v11, %v611_v45  ;;  %v6453_v2 = vsub.f32 %v10049_v60, %v6338_v7  ;;  %v946_v28 = vmul.f32 %v6415_v14, %v6415_v14  ;;  %v1158_v10 = vadd.f32 %v945_v9, %v944_v38  ;;  %v10054_v14 = vld [vmem:[#allocation52_spill] sm:$0xff]  ;;  %1016 = vadd.xlane.f32.xlu0 %v5892_v47 }
 0x176   :  { %10041 = vst [vmem:[#allocation49_spill] sm:$0xff] %v6427_v61  ;;  %10043 = vst [vmem:[#allocation164_spill] sm:$0xff] %v6432_v6  ;;  %v6446_v30 = vsub.f32 %v10047_v56, %v611_v45  ;;  %v6457_v63 = vadd.f32 %v1140_v39, %v931_v59  ;;  %v1147_v12 = vadd.f32 %v1146_v31, %v936_v18  ;;  %v10052_v56 = vunpack.c.l.bf16 %v10051_v55  ;;  %v10057_v39 = vld [vmem:[#allocation54_spill] sm:$0xff] }
 0x177   :  { %10046 = vst [vmem:[#allocation51_spill] sm:$0xff] %v6442_v1  ;;  %10050 = vst [vmem:[#allocation166_spill] sm:$0xff] %v6453_v2  ;;  %v6460_v11 = vadd.f32 %v1119_v17, %v6233_v23  ;;  %v942_v51 = vmul.f32 %v6427_v61, %v6427_v61  ;;  %v943_v60 = vmul.f32 %v6432_v6, %v6432_v6  ;;  %v10055_v38 = vunpack.c.l.bf16 %v10054_v14 }
 0x178   :  { %10048 = vst [vmem:[#allocation165_spill] sm:$0xff] %v6446_v30  ;;  %v6465_v4 = vsub.f32 %v10052_v56, %v6338_v7  ;;  %v1153_v5 = vadd.f32 %v1152_v33, %v941_v21  ;;  %v950_v23 = vmul.f32 %v6442_v1, %v6442_v1  ;;  %v951_v9 = vmul.f32 %v6446_v30, %v6446_v30 }
 0x179   :  { %v6473_v59 = vsub.f32 %v10055_v38, %v611_v45  ;;  %v10058_v18 = vunpack.c.l.bf16 %v10057_v39  ;;  %v10060_v17 = vunpack.c.h.bf16 %v10057_v39  ;;  %v947_v21 = vmul.f32 %v6453_v2, %v6453_v2  ;;  %v10062_v38 = vld [vmem:[#allocation56_spill] sm:$0xff]  ;;  %1128 = vadd.xlane.f32.xlu0 %v6401_v34 }
 0x17a   :  { %10053 = vst [vmem:[#allocation53_spill] sm:$0xff] %v6465_v4  ;;  %v1159_v33 = vadd.f32 %v1158_v10, %v946_v28  ;;  %v10063_v1 = vunpack.c.l.bf16 %v10062_v38  ;;  %v10065_v30 = vunpack.c.h.bf16 %v10062_v38  ;;  %v6503_v32 = vmul.f32 0.0013020834, %v551_v48  ;;  %v558_v10 = vpop.xlane.xlu1 %557 }
 0x17b   :  { %10056 = vst [vmem:[#allocation52_spill] sm:$0xff] %v6473_v59  ;;  %v6482_v31 = vsub.f32 %v10058_v18, %v6436_v50  ;;  %v6487_v56 = vsub.f32 %v10060_v17, %v6436_v50  ;;  %v6501_v18 = vadd.f32 %v1147_v12, %v937_v20  ;;  %v10067_v39 = vunpack.c.h.bf16 %v10051_v55 }
 0x17c   :  { %v6494_v6 = vsub.f32 %v10063_v1, %v6448_v0  ;;  %v6499_v61 = vsub.f32 %v10065_v30, %v6448_v0  ;;  %v948_v28 = vmul.f32 %v6465_v4, %v6465_v4  ;;  %v1154_v1 = vadd.f32 %v1153_v5, %v942_v51  ;;  %v10071_v30 = vld [vmem:[#allocation57_spill] sm:$0xff]  ;;  %v10077_v51 = vld [vmem:[#allocation58_spill] sm:$0xff] }
 0x17d   :  { %10059 = vst [vmem:[#allocation54_spill] sm:$0xff] %v6482_v31  ;;  %10061 = vst [vmem:[#allocation167_spill] sm:$0xff] %v6487_v56  ;;  %v6508_v17 = vsub.f32 %v10067_v39, %v6338_v7  ;;  %v10069_v2 = vunpack.c.h.bf16 %v10054_v14  ;;  %v10072_v38 = vunpack.c.l.bf16 %v10071_v30  ;;  %v952_v20 = vmul.f32 %v6473_v59, %v6473_v59  ;;  %v10074_v7 = vld [vmem:[#allocation55_spill] sm:$0xff]  ;;  %1135 = vadd.xlane.f32.xlu0 %v6410_v15 }
 0x17e   :  { %10064 = vst [vmem:[#allocation56_spill] sm:$0xff] %v6494_v6  ;;  %10066 = vst [vmem:[#allocation168_spill] sm:$0xff] %v6499_v61  ;;  %v1165_v48 = vadd.f32 %v951_v9, %v950_v23  ;;  %v10075_v55 = vunpack.c.l.bf16 %v10074_v7  ;;  %v956_v5 = vmul.f32 %v6482_v31, %v6482_v31  ;;  %v957_v14 = vmul.f32 %v6487_v56, %v6487_v56 }
 0x17f   :  { %10068 = vst [vmem:[#allocation169_spill] sm:$0xff] %v6508_v17  ;;  %v6514_v54 = vsub.f32 %v10069_v2, %v611_v45  ;;  %v6518_v12 = vsub.f32 %v10072_v38, %v611_v45  ;;  %v1160_v2 = vadd.f32 %v1159_v33, %v947_v21  ;;  %v10078_v38 = vunpack.c.l.bf16 %v10077_v51  ;;  %v10082_v21 = vld [vmem:[#allocation59_spill] sm:$0xff] }
 0x180   :  { %v6525_v39 = vsub.f32 %v10075_v55, %v6436_v50  ;;  %v962_v23 = vmul.f32 %v6494_v6, %v6494_v6  ;;  %v963_v9 = vmul.f32 %v6499_v61, %v6499_v61  ;;  %v949_v55 = vmul.f32 %v6508_v17, %v6508_v17 }
 0x181   :  { %10070 = vst [vmem:[#allocation170_spill] sm:$0xff] %v6514_v54  ;;  %10073 = vst [vmem:[#allocation57_spill] sm:$0xff] %v6518_v12  ;;  %v6534_v4 = vsub.f32 %v10078_v38, %v6448_v0  ;;  %v10080_v31 = vunpack.c.h.bf16 %v10071_v30  ;;  %v10083_v33 = vunpack.c.l.bf16 %v10082_v21  ;;  %v10085_v38 = vunpack.c.h.bf16 %v10082_v21  ;;  %v565_v30 = vpop.xlane.xlu1 %564  ;;  %1142 = vadd.xlane.f32.xlu0 %v6457_v63 }
 0x182   :  { %10076 = vst [vmem:[#allocation55_spill] sm:$0xff] %v6525_v39  ;;  %v6556_v6 = vadd.f32 %v1154_v1, %v943_v60  ;;  %v6558_v61 = vmul.f32 0.0013020834, %v558_v10  ;;  %v953_v17 = vmul.f32 %v6514_v54, %v6514_v54  ;;  %v958_v21 = vmul.f32 %v6525_v39, %v6525_v39 }
 0x183   :  { %10079 = vst [vmem:[#allocation58_spill] sm:$0xff] %v6534_v4  ;;  %v6544_v59 = vsub.f32 %v10080_v31, %v611_v45  ;;  %v6549_v56 = vsub.f32 %v10083_v33, %v6503_v32  ;;  %v6554_v41 = vsub.f32 %v10085_v38, %v6503_v32  ;;  %v954_v45 = vmul.f32 %v6518_v12, %v6518_v12 }
 0x184   :  { %v1166_v31 = vadd.f32 %v1165_v48, %v952_v20  ;;  %v10087_v33 = vunpack.c.h.bf16 %v10074_v7  ;;  %v1172_v60 = vadd.f32 %v957_v14, %v956_v5  ;;  %v1161_v10 = vadd.f32 %v1160_v2, %v948_v28  ;;  %v10093_v14 = vld [vmem:[#allocation62_spill] sm:$0xff] }
 0x185   :  { %10081 = vst [vmem:[#allocation171_spill] sm:$0xff] %v6544_v59  ;;  %10084 = vst [vmem:[#allocation59_spill] sm:$0xff] %v6549_v56  ;;  %v10088_v1 = vunpack.c.h.bf16 %v10077_v51  ;;  %v964_v20 = vmul.f32 %v6534_v4, %v6534_v4  ;;  %v1179_v48 = vadd.f32 %v963_v9, %v962_v23  ;;  %v955_v7 = vmul.f32 %v6544_v59, %v6544_v59  ;;  %v10095_v23 = vld [vmem:[#allocation61_spill] sm:$0xff] }
 0x186   :  { %10086 = vst [vmem:[#allocation172_spill] sm:$0xff] %v6554_v41  ;;  %v6567_v29 = vsub.f32 %v10087_v33, %v6436_v50  ;;  %v10090_v33 = vld [vmem:[#allocation60_spill] sm:$0xff]  ;;  %v968_v47 = vmul.f32 %v6549_v56, %v6549_v56  ;;  %v969_v28 = vmul.f32 %v6554_v41, %v6554_v41  ;;  %v6590_v5 = vmul.f32 0.0013020834, %v565_v30  ;;  %1009 = vadd.xlane.f32.xlu1 %v5857_v27 }
 0x187   :  { %v6575_v38 = vsub.f32 %v10088_v1, %v6448_v0  ;;  %v10091_v12 = vunpack.c.l.bf16 %v10090_v33  ;;  %v10094_v2 = vunpack.c.l.bf16 %v10093_v14  ;;  %v10096_v9 = vunpack.c.l.bf16 %v10095_v23  ;;  %1149 = vadd.xlane.f32.xlu0 %v6501_v18 }
 0x188   :  { %v1167_v56 = vadd.f32 %v1166_v31, %v953_v17  ;;  %v10100_v30 = vunpack.c.h.bf16 %v10093_v14  ;;  %v1173_v59 = vadd.f32 %v1172_v60, %v958_v21  ;;  %v6615_v54 = vadd.f32 %v1161_v10, %v949_v55  ;;  %v572_v14 = vpop.xlane.xlu1 %571  ;;  %v10106_v21 = vld [vmem:[#allocation64_spill] sm:$0xff] }
 0x189   :  { %10089 = vst [vmem:[#allocation173_spill] sm:$0xff] %v6575_v38  ;;  %v6584_v39 = vsub.f32 %v10091_v12, %v6503_v32  ;;  %v6595_v51 = vsub.f32 %v10094_v2, %v6436_v50  ;;  %v6600_v1 = vsub.f32 %v10096_v9, %v6558_v61  ;;  %v10098_v12 = vunpack.c.h.bf16 %v10095_v23  ;;  %v10102_v9 = vld [vmem:[#allocation63_spill] sm:$0xff] }
 0x18a   :  { %v6610_v41 = vsub.f32 %v10100_v30, %v6436_v50  ;;  %v959_v2 = vmul.f32 %v6567_v29, %v6567_v29  ;;  %v10103_v40 = vunpack.c.l.bf16 %v10102_v9  ;;  %v965_v17 = vmul.f32 %v6575_v38, %v6575_v38  ;;  %1121 = vadd.xlane.f32.xlu1 %v6460_v11 }
 0x18b   :  { %10092 = vst [vmem:[#allocation60_spill] sm:$0xff] %v6584_v39  ;;  %10097 = vst [vmem:[#allocation62_spill] sm:$0xff] %v6600_v1  ;;  %v6605_v4 = vsub.f32 %v10098_v12, %v6558_v61  ;;  %v1180_v31 = vadd.f32 %v1179_v48, %v964_v20  ;;  %v10104_v50 = vunpack.c.h.bf16 %v10090_v33  ;;  %v970_v34 = vmul.f32 %v6584_v39, %v6584_v39  ;;  %v10109_v48 = vld [vmem:[#allocation65_spill] sm:$0xff] }
 0x18c   :  { %10101 = vst [vmem:[#allocation174_spill] sm:$0xff] %v6610_v41  ;;  %v6620_v23 = vsub.f32 %v10103_v40, %v6448_v0  ;;  %v1186_v55 = vadd.f32 %v969_v28, %v968_v47  ;;  %v10107_v60 = vunpack.c.l.bf16 %v10106_v21  ;;  %v974_v40 = vmul.f32 %v6600_v1, %v6600_v1  ;;  %1156 = vadd.xlane.f32.xlu0 %v6556_v6 }
 0x18d   :  { %10099 = vst [vmem:[#allocation61_spill] sm:$0xff] %v6605_v4  ;;  %v6627_v12 = vsub.f32 %v10104_v50, %v6503_v32  ;;  %v975_v20 = vmul.f32 %v6605_v4, %v6605_v4  ;;  %v10110_v33 = vunpack.c.l.bf16 %v10109_v48  ;;  %v10112_v50 = vunpack.c.h.bf16 %v10109_v48 }
 0x18e   :  { %v6634_v10 = vsub.f32 %v10107_v60, %v6558_v61  ;;  %v1168_v28 = vadd.f32 %v1167_v56, %v954_v45  ;;  %v960_v60 = vmul.f32 %v6595_v51, %v6595_v51  ;;  %v961_v1 = vmul.f32 %v6610_v41, %v6610_v41  ;;  %v10115_v56 = vld [vmem:[#allocation66_spill] sm:$0xff]  ;;  %1023 = vadd.xlane.f32.xlu1 %v5992_v53 }
 0x18f   :  { %10105 = vst [vmem:[#allocation63_spill] sm:$0xff] %v6627_v12  ;;  %v6643_v30 = vsub.f32 %v10110_v33, %v6590_v5  ;;  %v6648_v47 = vsub.f32 %v10112_v50, %v6590_v5  ;;  %v1174_v39 = vadd.f32 %v1173_v59, %v959_v2  ;;  %v10114_v4 = vunpack.c.h.bf16 %v10102_v9  ;;  %v10120_v9 = vld [vmem:[#allocation67_spill] sm:$0xff] }
 0x190   :  { %10108 = vst [vmem:[#allocation64_spill] sm:$0xff] %v6634_v10  ;;  %v966_v48 = vmul.f32 %v6620_v23, %v6620_v23  ;;  %v1181_v50 = vadd.f32 %v1180_v31, %v965_v17  ;;  %v10116_v45 = vunpack.c.l.bf16 %v10115_v56  ;;  %v971_v41 = vmul.f32 %v6627_v12, %v6627_v12  ;;  %1163 = vadd.xlane.f32.xlu0 %v6615_v54 }
 0x191   :  { %10111 = vst [vmem:[#allocation65_spill] sm:$0xff] %v6643_v30  ;;  %10113 = vst [vmem:[#allocation175_spill] sm:$0xff] %v6648_v47  ;;  %v6658_v33 = vsub.f32 %v10114_v4, %v6448_v0  ;;  %v1187_v59 = vadd.f32 %v1186_v55, %v970_v34  ;;  %v10118_v15 = vunpack.c.h.bf16 %v10106_v21  ;;  %v976_v0 = vmul.f32 %v6634_v10, %v6634_v10  ;;  %v579_v21 = vpop.xlane.xlu1 %578 }
 0x192   :  { %v6665_v38 = vsub.f32 %v10116_v45, %v6503_v32  ;;  %v1193_v4 = vadd.f32 %v975_v20, %v974_v40  ;;  %v10121_v17 = vunpack.c.l.bf16 %v10120_v9  ;;  %v980_v45 = vmul.f32 %v6643_v30, %v6643_v30  ;;  %1030 = vadd.xlane.f32.xlu1 %v6001_v24 }
 0x193   :  { %v6672_v2 = vsub.f32 %v10118_v15, %v6558_v61  ;;  %v981_v34 = vmul.f32 %v6648_v47, %v6648_v47  ;;  %v1175_v55 = vadd.f32 %v1174_v39, %v960_v60  ;;  %v617_v12 = vmul.f32 0.0013020834, %v572_v14 }
 0x194   :  { %10117 = vst [vmem:[#allocation66_spill] sm:$0xff] %v6665_v38  ;;  %v6679_v31 = vsub.f32 %v10121_v17, %v6590_v5  ;;  %v866_v15 = vmul.f32 %v6107_v37, %v6107_v37  ;;  %v867_v40 = vmul.f32 %v6112_v13, %v6112_v13  ;;  %v6690_v20 = vadd.f32 %v1168_v28, %v955_v7  ;;  %v10125_v13 = vld [vmem:[#allocation69_spill] sm:$0xff] }
 0x195   :  { %10119 = vst [vmem:[#allocation176_spill] sm:$0xff] %v6672_v2  ;;  %v967_v17 = vmul.f32 %v6658_v33, %v6658_v33  ;;  %v1182_v30 = vadd.f32 %v1181_v50, %v966_v48  ;;  %v10123_v47 = vunpack.c.h.bf16 %v10115_v56  ;;  %v972_v14 = vmul.f32 %v6665_v38, %v6665_v38 }
 0x196   :  { %10122 = vst [vmem:[#allocation67_spill] sm:$0xff] %v6679_v31  ;;  %v1188_v60 = vadd.f32 %v1187_v59, %v971_v41  ;;  %v10126_v63 = vunpack.c.l.bf16 %v10125_v13  ;;  %v977_v28 = vmul.f32 %v6672_v2, %v6672_v2  ;;  %v1194_v48 = vadd.f32 %v1193_v4, %v976_v0  ;;  %v10130_v59 = vld [vmem:[#allocation68_spill] sm:$0xff]  ;;  %1170 = vadd.xlane.f32.xlu0 %v6690_v20 }
 0x197   :  { %v6697_v39 = vsub.f32 %v10123_v47, %v6503_v32  ;;  %v10128_v50 = vunpack.c.h.bf16 %v10120_v9  ;;  %v982_v27 = vmul.f32 %v6679_v31, %v6679_v31  ;;  %v1200_v47 = vadd.f32 %v981_v34, %v980_v45  ;;  %v586_v34 = vpop.xlane.xlu1 %585  ;;  %1037 = vadd.xlane.f32.xlu1 %v6019_v52  ;;  %v10347_v31 = vld [vmem:[#allocation160_spill] sm:$0xff] }
 0x198   :  { %v6705_v7 = vsub.f32 %v10126_v63, %v6558_v61  ;;  %v6716_v56 = vadd.f32 %v1175_v55, %v961_v1  ;;  %v1067_v41 = vadd.f32 %v867_v40, %v866_v15  ;;  %v10131_v37 = vunpack.c.l.bf16 %v10130_v59 }
 0x199   :  { %10124 = vst [vmem:[#allocation177_spill] sm:$0xff] %v6697_v39  ;;  %v6712_v32 = vsub.f32 %v10128_v50, %v6590_v5  ;;  %v10133_v10 = vunpack.c.h.bf16 %v10130_v59  ;;  %v6727_v0 = vadd.f32 %v1182_v30, %v967_v17  ;;  %v6729_v4 = vmul.f32 0.0013020834, %v579_v21  ;;  %v10137_v21 = vld [vmem:[#allocation72_spill] sm:$0xff]  ;;  %v10140_v17 = vld [vmem:[#allocation70_spill] sm:$0xff]  ;;  %v10143_v50 = vld [vmem:[#allocation17_spill] sm:$0xff] }
 0x19a   :  { %10127 = vst [vmem:[#allocation69_spill] sm:$0xff] %v6705_v7  ;;  %v6720_v63 = vsub.f32 %v10131_v37, %v617_v12  ;;  %v973_v9 = vmul.f32 %v6697_v39, %v6697_v39  ;;  %v10135_v1 = vunpack.c.h.bf16 %v10125_v13  ;;  %v1189_v37 = vadd.f32 %v1188_v60, %v972_v14  ;;  %1177 = vadd.xlane.f32.xlu0 %v6716_v56 }
 0x19b   :  { %10129 = vst [vmem:[#allocation178_spill] sm:$0xff] %v6712_v32  ;;  %v6724_v2 = vsub.f32 %v10133_v10, %v617_v12  ;;  %v978_v10 = vmul.f32 %v6705_v7, %v6705_v7  ;;  %v1062_v18 = vadd.f32 %v6235_v16, %v6088_v35  ;;  %v868_v30 = vmul.f32 %v6131_v57, %v6131_v57  ;;  %v10341_v57 = vld [vmem:[#allocation159_spill] sm:$0xff]  ;;  %v10348_v7 = vld [vmem:[#allocation46_spill] sm:$0xff] }
 0x19c   :  { %10132 = vst [vmem:[#allocation68_spill] sm:$0xff] %v6720_v63  ;;  %v6736_v45 = vsub.f32 %v10135_v1, %v6558_v61  ;;  %v1195_v55 = vadd.f32 %v1194_v48, %v977_v28  ;;  %v10138_v15 = vunpack.c.l.bf16 %v10137_v21  ;;  %v983_v61 = vmul.f32 %v6712_v32, %v6712_v32  ;;  %1044 = vadd.xlane.f32.xlu1 %v6073_v49 }
 0x19d   :  { %10134 = vst [vmem:[#allocation179_spill] sm:$0xff] %v6724_v2  ;;  %v1201_v11 = vadd.f32 %v1200_v47, %v982_v27  ;;  %v1068_v40 = vadd.f32 %v1067_v41, %v868_v30  ;;  %v10141_v14 = vunpack.c.l.bf16 %v10140_v17  ;;  %v986_v35 = vmul.f32 %v6720_v63, %v6720_v63 }
 0x19e   :  { %10136 = vst [vmem:[#allocation180_spill] sm:$0xff] %v6736_v45  ;;  %v6748_v13 = vsub.f32 %v10138_v15, %v6590_v5  ;;  %v987_v16 = vmul.f32 %v6724_v2, %v6724_v2  ;;  %v6761_v28 = vmul.f32 0.0013020834, %v586_v34  ;;  %v979_v48 = vmul.f32 %v6736_v45, %v6736_v45  ;;  %1184 = vadd.xlane.f32.xlu0 %v6727_v0  ;;  %v10313_v2 = vld [vmem:[#allocation90_spill] sm:$0xff] }
 0x19f   :  { %v6754_v60 = vsub.f32 %v10141_v14, %v617_v12  ;;  %v10144_v27 = vunpack.c.l.bf16 %v10143_v50  ;;  %v10146_v41 = vunpack.c.h.bf16 %v10143_v50  ;;  %v6776_v1 = vadd.f32 %v1189_v37, %v973_v9 }
 0x1a0   :  { %10139 = vst [vmem:[#allocation72_spill] sm:$0xff] %v6748_v13  ;;  %v1063_v6 = vadd.f32 %v1062_v18, %v6094_v8  ;;  %v10148_v34 = vunpack.c.h.bf16 %v10137_v21  ;;  %v869_v15 = vmul.f32 %v6149_v42, %v6149_v42  ;;  %v1196_v14 = vadd.f32 %v1195_v55, %v978_v10  ;;  %v10154_v10 = vld [vmem:[#allocation75_spill] sm:$0xff]  ;;  %1051 = vadd.xlane.f32.xlu1 %v6082_v58 }
 0x1a1   :  { %10142 = vst [vmem:[#allocation70_spill] sm:$0xff] %v6754_v60  ;;  %v6768_v47 = vsub.f32 %v10144_v27, %v6152_v19  ;;  %v6773_v59 = vsub.f32 %v10146_v41, %v6152_v19  ;;  %v984_v50 = vmul.f32 %v6748_v13, %v6748_v13  ;;  %v1202_v27 = vadd.f32 %v1201_v11, %v983_v61 }
 0x1a2   :  { %v6782_v30 = vsub.f32 %v10148_v34, %v6590_v5  ;;  %v10150_v53 = vunpack.c.h.bf16 %v9964_v46  ;;  %v1069_v37 = vadd.f32 %v1068_v40, %v869_v15  ;;  %v10152_v8 = vunpack.c.h.bf16 %v10140_v17  ;;  %v10159_v17 = vld [vmem:[#allocation71_spill] sm:$0xff]  ;;  %1191 = vadd.xlane.f32.xlu0 %v6776_v1  ;;  %v10217_v1 = vld [vmem:[#allocation25_spill] sm:$0xff] }
 0x1a3   :  { %10145 = vst [vmem:[#allocation17_spill] sm:$0xff] %v6768_v47  ;;  %10147 = vst [vmem:[#allocation181_spill] sm:$0xff] %v6773_v59  ;;  %v988_v5 = vmul.f32 %v6754_v60, %v6754_v60  ;;  %v1207_v21 = vadd.f32 %v987_v16, %v986_v35  ;;  %v10155_v55 = vunpack.c.l.bf16 %v10154_v10  ;;  %v10157_v61 = vunpack.c.h.bf16 %v10154_v10 }
 0x1a4   :  { %10149 = vst [vmem:[#allocation182_spill] sm:$0xff] %v6782_v30  ;;  %v6791_v9 = vsub.f32 %v10150_v53, %v6065_v43  ;;  %v6795_v18 = vsub.f32 %v10152_v8, %v617_v12  ;;  %v872_v43 = vmul.f32 %v6768_v47, %v6768_v47  ;;  %v873_v11 = vmul.f32 %v6773_v59, %v6773_v59 }
 0x1a5   :  { %v6802_v41 = vsub.f32 %v10155_v55, %v617_v12  ;;  %v6806_v46 = vsub.f32 %v10157_v61, %v617_v12  ;;  %v6814_v40 = vadd.f32 %v1063_v6, %v6098_v25  ;;  %v870_v54 = vmul.f32 %v6167_v62, %v6167_v62  ;;  %v10164_v6 = vld [vmem:[#allocation18_spill] sm:$0xff]  ;;  %1058 = vadd.xlane.f32.xlu1 %v6179_v22  ;;  %v10340_v62 = vld [vmem:[#allocation155_spill] sm:$0xff] }
 0x1a6   :  { %10151 = vst [vmem:[#allocation183_spill] sm:$0xff] %v6791_v9  ;;  %10153 = vst [vmem:[#allocation184_spill] sm:$0xff] %v6795_v18  ;;  %v10160_v35 = vunpack.c.l.bf16 %v10159_v17  ;;  %v10162_v12 = vunpack.c.h.bf16 %v10159_v17  ;;  %v6828_v15 = vadd.f32 %v1196_v14, %v979_v48  ;;  %v985_v24 = vmul.f32 %v6782_v30, %v6782_v30 }
 0x1a7   :  { %10156 = vst [vmem:[#allocation75_spill] sm:$0xff] %v6802_v41  ;;  %10158 = vst [vmem:[#allocation185_spill] sm:$0xff] %v6806_v46  ;;  %v1203_v25 = vadd.f32 %v1202_v27, %v984_v50  ;;  %v10165_v53 = vunpack.c.l.bf16 %v10164_v6  ;;  %v871_v10 = vmul.f32 %v6791_v9, %v6791_v9  ;;  %v1070_v55 = vadd.f32 %v1069_v37, %v870_v54  ;;  %v10167_v27 = vld [vmem:[#allocation73_spill] sm:$0xff] }
 0x1a8   :  { %v6821_v16 = vsub.f32 %v10160_v35, %v6729_v4  ;;  %v6826_v34 = vsub.f32 %v10162_v12, %v6729_v4  ;;  %v989_v61 = vmul.f32 %v6795_v18, %v6795_v18  ;;  %v1208_v17 = vadd.f32 %v1207_v21, %v988_v5  ;;  %v10170_v5 = vld [vmem:[#allocation19_spill] sm:$0xff]  ;;  %1198 = vadd.xlane.f32.xlu0 %v6828_v15 }
 0x1a9   :  { %v6835_v8 = vsub.f32 %v10165_v53, %v6152_v19  ;;  %v990_v48 = vmul.f32 %v6802_v41, %v6802_v41  ;;  %v991_v14 = vmul.f32 %v6806_v46, %v6806_v46  ;;  %v1074_v50 = vadd.f32 %v873_v11, %v872_v43  ;;  %1065 = vadd.xlane.f32.xlu1 %v6814_v40  ;;  %v10311_v41 = vld [vmem:[#allocation81_spill] sm:$0xff] }
 0x1aa   :  { %10161 = vst [vmem:[#allocation71_spill] sm:$0xff] %v6821_v16  ;;  %10163 = vst [vmem:[#allocation186_spill] sm:$0xff] %v6826_v34  ;;  %v10168_v35 = vunpack.c.l.bf16 %v10167_v27  ;;  %v992_v37 = vmul.f32 %v6821_v16, %v6821_v16  ;;  %v993_v20 = vmul.f32 %v6826_v34, %v6826_v34  ;;  %v10171_v21 = vunpack.c.l.bf16 %v10170_v5  ;;  %v10177_v16 = vld [vmem:[#allocation23_spill] sm:$0xff] }
 0x1ab   :  { %10166 = vst [vmem:[#allocation18_spill] sm:$0xff] %v6835_v8  ;;  %v10173_v43 = vunpack.c.h.bf16 %v10170_v5  ;;  %v6866_v53 = vadd.f32 %v1203_v25, %v985_v24  ;;  %v10175_v52 = vunpack.c.h.bf16 %v10164_v6  ;;  %v10178_v34 = vunpack.c.l.bf16 %v10177_v16 }
 0x1ac   :  { %v6849_v12 = vsub.f32 %v10168_v35, %v6729_v4  ;;  %v6859_v54 = vsub.f32 %v10171_v21, %v6259_v26  ;;  %v874_v21 = vmul.f32 %v6835_v8, %v6835_v8  ;;  %v6880_v47 = vadd.f32 %v1070_v55, %v871_v10  ;;  %v10187_v10 = vld [vmem:[#allocation74_spill] sm:$0xff] }
 0x1ad   :  { %v6864_v11 = vsub.f32 %v10173_v43, %v6259_v26  ;;  %v6871_v35 = vsub.f32 %v10175_v52, %v6152_v19  ;;  %v6876_v59 = vsub.f32 %v10178_v34, %v6152_v19  ;;  %v1209_v5 = vadd.f32 %v1208_v17, %v989_v61  ;;  %v10184_v52 = vld [vmem:[#allocation77_spill] sm:$0xff]  ;;  %1205 = vadd.xlane.f32.xlu0 %v6866_v53 }
 0x1ae   :  { %10169 = vst [vmem:[#allocation73_spill] sm:$0xff] %v6849_v12  ;;  %10172 = vst [vmem:[#allocation19_spill] sm:$0xff] %v6859_v54  ;;  %v10180_v24 = vunpack.c.h.bf16 %v10177_v16  ;;  %v10182_v6 = vunpack.c.h.bf16 %v10167_v27  ;;  %v1075_v34 = vadd.f32 %v1074_v50, %v874_v21  ;;  %v10185_v46 = vunpack.c.l.bf16 %v10184_v52  ;;  %1072 = vadd.xlane.f32.xlu1 %v6880_v47 }
 0x1af   :  { %10174 = vst [vmem:[#allocation187_spill] sm:$0xff] %v6864_v11  ;;  %10176 = vst [vmem:[#allocation188_spill] sm:$0xff] %v6871_v35  ;;  %v10188_v55 = vunpack.c.l.bf16 %v10187_v10  ;;  %v994_v56 = vmul.f32 %v6849_v12, %v6849_v12  ;;  %v1214_v17 = vadd.f32 %v993_v20, %v992_v37  ;;  %v879_v50 = vmul.f32 %v6864_v11, %v6864_v11 }
 0x1b0   :  { %10179 = vst [vmem:[#allocation23_spill] sm:$0xff] %v6876_v59  ;;  %v6885_v25 = vsub.f32 %v10180_v24, %v6152_v19  ;;  %v6890_v43 = vsub.f32 %v10182_v6, %v6729_v4  ;;  %v6896_v8 = vsub.f32 %v10185_v46, %v6729_v4  ;;  %v10190_v19 = vunpack.c.h.bf16 %v10187_v10  ;;  %v10192_v24 = vld [vmem:[#allocation22_spill] sm:$0xff] }
 0x1b1   :  { %v6901_v61 = vsub.f32 %v10188_v55, %v6761_v28  ;;  %v878_v46 = vmul.f32 %v6859_v54, %v6859_v54  ;;  %v875_v27 = vmul.f32 %v6871_v35, %v6871_v35  ;;  %v876_v21 = vmul.f32 %v6876_v59, %v6876_v59  ;;  %v10199_v54 = vld [vmem:[#allocation21_spill] sm:$0xff] }
 0x1b2   :  { %10181 = vst [vmem:[#allocation189_spill] sm:$0xff] %v6885_v25  ;;  %10183 = vst [vmem:[#allocation190_spill] sm:$0xff] %v6890_v43  ;;  %v6906_v16 = vsub.f32 %v10190_v19, %v6761_v28  ;;  %v10193_v6 = vunpack.c.l.bf16 %v10192_v24  ;;  %v10195_v37 = vunpack.c.h.bf16 %v10192_v24  ;;  %v1210_v10 = vadd.f32 %v1209_v5, %v990_v48  ;;  %v10202_v48 = vld [vmem:[#allocation76_spill] sm:$0xff] }
 0x1b3   :  { %10186 = vst [vmem:[#allocation77_spill] sm:$0xff] %v6896_v8  ;;  %10189 = vst [vmem:[#allocation74_spill] sm:$0xff] %v6901_v61  ;;  %v877_v55 = vmul.f32 %v6885_v25, %v6885_v25  ;;  %v10197_v19 = vunpack.c.h.bf16 %v10184_v52  ;;  %v10200_v12 = vunpack.c.l.bf16 %v10199_v54  ;;  %v995_v24 = vmul.f32 %v6890_v43, %v6890_v43  ;;  %v10205_v25 = vld [vmem:[#allocation26_spill] sm:$0xff] }
 0x1b4   :  { %10191 = vst [vmem:[#allocation191_spill] sm:$0xff] %v6906_v16  ;;  %v6922_v49 = vsub.f32 %v10193_v6, %v6276_v36  ;;  %v6927_v20 = vsub.f32 %v10195_v37, %v6276_v36  ;;  %v10203_v5 = vunpack.c.l.bf16 %v10202_v48  ;;  %v998_v52 = vmul.f32 %v6901_v61, %v6901_v61 }
 0x1b5   :  { %v6934_v11 = vsub.f32 %v10197_v19, %v6729_v4  ;;  %v6939_v59 = vsub.f32 %v10200_v12, %v6259_v26  ;;  %v999_v4 = vmul.f32 %v6906_v16, %v6906_v16  ;;  %v1076_v12 = vadd.f32 %v1075_v34, %v875_v27 }
 0x1b6   :  { %10194 = vst [vmem:[#allocation22_spill] sm:$0xff] %v6922_v49  ;;  %10196 = vst [vmem:[#allocation192_spill] sm:$0xff] %v6927_v20  ;;  %v6947_v6 = vsub.f32 %v10203_v5, %v6761_v28  ;;  %v996_v0 = vmul.f32 %v6896_v8, %v6896_v8  ;;  %v1215_v37 = vadd.f32 %v1214_v17, %v994_v56  ;;  %v10206_v61 = vunpack.c.l.bf16 %v10205_v25 }
 0x1b7   :  { %10198 = vst [vmem:[#allocation193_spill] sm:$0xff] %v6934_v11  ;;  %10201 = vst [vmem:[#allocation21_spill] sm:$0xff] %v6939_v59  ;;  %v1081_v19 = vadd.f32 %v879_v50, %v878_v46  ;;  %v884_v43 = vmul.f32 %v6922_v49, %v6922_v49  ;;  %v885_v5 = vmul.f32 %v6927_v20, %v6927_v20  ;;  %v10208_v58 = vunpack.c.h.bf16 %v10205_v25 }
 0x1b8   :  { %10204 = vst [vmem:[#allocation76_spill] sm:$0xff] %v6947_v6  ;;  %v6963_v35 = vsub.f32 %v10206_v61, %v6331_v3  ;;  %v1211_v27 = vadd.f32 %v1210_v10, %v991_v14  ;;  %v997_v56 = vmul.f32 %v6934_v11, %v6934_v11  ;;  %v10210_v17 = vunpack.c.h.bf16 %v10199_v54 }
 0x1b9   :  { %v6968_v34 = vsub.f32 %v10208_v58, %v6331_v3  ;;  %v880_v50 = vmul.f32 %v6939_v59, %v6939_v59  ;;  %v10212_v61 = vunpack.c.h.bf16 %v10202_v48  ;;  %v1000_v14 = vmul.f32 %v6947_v6, %v6947_v6  ;;  %v10214_v58 = vld [vmem:[#allocation24_spill] sm:$0xff] }
 0x1ba   :  { %10207 = vst [vmem:[#allocation26_spill] sm:$0xff] %v6963_v35  ;;  %v6975_v46 = vsub.f32 %v10210_v17, %v6259_v26  ;;  %v1221_v10 = vadd.f32 %v999_v4, %v998_v52  ;;  %v10215_v20 = vunpack.c.l.bf16 %v10214_v58  ;;  %v1077_v17 = vadd.f32 %v1076_v12, %v876_v21  ;;  %v10238_v6 = vld [vmem:[#allocation32_spill] sm:$0xff]  ;;  %1212 = vadd.xlane.f32.xlu0 %v1211_v27 }
 0x1bb   :  { %10209 = vst [vmem:[#allocation194_spill] sm:$0xff] %v6968_v34  ;;  %v6983_v25 = vsub.f32 %v10212_v61, %v6761_v28  ;;  %v1216_v49 = vadd.f32 %v1215_v37, %v995_v24  ;;  %v10218_v16 = vunpack.c.l.bf16 %v10217_v1  ;;  %v10220_v48 = vunpack.c.h.bf16 %v10217_v1  ;;  %v10222_v24 = vld [vmem:[#allocation78_spill] sm:$0xff]  ;;  %v10225_v37 = vld [vmem:[#allocation29_spill] sm:$0xff] }
 0x1bc   :  { %10211 = vst [vmem:[#allocation195_spill] sm:$0xff] %v6975_v46  ;;  %v6990_v54 = vsub.f32 %v10215_v20, %v6276_v36  ;;  %v1082_v52 = vadd.f32 %v1081_v19, %v880_v50  ;;  %v1088_v4 = vadd.f32 %v885_v5, %v884_v43  ;;  %v890_v20 = vmul.f32 %v6963_v35, %v6963_v35 }
 0x1bd   :  { %10213 = vst [vmem:[#allocation196_spill] sm:$0xff] %v6983_v25  ;;  %v6996_v59 = vsub.f32 %v10218_v16, %v6259_v26  ;;  %v7001_v61 = vsub.f32 %v10220_v48, %v6259_v26  ;;  %v891_v22 = vmul.f32 %v6968_v34, %v6968_v34  ;;  %v881_v21 = vmul.f32 %v6975_v46, %v6975_v46 }
 0x1be   :  { %10216 = vst [vmem:[#allocation24_spill] sm:$0xff] %v6990_v54  ;;  %v10223_v16 = vunpack.c.l.bf16 %v10222_v24  ;;  %v10226_v26 = vunpack.c.l.bf16 %v10225_v37  ;;  %v10228_v43 = vunpack.c.h.bf16 %v10225_v37  ;;  %v1001_v5 = vmul.f32 %v6983_v25, %v6983_v25 }
 0x1bf   :  { %10219 = vst [vmem:[#allocation25_spill] sm:$0xff] %v6996_v59  ;;  %10221 = vst [vmem:[#allocation197_spill] sm:$0xff] %v7001_v61  ;;  %v1222_v50 = vadd.f32 %v1221_v10, %v1000_v14  ;;  %v10230_v48 = vunpack.c.h.bf16 %v10214_v58  ;;  %v1078_v34 = vadd.f32 %v1077_v17, %v877_v55  ;;  %v882_v37 = vmul.f32 %v6996_v59, %v6996_v59  ;;  %v10234_v14 = vld [vmem:[#allocation28_spill] sm:$0xff]  ;;  %v10237_v17 = vld [vmem:[#allocation89_spill] sm:$0xff] }
 0x1c0   :  { %v7012_v12 = vsub.f32 %v10223_v16, %v6761_v28  ;;  %v7017_v1 = vsub.f32 %v10226_v26, %v6364_v44  ;;  %v7022_v19 = vsub.f32 %v10228_v43, %v6364_v44  ;;  %v886_v26 = vmul.f32 %v6990_v54, %v6990_v54 }
 0x1c1   :  { %v7030_v16 = vsub.f32 %v10230_v48, %v6276_v36  ;;  %v10232_v15 = vunpack.c.h.bf16 %v10222_v24  ;;  %v10235_v10 = vunpack.c.l.bf16 %v10234_v14  ;;  %v1217_v48 = vadd.f32 %v1216_v49, %v996_v0  ;;  %1079 = vadd.xlane.f32.xlu1 %v1078_v34 }
 0x1c2   :  { %10224 = vst [vmem:[#allocation78_spill] sm:$0xff] %v7012_v12  ;;  %10227 = vst [vmem:[#allocation29_spill] sm:$0xff] %v7017_v1  ;;  %v1083_v35 = vadd.f32 %v1082_v52, %v881_v21  ;;  %v1089_v25 = vadd.f32 %v1088_v4, %v886_v26  ;;  %v1095_v54 = vadd.f32 %v891_v22, %v890_v20  ;;  %v10239_v24 = vunpack.c.l.bf16 %v10238_v6  ;;  %v10243_v52 = vld [vmem:[#allocation27_spill] sm:$0xff] }
 0x1c3   :  { %10229 = vst [vmem:[#allocation198_spill] sm:$0xff] %v7022_v19  ;;  %10231 = vst [vmem:[#allocation199_spill] sm:$0xff] %v7030_v16  ;;  %v7040_v43 = vsub.f32 %v10232_v15, %v6761_v28  ;;  %v7045_v58 = vsub.f32 %v10235_v10, %v6331_v3  ;;  %v896_v40 = vmul.f32 %v7017_v1, %v7017_v1  ;;  %v10241_v15 = vunpack.c.h.bf16 %v10238_v6 }
 0x1c4   :  { %v897_v55 = vmul.f32 %v7022_v19, %v7022_v19  ;;  %v7054_v28 = vsub.f32 %v10239_v24, %v10237_v17  ;;  %v1002_v49 = vmul.f32 %v7012_v12, %v7012_v12  ;;  %v1223_v0 = vadd.f32 %v1222_v50, %v1001_v5  ;;  %v10248_v50 = vld [vmem:[#allocation30_spill] sm:$0xff] }
 0x1c5   :  { %10233 = vst [vmem:[#allocation200_spill] sm:$0xff] %v7040_v43  ;;  %10236 = vst [vmem:[#allocation28_spill] sm:$0xff] %v7045_v58  ;;  %v7059_v10 = vsub.f32 %v10241_v15, %v10237_v17  ;;  %v10244_v4 = vunpack.c.l.bf16 %v10243_v52  ;;  %v887_v22 = vmul.f32 %v7030_v16, %v7030_v16  ;;  %v883_v6 = vmul.f32 %v7001_v61, %v7001_v61 }
 0x1c6   :  { %10240 = vst [vmem:[#allocation89_spill] sm:$0xff] %v7054_v28  ;;  %v10246_v53 = vunpack.c.h.bf16 %v10234_v14  ;;  %v892_v5 = vmul.f32 %v7045_v58, %v7045_v58  ;;  %v10249_v26 = vunpack.c.l.bf16 %v10248_v50  ;;  %v1218_v15 = vadd.f32 %v1217_v48, %v997_v56  ;;  %v10253_v56 = vld [vmem:[#allocation31_spill] sm:$0xff] }
 0x1c7   :  { %10242 = vst [vmem:[#allocation32_spill] sm:$0xff] %v7059_v10  ;;  %v7067_v20 = vsub.f32 %v10244_v4, %v6276_v36  ;;  %v1084_v4 = vadd.f32 %v1083_v35, %v882_v37  ;;  %v1003_v47 = vmul.f32 %v7040_v43, %v7040_v43  ;;  %v1090_v19 = vadd.f32 %v1089_v25, %v887_v22 }
 0x1c8   :  { %v7077_v21 = vsub.f32 %v10246_v53, %v6331_v3  ;;  %v7084_v24 = vsub.f32 %v10249_v26, %v6364_v44  ;;  %v1096_v1 = vadd.f32 %v1095_v54, %v892_v5  ;;  %v1102_v16 = vadd.f32 %v897_v55, %v896_v40  ;;  %v10258_v40 = vld [vmem:[#allocation34_spill] sm:$0xff]  ;;  %1219 = vadd.xlane.f32.xlu0 %v1218_v15 }
 0x1c9   :  { %10245 = vst [vmem:[#allocation27_spill] sm:$0xff] %v7067_v20  ;;  %v902_v14 = vmul.f32 %v7054_v28, %v7054_v28  ;;  %v903_v53 = vmul.f32 %v7059_v10, %v7059_v10  ;;  %v1224_v58 = vadd.f32 %v1223_v0, %v1002_v49  ;;  %v10251_v26 = vunpack.c.h.bf16 %v10243_v52 }
 0x1ca   :  { %10247 = vst [vmem:[#allocation201_spill] sm:$0xff] %v7077_v21  ;;  %10250 = vst [vmem:[#allocation30_spill] sm:$0xff] %v7084_v24  ;;  %v888_v35 = vmul.f32 %v7067_v20, %v7067_v20  ;;  %v10254_v25 = vunpack.c.l.bf16 %v10253_v56  ;;  %v893_v37 = vmul.f32 %v7077_v21, %v7077_v21  ;;  %v10256_v27 = vunpack.c.h.bf16 %v10248_v50 }
 0x1cb   :  { %v7095_v12 = vsub.f32 %v10251_v26, %v6276_v36  ;;  %v898_v36 = vmul.f32 %v7084_v24, %v7084_v24  ;;  %v10259_v55 = vunpack.c.l.bf16 %v10258_v40  ;;  %v1085_v0 = vadd.f32 %v1084_v4, %v883_v6  ;;  %v10263_v6 = vld [vmem:[#allocation33_spill] sm:$0xff] }
 0x1cc   :  { %v7102_v54 = vsub.f32 %v10254_v25, %v6331_v3  ;;  %v7109_v48 = vsub.f32 %v10256_v27, %v6364_v44  ;;  %v1091_v52 = vadd.f32 %v1090_v19, %v888_v35  ;;  %v1097_v22 = vadd.f32 %v1096_v1, %v893_v37  ;;  %v10298_v24 = vld [vmem:[#allocation93_spill] sm:$0xff] }
 0x1cd   :  { %10252 = vst [vmem:[#allocation202_spill] sm:$0xff] %v7095_v12  ;;  %v7116_v49 = vsub.f32 %v10259_v55, %v10237_v17  ;;  %v1103_v34 = vadd.f32 %v1102_v16, %v898_v36  ;;  %v1109_v5 = vadd.f32 %v903_v53, %v902_v14  ;;  %v1225_v26 = vadd.f32 %v1224_v58, %v1003_v47 }
 0x1ce   :  { %10255 = vst [vmem:[#allocation31_spill] sm:$0xff] %v7102_v54  ;;  %10257 = vst [vmem:[#allocation203_spill] sm:$0xff] %v7109_v48  ;;  %v889_v50 = vmul.f32 %v7095_v12, %v7095_v12  ;;  %v10261_v25 = vunpack.c.h.bf16 %v10253_v56  ;;  %v894_v10 = vmul.f32 %v7102_v54, %v7102_v54  ;;  %1086 = vadd.xlane.f32.xlu1 %v1085_v0  ;;  %v10264_v19 = vunpack.c.l.bf16 %v10263_v6  ;;  %v10300_v54 = vld [vmem:[#allocation95_spill] sm:$0xff] }
 0x1cf   :  { %10260 = vst [vmem:[#allocation34_spill] sm:$0xff] %v7116_v49  ;;  %v899_v16 = vmul.f32 %v7109_v48, %v7109_v48  ;;  %v10266_v58 = vunpack.c.h.bf16 %v10258_v40  ;;  %1226 = vadd.xlane.f32.xlu0 %v1225_v26  ;;  %v10268_v56 = vunpack.c.h.bf16 %v10263_v6  ;;  %v10270_v40 = vld [vmem:[#allocation35_spill] sm:$0xff] }
 0x1d0   :  { %v7123_v27 = vsub.f32 %v10261_v25, %v6331_v3  ;;  %v7130_v1 = vsub.f32 %v10264_v19, %v6364_v44  ;;  %v904_v3 = vmul.f32 %v7116_v49, %v7116_v49  ;;  %v1092_v4 = vadd.f32 %v1091_v52, %v889_v50 }
 0x1d1   :  { %v7137_v15 = vsub.f32 %v10266_v58, %v10237_v17  ;;  %v1098_v47 = vadd.f32 %v1097_v22, %v894_v10  ;;  %v1104_v14 = vadd.f32 %v1103_v34, %v899_v16  ;;  %v7146_v37 = vsub.f32 %v10268_v56, %v6364_v44  ;;  %v4287_v58 = vld [vmem:[#allocation8 + $0x4] ss:$16 sps:$4 sm:$0xff]  }
 0x1d2   :  { %10262 = vst [vmem:[#allocation204_spill] sm:$0xff] %v7123_v27  ;;  %10265 = vst [vmem:[#allocation33_spill] sm:$0xff] %v7130_v1  ;;  %v1110_v53 = vadd.f32 %v1109_v5, %v904_v3  ;;  %v895_v35 = vmul.f32 %v7123_v27, %v7123_v27  ;;  %1093 = vadd.xlane.f32.xlu1 %v1092_v4  ;;  %v900_v36 = vmul.f32 %v7130_v1, %v7130_v1  ;;  %v4289_v3 = vld [vmem:[#allocation8 + $0xc] ss:$16 sps:$4 sm:$0xff]   ;;  %v4291_v4 = vld [vmem:[#allocation8] ss:$16 sps:$4 sm:$0xff]  }
 0x1d3   :  { %10267 = vst [vmem:[#allocation205_spill] sm:$0xff] %v7137_v15  ;;  %10269 = vst [vmem:[#allocation206_spill] sm:$0xff] %v7146_v37  ;;  %v10271_v55 = vunpack.c.l.bf16 %v10270_v40  ;;  %v905_v10 = vmul.f32 %v7137_v15, %v7137_v15  ;;  %v901_v5 = vmul.f32 %v7146_v37, %v7146_v37  ;;  %v10273_v44 = vunpack.c.h.bf16 %v10270_v40  ;;  %3779 = vmatprep.subr.bf16.mxu0 %v4287_v58  ;;  %v4310_v15 = vld [vmem:[#allocation8 + $0x68] ss:$16 sps:$4 sm:$0xff]  }
 0x1d4   :  { %v1099_v52 = vadd.f32 %v1098_v47, %v895_v35  ;;  %v1105_v22 = vadd.f32 %v1104_v14, %v900_v36  ;;  %v4292_v47 = vld [vmem:[#allocation8 + $0x8] ss:$16 sps:$4 sm:$0xff]   ;;  %3902 = vmatprep.subr.bf16.mxu1 %v4289_v3  ;;  %3780 = vmatpush1.bf16.msra.mxu0 %v4291_v4  ;;  %v10276_v14 = vld [vmem:[#allocation120_spill] sm:$0xff]  ;;  %v7176_v35 = vpop.permute.xlu1 %1977  ;;  %v4301_v4 = vld [vmem:[#allocation8 + $0x4c] ss:$16 sps:$4 sm:$0xff]  }
 0x1d5   :  { %v7153_v0 = vsub.f32 %v10271_v55, %v10237_v17  ;;  %v1111_v34 = vadd.f32 %v1110_v53, %v905_v10  ;;  %v7162_v26 = vsub.f32 %v10273_v44, %v10237_v17  ;;  %3903 = vmatpush1.bf16.msra.mxu1 %v4292_v47  ;;  %v10275_v17 = vld [vmem:[#allocation124_spill] sm:$0xff]  ;;  %v7174_v53 = vpop.permute.xlu0 %1981  ;;  %10278 = vst [vmem:[#allocation120_spill] sm:$0xff] %v7176_v35 }
 0x1d6   :  { %1100 = vadd.xlane.f32.xlu1 %v1099_v52  ;;  %v1106_v25 = vadd.f32 %v1105_v22, %v901_v5  ;;  %10277 = vst [vmem:[#allocation124_spill] sm:$0xff] %v7174_v53  ;;  %v4299_v3 = vld [vmem:[#allocation8 + $0x44] ss:$16 sps:$4 sm:$0xff]   ;;  %v4303_v47 = vld [vmem:[#allocation8 + $0x40] ss:$16 sps:$4 sm:$0xff]  }
 0x1d7   :  { %10272 = vst [vmem:[#allocation35_spill] sm:$0xff] %v7153_v0  ;;  %10274 = vst [vmem:[#allocation207_spill] sm:$0xff] %v7162_v26  ;;  %v906_v50 = vmul.f32 %v7153_v0, %v7153_v0  ;;  %v907_v19 = vmul.f32 %v7162_v26, %v7162_v26  ;;  %v4309_v0 = vld [vmem:[#allocation8 + $0x60] ss:$16 sps:$4 sm:$0xff]  }
 0x1d8   :  { %v7182_v36 = vpop.permute.xlu1 %2044 }
 0x1d9   :  { %v1112_v6 = vadd.f32 %v1111_v34, %v906_v50  ;;  %v7180_v56 = vpop.permute.xlu0 %2052  ;;  %10280 = vst [vmem:[#allocation209_spill] sm:$0xff] %v7182_v36  ;;  %v4293_v50 = vld [vmem:[#allocation8 + $0x24] ss:$16 sps:$4 sm:$0xff]  }
 0x1da   :  { %1107 = vadd.xlane.f32.xlu1 %v1106_v25  ;;  %10279 = vst [vmem:[#allocation208_spill] sm:$0xff] %v7180_v56  ;;  %v4295_v25 = vld [vmem:[#allocation8 + $0x2c] ss:$16 sps:$4 sm:$0xff]   ;;  %3781 = vmatprep.subr.bf16.mxu0 %v4293_v50 }
 0x1db   :  { %v1113_v16 = vadd.f32 %v1112_v6, %v907_v19  ;;  %v4297_v6 = vld [vmem:[#allocation8 + $0x20] ss:$16 sps:$4 sm:$0xff]   ;;  %v4298_v19 = vld [vmem:[#allocation8 + $0x28] ss:$16 sps:$4 sm:$0xff]   ;;  %3904 = vmatprep.subr.bf16.mxu1 %v4295_v25 }
 0x1dc   :  { %v7190_v55 = vpop.permute.xlu1 %2048  ;;  %3782 = vmatpush1.bf16.msra.mxu0 %v4297_v6  ;;  %3905 = vmatpush1.bf16.msra.mxu1 %v4298_v19  ;;  %v4305_v6 = vld [vmem:[#allocation8 + $0x64] ss:$16 sps:$4 sm:$0xff]   ;;  %v4307_v19 = vld [vmem:[#allocation8 + $0x6c] ss:$16 sps:$4 sm:$0xff]  }
 0x1dd   :  { %v7188_v40 = vpop.permute.xlu0 %2056  ;;  %10282 = vst [vmem:[#allocation211_spill] sm:$0xff] %v7190_v55  ;;  %3783 = vmatprep.subr.bf16.mxu0 %v4299_v3  ;;  %3906 = vmatprep.subr.bf16.mxu1 %v4301_v4 }
 0x1de   :  { %1114 = vadd.xlane.f32.xlu1 %v1113_v16  ;;  %10281 = vst [vmem:[#allocation210_spill] sm:$0xff] %v7188_v40  ;;  %v10367_v40 = vld [vmem:[#allocation166_spill] sm:$0xff] }
 0x1e0   :  { %v7195_v52 = vpop.permute.xlu1 %1985  ;;  %3784 = vmatpush1.bf16.msra.mxu0 %v4303_v47  ;;  %v1516_v47 = vld [vmem:[%s9147_s2] sm:$0x3f] }
 0x1e1   :  { %v7193_v10 = vpop.permute.xlu0 %2060  ;;  %10284 = vst [vmem:[#allocation213_spill] sm:$0xff] %v7195_v52  ;;  %3785 = vmatprep.subr.bf16.mxu0 %v4305_v6  ;;  %v7230_v27 = vrot.slane %v1516_v47, %v10298_v24  ;;  %v7233_v21 = vrot.slane %v1516_v47, %v10300_v54 }
 0x1e2   :  { %10283 = vst [vmem:[#allocation212_spill] sm:$0xff] %v7193_v10 }
 0x1e3   :  { %10299 = vst [vmem:[#allocation226_spill] sm:$0xff] %v7230_v27  ;;  %10301 = vst [vmem:[#allocation227_spill] sm:$0xff] %v7233_v21 }
 0x1e4   :  { %v7200_v34 = vpop.permute.xlu1 %1989  ;;  %3786 = vmatpush1.bf16.msra.mxu0 %v4309_v0 }
 0x1e5   :  { %2080 = vbcast.lane.b32.xlu0 %v10275_v17, 328  ;;  %v7198_v22 = vpop.permute.xlu0 %2064  ;;  %10286 = vst [vmem:[#allocation215_spill] sm:$0xff] %v7200_v34 }
 0x1e6   :  { %10285 = vst [vmem:[#allocation214_spill] sm:$0xff] %v7198_v22 }
 0x1e8   :  { %v7204_v44 = vpop.permute.xlu1 %1993 }
 0x1e9   :  { %2084 = vbcast.lane.b32.xlu0 %v10275_v17, 336  ;;  %v7202_v5 = vpop.permute.xlu0 %2068  ;;  %10288 = vst [vmem:[#allocation217_spill] sm:$0xff] %v7204_v44  ;;  %v10326_v44 = vld [vmem:[#allocation150_spill] sm:$0xff] }
 0x1ea   :  { %10287 = vst [vmem:[#allocation216_spill] sm:$0xff] %v7202_v5 }
 0x1ec   :  { %v7208_v58 = vpop.permute.xlu1 %1997 }
 0x1ed   :  { %2088 = vbcast.lane.b32.xlu0 %v10275_v17, 344  ;;  %v7206_v16 = vpop.permute.xlu0 %2072  ;;  %10290 = vst [vmem:[#allocation219_spill] sm:$0xff] %v7208_v58 }
 0x1ee   :  { %10289 = vst [vmem:[#allocation218_spill] sm:$0xff] %v7206_v16  ;;  %v10357_v16 = vld [vmem:[#allocation49_spill] sm:$0xff] }
 0x1ef   :  { %2013 = vbcast.lane.b32.xlu1 %v10276_v14, 328 }
 0x1f0   :  { %v7212_v26 = vpop.permute.xlu1 %2001 }
 0x1f1   :  { %2092 = vbcast.lane.b32.xlu0 %v10275_v17, 352  ;;  %10292 = vst [vmem:[#allocation221_spill] sm:$0xff] %v7212_v26 }
 0x1f3   :  { %2017 = vbcast.lane.b32.xlu1 %v10276_v14, 336 }
 0x1f4   :  { %v7214_v49 = vpop.permute.xlu1 %2005 }
 0x1f5   :  { %2096 = vbcast.lane.b32.xlu0 %v10275_v17, 360  ;;  %10293 = vst [vmem:[#allocation222_spill] sm:$0xff] %v7214_v49 }
 0x1f7   :  { %2021 = vbcast.lane.b32.xlu1 %v10276_v14, 344 }
 0x1f9   :  { %2100 = vbcast.lane.b32.xlu0 %v10275_v17, 368 }
 0x1fb   :  { %2025 = vbcast.lane.b32.xlu1 %v10276_v14, 352 }
 0x1fd   :  { %2104 = vbcast.lane.b32.xlu0 %v10275_v17, 376  ;;  %v4304_v17 = vld [vmem:[#allocation8 + $0x48] ss:$16 sps:$4 sm:$0xff]  }
 0x1fe   :  { %3907 = vmatpush1.bf16.msra.mxu1 %v4304_v17  ;;  %v10294_v17 = vld [vmem:[#allocation85_spill] sm:$0xff] }
 0x1ff   :  { %2029 = vbcast.lane.b32.xlu1 %v10276_v14, 360  ;;  %3908 = vmatprep.subr.bf16.mxu1 %v4307_v19  ;;  %v7223_v1 = vsub.s32 3, %v10294_v17  ;;  %v7226_v19 = vpop.permute.xlu1 %2009  ;;  %v1540_v0 = vsub.s32 5, %v10294_v17 }
 0x200   :  { %10297 = vst [vmem:[#allocation225_spill] sm:$0xff] %v7226_v19  ;;  %v10315_v19 = vld [vmem:[#allocation91_spill] sm:$0xff] }
 0x201   :  { %10296 = vst [vmem:[#allocation224_spill] sm:$0xff] %v7223_v1 }
 0x202   :  { %3909 = vmatpush1.bf16.msra.mxu1 %v4310_v15 }
 0x203   :  { %2033 = vbcast.lane.b32.xlu1 %v10276_v14, 368 }
 0x207   :  { %2037 = vbcast.lane.b32.xlu1 %v10276_v14, 376  ;;  %v7210_v14 = vpop.permute.xlu0 %2076 }
 0x208   :  { %10291 = vst [vmem:[#allocation220_spill] sm:$0xff] %v7210_v14 }
 0x20b   :  { %v1017_v50 = vpop.xlane.xlu0 %1016 }
 0x20c   :  { %v1229_v25 = vmul.f32 0.0013020834, %v1017_v50  ;;  %v7220_v50 = vsub.s32 2, %v10294_v17 }
 0x20e   :  { %v1261_v28 = vadd.f32 1e-12, %v1229_v25  ;;  %10295 = vst [vmem:[#allocation223_spill] sm:$0xff] %v7220_v50  ;;  %v1536_v25 = vsub.s32 4, %v10294_v17  ;;  %v7236_v12 = vrot.slane %v1516_v47, %v7220_v50 }
 0x20f   :  { %v1129_v37 = vpop.xlane.xlu0 %1128 }
 0x210   :  { %4577 = vrsqrt.f32 %v1261_v28  ;;  %v1245_v3 = vmul.f32 0.0013020834, %v1129_v37  ;;  %v4311_v28 = vld [vmem:[#allocation8 + $0x84] ss:$16 sps:$4 sm:$0xff]   ;;  %v4313_v37 = vld [vmem:[#allocation8 + $0x8c] ss:$16 sps:$4 sm:$0xff]  }
 0x211   :  { %3787 = vmatprep.subr.bf16.mxu0 %v4311_v28  ;;  %3910 = vmatprep.subr.bf16.mxu1 %v4313_v37  ;;  %10302 = vst [vmem:[#allocation228_spill] sm:$0xff] %v7236_v12  ;;  %v7243_v28 = vrot.slane %v1516_v47, %v1540_v0 }
 0x212   :  { %v1277_v4 = vadd.f32 1e-12, %v1245_v3  ;;  %v1740_v3 = vld [vmem:[#allocation7] sm:$0x3f] }
 0x213   :  { %v1136_v6 = vpop.xlane.xlu0 %1135  ;;  %10305 = vst [vmem:[#allocation231_spill] sm:$0xff] %v7243_v28  ;;  %v7246_v37 = vrot.slane %v1740_v3, %v10298_v24  ;;  %v7249_v43 = vrot.slane %v1740_v3, %v10300_v54  ;;  %v7252_v46 = vrot.slane %v1740_v3, %v7220_v50  ;;  %v7255_v11 = vrot.slane %v1740_v3, %v7223_v1  ;;  %v10312_v24 = vld [vmem:[#allocation82_spill] sm:$0xff] }
 0x214   :  { %4579 = vrsqrt.f32 %v1277_v4  ;;  %v1246_v15 = vmul.f32 0.0013020834, %v1136_v6  ;;  %v7239_v4 = vrot.slane %v1516_v47, %v7223_v1  ;;  %v7241_v6 = vrot.slane %v1516_v47, %v1536_v25 }
 0x215   :  { %10306 = vst [vmem:[#allocation232_spill] sm:$0xff] %v7246_v37  ;;  %10307 = vst [vmem:[#allocation233_spill] sm:$0xff] %v7249_v43  ;;  %v7257_v8 = vrot.slane %v1740_v3, %v1536_v25  ;;  %v7262_v63 = vrot.slane %v1740_v3, %v1540_v0  ;;  %v10316_v25 = vld [vmem:[#allocation96_spill] sm:$0xff] }
 0x216   :  { %v1278_v48 = vadd.f32 1e-12, %v1246_v15  ;;  %10303 = vst [vmem:[#allocation229_spill] sm:$0xff] %v7239_v4  ;;  %10304 = vst [vmem:[#allocation230_spill] sm:$0xff] %v7241_v6  ;;  %v1010_v15 = vpop.xlane.xlu1 %1009 }
 0x217   :  { %v1143_v20 = vpop.xlane.xlu0 %1142  ;;  %v1228_v61 = vmul.f32 0.0013020834, %v1010_v15  ;;  %10308 = vst [vmem:[#allocation234_spill] sm:$0xff] %v7252_v46  ;;  %10309 = vst [vmem:[#allocation235_spill] sm:$0xff] %v7255_v11 }
 0x218   :  { %4581 = vrsqrt.f32 %v1278_v48  ;;  %v1247_v17 = vmul.f32 0.0013020834, %v1143_v20  ;;  %10310 = vst [vmem:[#allocation236_spill] sm:$0xff] %v7257_v8  ;;  %10314 = vst [vmem:[#allocation81_spill] sm:$0xff] %v7262_v63 }
 0x219   :  { %v1260_v48 = vadd.f32 1e-12, %v1228_v61  ;;  %v10318_v61 = vld [vmem:[#allocation97_spill] sm:$0xff] }
 0x21a   :  { %v4578_v59 = vpop.eup %4577  ;;  %v1279_v20 = vadd.f32 1e-12, %v1247_v17  ;;  %v1122_v50 = vpop.xlane.xlu1 %1121 }
 0x21b   :  { %v1150_v47 = vpop.xlane.xlu0 %1149  ;;  %v1330_v18 = vmul.f32 %v4578_v59, %v10311_v41  ;;  %v1331_v60 = vmul.f32 %v4578_v59, %v10312_v24  ;;  %v1332_v54 = vmul.f32 %v4578_v59, %v10313_v2  ;;  %v1333_v49 = vmul.f32 %v4578_v59, %v10315_v19 }
 0x21c   :  { %4583 = vrsqrt.f32 %v1279_v20  ;;  %v1248_v15 = vmul.f32 0.0013020834, %v1150_v47  ;;  %v1244_v1 = vmul.f32 0.0013020834, %v1122_v50  ;;  %v7266_v26 = vmul.f32 %v4578_v59, %v10316_v25  ;;  %v10323_v50 = vld [vmem:[#allocation38_spill] sm:$0xff]  ;;  %v10325_v25 = vld [vmem:[#allocation39_spill] sm:$0xff] }
 0x21d   :  { %4585 = vrsqrt.f32 %v1260_v48  ;;  %v7269_v17 = vmul.f32 %v4578_v59, %v10318_v61  ;;  %v7272_v24 = vmul.f32 %v7230_v27, %v1330_v18  ;;  %v7275_v2 = vmul.f32 %v7233_v21, %v1331_v60  ;;  %v10324_v48 = vld [vmem:[#allocation142_spill] sm:$0xff] }
 0x21e   :  { %10317 = vst [vmem:[#allocation82_spill] sm:$0xff] %v7266_v26  ;;  %v4580_v41 = vpop.eup %4579  ;;  %v1280_v58 = vadd.f32 1e-12, %v1248_v15  ;;  %v7278_v0 = vmul.f32 %v7236_v12, %v1332_v54  ;;  %v1276_v19 = vadd.f32 1e-12, %v1244_v1  ;;  %v1024_v15 = vpop.xlane.xlu1 %1023  ;;  %v7285_v34 = vmul.f32 %v7239_v4, %v1333_v49  ;;  %v10328_v54 = vld [vmem:[#allocation41_spill] sm:$0xff] }
 0x21f   :  { %10319 = vst [vmem:[#allocation90_spill] sm:$0xff] %v7269_v17  ;;  %10320 = vst [vmem:[#allocation91_spill] sm:$0xff] %v7272_v24  ;;  %v1157_v3 = vpop.xlane.xlu0 %1156  ;;  %v1426_v20 = vmul.f32 %v4580_v41, %v10323_v50  ;;  %v1427_v47 = vmul.f32 %v4580_v41, %v10324_v48  ;;  %v1428_v59 = vmul.f32 %v4580_v41, %v10325_v25  ;;  %v1230_v60 = vmul.f32 0.0013020834, %v1024_v15  ;;  %v10329_v1 = vld [vmem:[#allocation153_spill] sm:$0xff]  ;;  %v10330_v25 = vld [vmem:[#allocation40_spill] sm:$0xff] }
 0x220   :  { %10321 = vst [vmem:[#allocation96_spill] sm:$0xff] %v7275_v2  ;;  %10322 = vst [vmem:[#allocation97_spill] sm:$0xff] %v7278_v0  ;;  %4587 = vrsqrt.f32 %v1280_v58  ;;  %v1249_v61 = vmul.f32 0.0013020834, %v1157_v3  ;;  %v1429_v18 = vmul.f32 %v4580_v41, %v10326_v44  ;;  %v1430_v52 = vmul.f32 %v4580_v41, %v10328_v54  ;;  %v10331_v15 = vld [vmem:[#allocation144_spill] sm:$0xff]  ;;  %v10333_v0 = vld [vmem:[#allocation151_spill] sm:$0xff] }
 0x221   :  { %10327 = vst [vmem:[#allocation38_spill] sm:$0xff] %v7285_v34  ;;  %4589 = vrsqrt.f32 %v1276_v19  ;;  %v1431_v53 = vmul.f32 %v4580_v41, %v10329_v1  ;;  %v7290_v48 = vmul.f32 %v7230_v27, %v1426_v20  ;;  %v7293_v58 = vmul.f32 %v7233_v21, %v1427_v47  ;;  %v10332_v20 = vld [vmem:[#allocation148_spill] sm:$0xff] }
 0x222   :  { %v4582_v35 = vpop.eup %4581  ;;  %v1281_v50 = vadd.f32 1e-12, %v1249_v61  ;;  %v7296_v3 = vmul.f32 %v7236_v12, %v1428_v59  ;;  %v1262_v44 = vadd.f32 1e-12, %v1230_v60  ;;  %v7301_v54 = vmul.f32 %v7239_v4, %v1429_v18  ;;  %v1031_v61 = vpop.xlane.xlu1 %1030  ;;  %v10334_v59 = vld [vmem:[#allocation154_spill] sm:$0xff] }
 0x223   :  { %v1164_v49 = vpop.xlane.xlu0 %1163  ;;  %v1432_v19 = vmul.f32 %v4582_v35, %v10330_v25  ;;  %v1433_v34 = vmul.f32 %v4582_v35, %v10331_v15  ;;  %v1434_v1 = vmul.f32 %v4582_v35, %v10332_v20  ;;  %v1435_v47 = vmul.f32 %v4582_v35, %v10333_v0  ;;  %v10335_v15 = vld [vmem:[#allocation157_spill] sm:$0xff] }
 0x224   :  { %4591 = vrsqrt.f32 %v1281_v50  ;;  %v1250_v41 = vmul.f32 0.0013020834, %v1164_v49  ;;  %v1231_v2 = vmul.f32 0.0013020834, %v1031_v61  ;;  %v1436_v24 = vmul.f32 %v4582_v35, %v10334_v59  ;;  %v10337_v61 = vld [vmem:[#allocation42_spill] sm:$0xff]  ;;  %v10338_v59 = vld [vmem:[#allocation149_spill] sm:$0xff] }
 0x225   :  { %4593 = vrsqrt.f32 %v1262_v44  ;;  %v7307_v60 = vmul.f32 %v7241_v6, %v1430_v52  ;;  %v1437_v26 = vmul.f32 %v4582_v35, %v10335_v15  ;;  %v7311_v18 = vmul.f32 %v7243_v28, %v1431_v53  ;;  %v10339_v15 = vld [vmem:[#allocation43_spill] sm:$0xff] }
 0x226   :  { %v4584_v25 = vpop.eup %4583  ;;  %v1282_v17 = vadd.f32 1e-12, %v1250_v41  ;;  %v7314_v50 = vmul.f32 %v7230_v27, %v1432_v19  ;;  %v1263_v0 = vadd.f32 1e-12, %v1231_v2  ;;  %v7321_v52 = vmul.f32 %v7233_v21, %v1433_v34  ;;  %v1038_v35 = vpop.xlane.xlu1 %1037 }
 0x227   :  { %v7316_v49 = vpop.eup %4585  ;;  %v1171_v44 = vpop.xlane.xlu0 %1170  ;;  %v1438_v20 = vmul.f32 %v4584_v25, %v10337_v61  ;;  %v1439_v9 = vmul.f32 %v4584_v25, %v10338_v59  ;;  %v1440_v53 = vmul.f32 %v4584_v25, %v10339_v15  ;;  %v1441_v42 = vmul.f32 %v4584_v25, %v10340_v62  ;;  %v10342_v59 = vld [vmem:[#allocation83_spill] sm:$0xff] }
 0x228   :  { %10336 = vst [vmem:[#allocation142_spill] sm:$0xff] %v7316_v49  ;;  %4595 = vrsqrt.f32 %v1282_v17  ;;  %v1251_v41 = vmul.f32 0.0013020834, %v1171_v44  ;;  %v1232_v19 = vmul.f32 0.0013020834, %v1038_v35  ;;  %v1442_v49 = vmul.f32 %v4584_v25, %v10341_v57  ;;  %v10344_v35 = vld [vmem:[#allocation44_spill] sm:$0xff] }
 0x229   :  { %4597 = vrsqrt.f32 %v1263_v0  ;;  %v7327_v2 = vmul.f32 %v7236_v12, %v1434_v1  ;;  %v1443_v13 = vmul.f32 %v4584_v25, %v10342_v59  ;;  %v7331_v34 = vmul.f32 %v7241_v6, %v1436_v24  ;;  %v10345_v57 = vld [vmem:[#allocation152_spill] sm:$0xff] }
 0x22a   :  { %v4588_v61 = vpop.eup %4587  ;;  %v1283_v30 = vadd.f32 1e-12, %v1251_v41  ;;  %v7334_v17 = vmul.f32 %v7243_v28, %v1437_v26  ;;  %v1264_v62 = vadd.f32 1e-12, %v1232_v19  ;;  %v7341_v1 = vmul.f32 %v7239_v4, %v1435_v47  ;;  %v1045_v25 = vpop.xlane.xlu1 %1044  ;;  %v10346_v59 = vld [vmem:[#allocation156_spill] sm:$0xff]  ;;  %v10349_v19 = vld [vmem:[#allocation163_spill] sm:$0xff] }
 0x22b   :  { %v7336_v44 = vpop.eup %4589  ;;  %v1178_v0 = vpop.xlane.xlu0 %1177  ;;  %v1444_v15 = vmul.f32 %v4588_v61, %v10344_v35  ;;  %v1445_v32 = vmul.f32 %v4588_v61, %v10345_v57  ;;  %v1446_v24 = vmul.f32 %v4588_v61, %v10346_v59  ;;  %v1447_v45 = vmul.f32 %v4588_v61, %v10347_v31 }
 0x22c   :  { %10343 = vst [vmem:[#allocation39_spill] sm:$0xff] %v7336_v44  ;;  %4599 = vrsqrt.f32 %v1283_v30  ;;  %v1252_v41 = vmul.f32 0.0013020834, %v1178_v0  ;;  %v1233_v26 = vmul.f32 0.0013020834, %v1045_v25  ;;  %v1448_v39 = vmul.f32 %v4588_v61, %v10348_v7  ;;  %v10352_v25 = vld [vmem:[#allocation45_spill] sm:$0xff] }
 0x22d   :  { %4601 = vrsqrt.f32 %v1264_v62  ;;  %v1449_v38 = vmul.f32 %v4588_v61, %v10349_v19  ;;  %v7348_v57 = vmul.f32 %v7230_v27, %v1438_v20  ;;  %v7351_v47 = vmul.f32 %v7233_v21, %v1439_v9  ;;  %v10353_v7 = vld [vmem:[#allocation158_spill] sm:$0xff]  ;;  %v10355_v19 = vld [vmem:[#allocation47_spill] sm:$0xff] }
 0x22e   :  { %v4592_v36 = vpop.eup %4591  ;;  %v1284_v35 = vadd.f32 1e-12, %v1252_v41  ;;  %v7354_v30 = vmul.f32 %v7236_v12, %v1440_v53  ;;  %v1265_v31 = vadd.f32 1e-12, %v1233_v26  ;;  %v7361_v61 = vmul.f32 %v7239_v4, %v1441_v42  ;;  %v1052_v41 = vpop.xlane.xlu1 %1051  ;;  %v10356_v44 = vld [vmem:[#allocation162_spill] sm:$0xff] }
 0x22f   :  { %10350 = vst [vmem:[#allocation150_spill] sm:$0xff] %v7351_v47  ;;  %v7356_v0 = vpop.eup %4593  ;;  %v1185_v62 = vpop.xlane.xlu0 %1184  ;;  %v1450_v59 = vmul.f32 %v4592_v36, %v10352_v25  ;;  %v1451_v55 = vmul.f32 %v4592_v36, %v10353_v7  ;;  %v1452_v9 = vmul.f32 %v4592_v36, %v10355_v19  ;;  %v1453_v14 = vmul.f32 %v4592_v36, %v10356_v44  ;;  %v10359_v7 = vld [vmem:[#allocation164_spill] sm:$0xff] }
 0x230   :  { %10351 = vst [vmem:[#allocation41_spill] sm:$0xff] %v7356_v0  ;;  %10354 = vst [vmem:[#allocation153_spill] sm:$0xff] %v7361_v61  ;;  %4603 = vrsqrt.f32 %v1284_v35  ;;  %v1253_v20 = vmul.f32 0.0013020834, %v1185_v62  ;;  %v1234_v53 = vmul.f32 0.0013020834, %v1052_v41  ;;  %v1454_v0 = vmul.f32 %v4592_v36, %v10357_v16 }
 0x231   :  { %4605 = vrsqrt.f32 %v1265_v31  ;;  %v7367_v26 = vmul.f32 %v7241_v6, %v1442_v49  ;;  %v1455_v22 = vmul.f32 %v4592_v36, %v10359_v7  ;;  %v7371_v42 = vmul.f32 %v7243_v28, %v1443_v13  ;;  %v10363_v41 = vld [vmem:[#allocation48_spill] sm:$0xff]  ;;  %v10364_v16 = vld [vmem:[#allocation161_spill] sm:$0xff]  ;;  %v10366_v7 = vld [vmem:[#allocation50_spill] sm:$0xff] }
 0x232   :  { %v4596_v25 = vpop.eup %4595  ;;  %v1285_v5 = vadd.f32 1e-12, %v1253_v20  ;;  %v7374_v35 = vmul.f32 %v7230_v27, %v1444_v15  ;;  %v1266_v44 = vadd.f32 1e-12, %v1234_v53  ;;  %v7381_v49 = vmul.f32 %v7233_v21, %v1445_v32  ;;  %v1059_v36 = vpop.xlane.xlu1 %1058  ;;  %v10368_v53 = vld [vmem:[#allocation53_spill] sm:$0xff] }
 0x233   :  { %10358 = vst [vmem:[#allocation40_spill] sm:$0xff] %v7367_v26  ;;  %10360 = vst [vmem:[#allocation144_spill] sm:$0xff] %v7371_v42  ;;  %v7376_v62 = vpop.eup %4597  ;;  %v1192_v31 = vpop.xlane.xlu0 %1191  ;;  %v1456_v19 = vmul.f32 %v4596_v25, %v10363_v41  ;;  %v1457_v10 = vmul.f32 %v4596_v25, %v10364_v16  ;;  %v7384_v13 = vmul.f32 %v4596_v25, %v10366_v7  ;;  %v10375_v42 = vld [vmem:[#allocation165_spill] sm:$0xff] }
 0x234   :  { %10361 = vst [vmem:[#allocation148_spill] sm:$0xff] %v7374_v35  ;;  %10362 = vst [vmem:[#allocation151_spill] sm:$0xff] %v7376_v62  ;;  %4607 = vrsqrt.f32 %v1285_v5  ;;  %v1254_v20 = vmul.f32 0.0013020834, %v1192_v31  ;;  %v7387_v15 = vmul.f32 %v4596_v25, %v10367_v40  ;;  %v1235_v62 = vmul.f32 0.0013020834, %v1059_v36 }
 0x235   :  { %10365 = vst [vmem:[#allocation154_spill] sm:$0xff] %v7381_v49  ;;  %4609 = vrsqrt.f32 %v1266_v44  ;;  %v7390_v56 = vmul.f32 %v4596_v25, %v10368_v53  ;;  %v7393_v41 = vmul.f32 %v7236_v12, %v1446_v24  ;;  %v10370_v49 = vld [vmem:[#allocation169_spill] sm:$0xff]  ;;  %v7397_v31 = vmul.f32 %v7241_v6, %v1448_v39  ;;  %v10374_v35 = vld [vmem:[#allocation51_spill] sm:$0xff]  ;;  %v10377_v39 = vld [vmem:[#allocation52_spill] sm:$0xff] }
 0x236   :  { %v4600_v16 = vpop.eup %4599  ;;  %v1286_v32 = vadd.f32 1e-12, %v1254_v20  ;;  %v1461_v5 = vmul.f32 %v4596_v25, %v10370_v49  ;;  %v7400_v7 = vmul.f32 %v7243_v28, %v1449_v38  ;;  %v1267_v44 = vadd.f32 1e-12, %v1235_v62  ;;  %v1066_v49 = vpop.xlane.xlu1 %1065  ;;  %v10379_v62 = vld [vmem:[#allocation57_spill] sm:$0xff] }
 0x237   :  { %10369 = vst [vmem:[#allocation157_spill] sm:$0xff] %v7393_v41  ;;  %10371 = vst [vmem:[#allocation42_spill] sm:$0xff] %v7397_v31  ;;  %v7402_v40 = vpop.eup %4601  ;;  %v1199_v36 = vpop.xlane.xlu0 %1198  ;;  %v1462_v53 = vmul.f32 %v4600_v16, %v10374_v35  ;;  %v7406_v26 = vmul.f32 %v4600_v16, %v10375_v42  ;;  %v7409_v24 = vmul.f32 %v7239_v4, %v1447_v45  ;;  %v10378_v31 = vld [vmem:[#allocation170_spill] sm:$0xff]  ;;  %v10380_v41 = vld [vmem:[#allocation171_spill] sm:$0xff] }
 0x238   :  { %10372 = vst [vmem:[#allocation149_spill] sm:$0xff] %v7400_v7  ;;  %10373 = vst [vmem:[#allocation43_spill] sm:$0xff] %v7402_v40  ;;  %4611 = vrsqrt.f32 %v1286_v32  ;;  %v1255_v25 = vmul.f32 0.0013020834, %v1199_v36  ;;  %v1464_v20 = vmul.f32 %v4600_v16, %v10377_v39  ;;  %v7413_v38 = vmul.f32 %v4600_v16, %v10378_v31 }
 0x239   :  { %10376 = vst [vmem:[#allocation155_spill] sm:$0xff] %v7409_v24  ;;  %4613 = vrsqrt.f32 %v1267_v44  ;;  %v1236_v40 = vmul.f32 0.0013020834, %v1066_v49  ;;  %v1466_v7 = vmul.f32 %v4600_v16, %v10379_v62  ;;  %v1467_v35 = vmul.f32 %v4600_v16, %v10380_v41  ;;  %v10385_v49 = vld [vmem:[#allocation54_spill] sm:$0xff]  ;;  %v10386_v62 = vld [vmem:[#allocation167_spill] sm:$0xff] }
 0x23a   :  { %v4604_v61 = vpop.eup %4603  ;;  %v1287_v42 = vadd.f32 1e-12, %v1255_v25  ;;  %v7418_v47 = vmul.f32 %v7230_v27, %v1450_v59  ;;  %v7421_v45 = vmul.f32 %v7233_v21, %v1451_v55  ;;  %v7424_v32 = vmul.f32 %v7236_v12, %v1452_v9  ;;  %v10388_v25 = vld [vmem:[#allocation55_spill] sm:$0xff] }
 0x23b   :  { %v7426_v36 = vpop.eup %4605  ;;  %v1268_v31 = vadd.f32 1e-12, %v1236_v40  ;;  %v1206_v44 = vpop.xlane.xlu0 %1205  ;;  %v1468_v39 = vmul.f32 %v4604_v61, %v10385_v49  ;;  %v1469_v24 = vmul.f32 %v4604_v61, %v10386_v62  ;;  %v7431_v41 = vmul.f32 %v7239_v4, %v1453_v14  ;;  %v10390_v62 = vld [vmem:[#allocation174_spill] sm:$0xff] }
 0x23c   :  { %10381 = vst [vmem:[#allocation159_spill] sm:$0xff] %v7418_v47  ;;  %10382 = vst [vmem:[#allocation83_spill] sm:$0xff] %v7421_v45  ;;  %4615 = vrsqrt.f32 %v1287_v42  ;;  %v1256_v59 = vmul.f32 0.0013020834, %v1206_v44  ;;  %v1073_v16 = vpop.xlane.xlu1 %1072  ;;  %v1470_v55 = vmul.f32 %v4604_v61, %v10388_v25  ;;  %v1471_v45 = vmul.f32 %v4604_v61, %v6567_v29 }
 0x23d   :  { %10383 = vst [vmem:[#allocation44_spill] sm:$0xff] %v7424_v32  ;;  %10384 = vst [vmem:[#allocation152_spill] sm:$0xff] %v7426_v36  ;;  %4617 = vrsqrt.f32 %v1268_v31  ;;  %v1237_v9 = vmul.f32 0.0013020834, %v1073_v16  ;;  %v1472_v36 = vmul.f32 %v4604_v61, %v6595_v51  ;;  %v7437_v40 = vmul.f32 %v7241_v6, %v1454_v0  ;;  %v10393_v16 = vld [vmem:[#allocation56_spill] sm:$0xff] }
 0x23e   :  { %10387 = vst [vmem:[#allocation156_spill] sm:$0xff] %v7431_v41  ;;  %v4608_v49 = vpop.eup %4607  ;;  %v1288_v32 = vadd.f32 1e-12, %v1256_v59  ;;  %v1473_v47 = vmul.f32 %v4604_v61, %v10390_v62  ;;  %v7441_v14 = vmul.f32 %v7243_v28, %v1455_v22  ;;  %v7444_v42 = vmul.f32 %v7230_v27, %v1456_v19  ;;  %v10394_v51 = vld [vmem:[#allocation168_spill] sm:$0xff]  ;;  %v10395_v62 = vld [vmem:[#allocation58_spill] sm:$0xff] }
 0x23f   :  { %10389 = vst [vmem:[#allocation160_spill] sm:$0xff] %v7437_v40  ;;  %v7446_v44 = vpop.eup %4609  ;;  %v1269_v29 = vadd.f32 1e-12, %v1237_v9  ;;  %v1474_v25 = vmul.f32 %v4608_v49, %v10393_v16  ;;  %v1475_v41 = vmul.f32 %v4608_v49, %v10394_v51  ;;  %v7451_v0 = vmul.f32 %v7233_v21, %v1457_v10 }
 0x240   :  { %10391 = vst [vmem:[#allocation46_spill] sm:$0xff] %v7441_v14  ;;  %10392 = vst [vmem:[#allocation163_spill] sm:$0xff] %v7446_v44  ;;  %4619 = vrsqrt.f32 %v1288_v32  ;;  %v1476_v22 = vmul.f32 %v4608_v49, %v10395_v62  ;;  %v10396_v14 = vld [vmem:[#allocation173_spill] sm:$0xff]  ;;  %v1478_v44 = vmul.f32 %v4608_v49, %v6620_v23  ;;  %v7458_v9 = vmul.f32 %v7236_v12, %v7384_v13 }
 0x241   :  { %v1477_v40 = vmul.f32 %v4608_v49, %v10396_v14  ;;  %4621 = vrsqrt.f32 %v1269_v29  ;;  %v1479_v10 = vmul.f32 %v4608_v49, %v6658_v33  ;;  %v7465_v32 = vmul.f32 %v7241_v6, %v7390_v56 }
 0x242   :  { %v7460_v16 = vpop.eup %4611  ;;  %v7474_v13 = vmul.f32 %v7239_v4, %v7387_v15  ;;  %v7480_v33 = vmul.f32 %v7236_v12, %v1464_v20  ;;  %v7491_v15 = vmul.f32 %v7239_v4, %v7413_v38 }
 0x243   :  { %10397 = vst [vmem:[#allocation45_spill] sm:$0xff] %v7460_v16  ;;  %v7470_v14 = vpop.eup %4613  ;;  %v10417_v16 = vld [vmem:[#allocation157_spill] sm:$0xff] }
 0x244   :  { %10398 = vst [vmem:[#allocation158_spill] sm:$0xff] %v7470_v14  ;;  %v7519_v14 = vmul.f32 %v7230_v27, %v1474_v25  ;;  %v7536_v25 = vmul.f32 %v7243_v28, %v1479_v10  ;;  %v7562_v10 = vadd.f32 %v7262_v63, %v7311_v18  ;;  %v1885_v18 = vadd.f32 %v7262_v63, %v7334_v17 }
 0x246   :  { %v7496_v20 = vpop.eup %4615  ;;  %10408 = vst [vmem:[#allocation169_spill] sm:$0xff] %v7562_v10  ;;  %v10418_v10 = vld [vmem:[#allocation42_spill] sm:$0xff] }
 0x247   :  { %v1213_v31 = vpop.xlane.xlu0 %1212  ;;  %10399 = vst [vmem:[#allocation47_spill] sm:$0xff] %v7496_v20  ;;  %v10416_v20 = vld [vmem:[#allocation154_spill] sm:$0xff] }
 0x248   :  { %v1257_v59 = vmul.f32 0.0013020834, %v1213_v31  ;;  %v7468_v31 = vmul.f32 %v7243_v28, %v1461_v5  ;;  %v7484_v5 = vmul.f32 %v7233_v21, %v7406_v26  ;;  %v7502_v26 = vmul.f32 %v7233_v21, %v1469_v24 }
 0x24a   :  { %v1289_v51 = vadd.f32 1e-12, %v1257_v59  ;;  %v7487_v59 = vmul.f32 %v7241_v6, %v1466_v7  ;;  %v7505_v7 = vmul.f32 %v7236_v12, %v1470_v55  ;;  %v7522_v55 = vmul.f32 %v7236_v12, %v1476_v22 }
 0x24b   :  { %v7540_v22 = vadd.f32 %v7246_v37, %v7290_v48  ;;  %v7558_v48 = vadd.f32 %v7255_v11, %v7301_v54  ;;  %v1883_v54 = vadd.f32 %v7255_v11, %v7341_v1 }
 0x24c   :  { %4623 = vrsqrt.f32 %v1289_v51  ;;  %v7499_v51 = vmul.f32 %v7230_v27, %v1468_v39 }
 0x24d   :  { %10402 = vst [vmem:[#allocation164_spill] sm:$0xff] %v7540_v22  ;;  %10407 = vst [vmem:[#allocation53_spill] sm:$0xff] %v7558_v48  ;;  %v10420_v48 = vld [vmem:[#allocation149_spill] sm:$0xff]  ;;  %v10427_v22 = vld [vmem:[#allocation46_spill] sm:$0xff] }
 0x24e   :  { %v1080_v61 = vpop.xlane.xlu1 %1079 }
 0x24f   :  { %v1238_v19 = vmul.f32 0.0013020834, %v1080_v61  ;;  %v7477_v61 = vmul.f32 %v7230_v27, %v1462_v53  ;;  %v7494_v53 = vmul.f32 %v7243_v28, %v1467_v35  ;;  %v7513_v35 = vmul.f32 %v7241_v6, %v1472_v36 }
 0x250   :  { %v7528_v36 = vmul.f32 %v7241_v6, %v1478_v44  ;;  %v7546_v44 = vadd.f32 %v7249_v43, %v7293_v58  ;;  %v1880_v58 = vadd.f32 %v7246_v37, %v7314_v50  ;;  %v1886_v50 = vadd.f32 %v7246_v37, %v7348_v57  ;;  %v10425_v6 = vld [vmem:[#allocation156_spill] sm:$0xff] }
 0x251   :  { %v1270_v29 = vadd.f32 1e-12, %v1238_v19 }
 0x252   :  { %10404 = vst [vmem:[#allocation161_spill] sm:$0xff] %v7546_v44  ;;  %v10422_v44 = vld [vmem:[#allocation44_spill] sm:$0xff] }
 0x253   :  { %4625 = vrsqrt.f32 %v1270_v29  ;;  %v7507_v29 = vpop.eup %4617 }
 0x254   :  { %10400 = vst [vmem:[#allocation162_spill] sm:$0xff] %v7507_v29  ;;  %v7530_v29 = vpop.eup %4619 }
 0x255   :  { %v1220_v23 = vpop.xlane.xlu0 %1219  ;;  %10401 = vst [vmem:[#allocation49_spill] sm:$0xff] %v7530_v29  ;;  %v10415_v29 = vld [vmem:[#allocation148_spill] sm:$0xff] }
 0x256   :  { %v1258_v56 = vmul.f32 0.0013020834, %v1220_v23  ;;  %v1892_v57 = vadd.f32 %v7246_v37, %v10415_v29  ;;  %v1900_v29 = vadd.f32 %v7252_v46, %v10422_v44  ;;  %v1905_v44 = vadd.f32 %v7249_v43, %v7451_v0 }
 0x257   :  { %v1911_v0 = vadd.f32 %v7249_v43, %v7484_v5  ;;  %v1920_v5 = vadd.f32 %v7257_v8, %v7513_v35 }
 0x258   :  { %v1290_v19 = vadd.f32 1e-12, %v1258_v56  ;;  %v7516_v56 = vmul.f32 %v7243_v28, %v1473_v47 }
 0x25a   :  { %4627 = vrsqrt.f32 %v1290_v19  ;;  %v7533_v19 = vmul.f32 %v7239_v4, %v1477_v40  ;;  %v7554_v40 = vadd.f32 %v7257_v8, %v7307_v60  ;;  %v1882_v60 = vadd.f32 %v7252_v46, %v7327_v2  ;;  %v10411_v2 = vld [vmem:[#allocation150_spill] sm:$0xff] }
 0x25b   :  { %v1087_v49 = vpop.xlane.xlu1 %1086 }
 0x25c   :  { %v1239_v62 = vmul.f32 0.0013020834, %v1087_v49  ;;  %v1227_v38 = vpop.xlane.xlu0 %1226  ;;  %v7510_v49 = vmul.f32 %v7239_v4, %v1471_v45  ;;  %v7525_v45 = vmul.f32 %v7233_v21, %v1475_v41  ;;  %10406 = vst [vmem:[#allocation166_spill] sm:$0xff] %v7554_v40  ;;  %v10419_v40 = vld [vmem:[#allocation155_spill] sm:$0xff]  ;;  %v10426_v4 = vld [vmem:[#allocation160_spill] sm:$0xff]  ;;  %v7674_v35 = vadd.f32 %v7255_v11, %v7533_v19 }
 0x25d   :  { %v1259_v39 = vmul.f32 0.0013020834, %v1227_v38  ;;  %v7550_v38 = vadd.f32 %v7252_v46, %v7296_v3  ;;  %v1881_v3 = vadd.f32 %v7249_v43, %v7321_v52  ;;  %v1888_v52 = vadd.f32 %v7252_v46, %v7354_v30 }
 0x25e   :  { %v1271_v23 = vadd.f32 1e-12, %v1239_v62  ;;  %v1893_v30 = vadd.f32 %v7249_v43, %v10416_v20  ;;  %v10424_v20 = vld [vmem:[#allocation83_spill] sm:$0xff]  ;;  %10431 = vst [vmem:[#allocation54_spill] sm:$0xff] %v7674_v35 }
 0x25f   :  { %v1094_v24 = vpop.xlane.xlu1 %1093  ;;  %v1291_v47 = vadd.f32 1e-12, %v1259_v39  ;;  %10405 = vst [vmem:[#allocation50_spill] sm:$0xff] %v7550_v38  ;;  %v1884_v39 = vadd.f32 %v7257_v8, %v7331_v34  ;;  %v10412_v34 = vld [vmem:[#allocation153_spill] sm:$0xff]  ;;  %v10421_v38 = vld [vmem:[#allocation159_spill] sm:$0xff] }
 0x260   :  { %4629 = vrsqrt.f32 %v1271_v23  ;;  %v1240_v62 = vmul.f32 0.0013020834, %v1094_v24  ;;  %v7542_v23 = vpop.eup %4621 }
 0x261   :  { %10403 = vst [vmem:[#allocation48_spill] sm:$0xff] %v7542_v23  ;;  %4631 = vrsqrt.f32 %v1291_v47  ;;  %v7572_v24 = vpop.eup %4623  ;;  %v1887_v47 = vadd.f32 %v7249_v43, %v10411_v2  ;;  %v10414_v23 = vld [vmem:[#allocation144_spill] sm:$0xff]  ;;  %v1896_v2 = vadd.f32 %v7257_v8, %v10418_v10  ;;  %v1901_v10 = vadd.f32 %v7255_v11, %v10425_v6 }
 0x262   :  { %v1272_v41 = vadd.f32 1e-12, %v1240_v62  ;;  %10409 = vst [vmem:[#allocation51_spill] sm:$0xff] %v7572_v24  ;;  %v7582_v62 = vpop.eup %4625  ;;  %v10413_v24 = vld [vmem:[#allocation40_spill] sm:$0xff]  ;;  %v1891_v17 = vadd.f32 %v7262_v63, %v10414_v23  ;;  %v1898_v23 = vadd.f32 %v7246_v37, %v10421_v38  ;;  %v1904_v38 = vadd.f32 %v7246_v37, %v7444_v42 }
 0x263   :  { %10410 = vst [vmem:[#allocation165_spill] sm:$0xff] %v7582_v62  ;;  %v1890_v1 = vadd.f32 %v7257_v8, %v10413_v24  ;;  %v1894_v62 = vadd.f32 %v7252_v46, %v10417_v16  ;;  %v1897_v24 = vadd.f32 %v7262_v63, %v10420_v48  ;;  %v1899_v16 = vadd.f32 %v7249_v43, %v10424_v20 }
 0x264   :  { %4633 = vrsqrt.f32 %v1272_v41  ;;  %v1889_v41 = vadd.f32 %v7255_v11, %v10412_v34  ;;  %v1895_v34 = vadd.f32 %v7255_v11, %v10419_v40  ;;  %v7608_v28 = vpop.eup %4627  ;;  %v1902_v40 = vadd.f32 %v7257_v8, %v10426_v4 }
 0x265   :  { %10423 = vst [vmem:[#allocation52_spill] sm:$0xff] %v7608_v28  ;;  %v1903_v48 = vadd.f32 %v7262_v63, %v10427_v22  ;;  %v1906_v20 = vadd.f32 %v7252_v46, %v7458_v9  ;;  %v1908_v6 = vadd.f32 %v7257_v8, %v7465_v32  ;;  %v1907_v4 = vadd.f32 %v7255_v11, %v7474_v13 }
 0x266   :  { %v1909_v22 = vadd.f32 %v7262_v63, %v7468_v31  ;;  %v1912_v42 = vadd.f32 %v7252_v46, %v7480_v33  ;;  %v1913_v9 = vadd.f32 %v7255_v11, %v7491_v15  ;;  %v1914_v32 = vadd.f32 %v7257_v8, %v7487_v59 }
 0x267   :  { %v1915_v13 = vadd.f32 %v7262_v63, %v7494_v53  ;;  %v1916_v31 = vadd.f32 %v7246_v37, %v7499_v51  ;;  %v1918_v33 = vadd.f32 %v7252_v46, %v7505_v7  ;;  %v1919_v59 = vadd.f32 %v7255_v11, %v7510_v49 }
 0x268   :  { %v1921_v53 = vadd.f32 %v7262_v63, %v7516_v56  ;;  %v7662_v51 = vadd.f32 %v7246_v37, %v7519_v14  ;;  %v7670_v7 = vadd.f32 %v7249_v43, %v7525_v45  ;;  %v7678_v49 = vadd.f32 %v7257_v8, %v7528_v36  ;;  %v10432_v56 = vld [vmem:[#allocation208_spill] sm:$0xff] }
 0x269   :  { %v7682_v14 = vadd.f32 %v7262_v63, %v7536_v25  ;;  %v7691_v45 = vmul.f32 %v10432_v56, %v1882_v60  ;;  %v7694_v19 = vmul.f32 %v10432_v56, %v1883_v54  ;;  %v7700_v36 = vmul.f32 %v10432_v56, %v1885_v18  ;;  %v10434_v25 = vld [vmem:[#allocation210_spill] sm:$0xff] }
 0x26a   :  { %v7618_v12 = vpop.eup %4629  ;;  %v7703_v35 = vmul.f32 %v10434_v25, %v1886_v50  ;;  %v7712_v60 = vmul.f32 %v10434_v25, %v1889_v41  ;;  %v7715_v54 = vmul.f32 %v10434_v25, %v1890_v1  ;;  %v4315_v18 = vld [vmem:[#allocation8 + $0x80] ss:$16 sps:$4 sm:$0xff]  }
 0x26b   :  { %10428 = vst [vmem:[#allocation170_spill] sm:$0xff] %v7618_v12  ;;  %v1910_v12 = vadd.f32 %v7246_v37, %v7477_v61  ;;  %v7644_v28 = vpop.eup %4631  ;;  %v1917_v61 = vadd.f32 %v7249_v43, %v7502_v26  ;;  %v7666_v26 = vadd.f32 %v7252_v46, %v7522_v55  ;;  %v7688_v55 = vmul.f32 %v10432_v56, %v1881_v3 }
 0x26c   :  { %10429 = vst [vmem:[#allocation57_spill] sm:$0xff] %v7644_v28  ;;  %v7697_v28 = vmul.f32 %v10432_v56, %v1884_v39  ;;  %10433 = vst [vmem:[#allocation167_spill] sm:$0xff] %v7700_v36  ;;  %v7709_v3 = vmul.f32 %v10434_v25, %v1888_v52  ;;  %v7718_v39 = vmul.f32 %v10434_v25, %v1891_v17  ;;  %v10436_v36 = vld [vmem:[#allocation212_spill] sm:$0xff]  ;;  %3788 = vmatpush1.bf16.msra.mxu0 %v4315_v18 }
 0x26d   :  { %v7721_v50 = vmul.f32 %v10436_v36, %v1892_v57  ;;  %v7727_v52 = vmul.f32 %v10436_v36, %v1894_v62  ;;  %v7730_v41 = vmul.f32 %v10436_v36, %v1895_v34  ;;  %v7733_v1 = vmul.f32 %v10436_v36, %v1896_v2 }
 0x26e   :  { %v7654_v15 = vpop.eup %4633  ;;  %10435 = vst [vmem:[#allocation55_spill] sm:$0xff] %v7718_v39  ;;  %v7736_v17 = vmul.f32 %v10436_v36, %v1897_v24  ;;  %v10438_v24 = vld [vmem:[#allocation216_spill] sm:$0xff] }
 0x26f   :  { %10430 = vst [vmem:[#allocation171_spill] sm:$0xff] %v7654_v15  ;;  %v7685_v15 = vmul.f32 %v10432_v56, %v1880_v58  ;;  %v7706_v58 = vmul.f32 %v10434_v25, %v1887_v47  ;;  %v4316_v56 = vld [vmem:[#allocation8 + $0x88] ss:$16 sps:$4 sm:$0xff]   ;;  %v7724_v47 = vmul.f32 %v10436_v36, %v1893_v30  ;;  %v10437_v25 = vld [vmem:[#allocation214_spill] sm:$0xff]  ;;  %v7763_v36 = vmul.f32 %v10438_v24, %v1906_v20 }
 0x270   :  { %v7739_v39 = vmul.f32 %v10437_v25, %v1898_v23  ;;  %v7742_v57 = vmul.f32 %v10437_v25, %v1899_v16  ;;  %v7745_v30 = vmul.f32 %v10437_v25, %v1900_v29  ;;  %v7748_v62 = vmul.f32 %v10437_v25, %v1901_v10  ;;  %3911 = vmatpush1.bf16.msra.mxu1 %v4316_v56 }
 0x271   :  { %v7751_v34 = vmul.f32 %v10437_v25, %v1902_v40  ;;  %v7754_v2 = vmul.f32 %v10437_v25, %v1903_v48  ;;  %v7757_v23 = vmul.f32 %v10438_v24, %v1904_v38  ;;  %v7760_v16 = vmul.f32 %v10438_v24, %v1905_v44  ;;  %v10440_v48 = vld [vmem:[#allocation218_spill] sm:$0xff]  ;;  %v4319_v25 = vld [vmem:[#allocation8 + $0xac] ss:$16 sps:$4 sm:$0xff]  }
 0x272   :  { %v7766_v29 = vmul.f32 %v10438_v24, %v1907_v4  ;;  %v7769_v10 = vmul.f32 %v10438_v24, %v1908_v6  ;;  %v7772_v40 = vmul.f32 %v10438_v24, %v1909_v22  ;;  %v7775_v18 = vmul.f32 %v10440_v48, %v1910_v12  ;;  %v10447_v22 = vld [vmem:[#allocation220_spill] sm:$0xff]  ;;  %3912 = vmatprep.subr.bf16.mxu1 %v4319_v25 }
 0x273   :  { %v7778_v38 = vmul.f32 %v10440_v48, %v1911_v0  ;;  %v7781_v44 = vmul.f32 %v10440_v48, %v1912_v42  ;;  %v7784_v20 = vmul.f32 %v10440_v48, %v1913_v9  ;;  %v7787_v4 = vmul.f32 %v10440_v48, %v1914_v32  ;;  %v4317_v9 = vld [vmem:[#allocation8 + $0xa4] ss:$16 sps:$4 sm:$0xff]  }
 0x274   :  { %10439 = vst [vmem:[#allocation174_spill] sm:$0xff] %v7772_v40  ;;  %10441 = vst [vmem:[#allocation56_spill] sm:$0xff] %v7775_v18  ;;  %v7790_v6 = vmul.f32 %v10440_v48, %v1915_v13  ;;  %v7793_v56 = vmul.f32 %v10447_v22, %v1916_v31  ;;  %v7796_v12 = vmul.f32 %v10447_v22, %v1917_v61  ;;  %v10453_v24 = vld [vmem:[#allocation140_spill] sm:$0xff]  ;;  %v10454_v13 = vld [vmem:[#allocation39_spill] sm:$0xff]  ;;  %3789 = vmatprep.subr.bf16.mxu0 %v4317_v9 }
 0x275   :  { %10442 = vst [vmem:[#allocation168_spill] sm:$0xff] %v7778_v38  ;;  %10443 = vst [vmem:[#allocation58_spill] sm:$0xff] %v7781_v44  ;;  %v7799_v0 = vmul.f32 %v10447_v22, %v1918_v33  ;;  %v7802_v42 = vmul.f32 %v10447_v22, %v1919_v59  ;;  %v7805_v32 = vmul.f32 %v10447_v22, %v1920_v5  ;;  %v10460_v5 = vld [vmem:[#allocation147_spill] sm:$0xff]  ;;  %v10467_v40 = vld [vmem:[#allocation161_spill] sm:$0xff] }
 0x276   :  { %10444 = vst [vmem:[#allocation173_spill] sm:$0xff] %v7784_v20  ;;  %10445 = vst [vmem:[#allocation150_spill] sm:$0xff] %v7787_v4  ;;  %v1420_v48 = vmul.f32 %v10454_v13, %v10453_v24  ;;  %v7814_v33 = vmul.f32 %v10447_v22, %v1921_v53  ;;  %v10461_v4 = vld [vmem:[#allocation228_spill] sm:$0xff]  ;;  %v10463_v44 = vld [vmem:[#allocation211_spill] sm:$0xff] }
 0x277   :  { %10446 = vst [vmem:[#allocation153_spill] sm:$0xff] %v7790_v6  ;;  %10448 = vst [vmem:[#allocation40_spill] sm:$0xff] %v7793_v56  ;;  %v10455_v6 = vld [vmem:[#allocation143_spill] sm:$0xff]  ;;  %v10456_v56 = vld [vmem:[#allocation36_spill] sm:$0xff] }
 0x278   :  { %10449 = vst [vmem:[#allocation144_spill] sm:$0xff] %v7796_v12  ;;  %10450 = vst [vmem:[#allocation148_spill] sm:$0xff] %v7799_v0  ;;  %v1421_v31 = vmul.f32 %v10454_v13, %v10455_v6  ;;  %v1422_v61 = vmul.f32 %v10454_v13, %v10456_v56  ;;  %v10458_v0 = vld [vmem:[#allocation146_spill] sm:$0xff]  ;;  %v1644_v24 = vmul.f32 %v7230_v27, %v1420_v48  ;;  %v10462_v56 = vld [vmem:[#allocation164_spill] sm:$0xff] }
 0x279   :  { %10451 = vst [vmem:[#allocation154_spill] sm:$0xff] %v7802_v42  ;;  %10452 = vst [vmem:[#allocation157_spill] sm:$0xff] %v7805_v32  ;;  %v1423_v59 = vmul.f32 %v10454_v13, %v10458_v0  ;;  %v10459_v42 = vld [vmem:[#allocation37_spill] sm:$0xff]  ;;  %v1425_v32 = vmul.f32 %v10454_v13, %v10460_v5  ;;  %v2208_v53 = vmul.f32 %v10463_v44, %v10462_v56  ;;  %v10465_v0 = vld [vmem:[#allocation230_spill] sm:$0xff]  ;;  %v2081_v56 = vpop.permute.xlu0 %2080 }
 0x27a   :  { %10457 = vst [vmem:[#allocation42_spill] sm:$0xff] %v7814_v33  ;;  %v1424_v12 = vmul.f32 %v10454_v13, %v10459_v42  ;;  %v1645_v6 = vmul.f32 %v7233_v21, %v1421_v31  ;;  %v1646_v20 = vmul.f32 %v10461_v4, %v1422_v61  ;;  %v10464_v22 = vld [vmem:[#allocation229_spill] sm:$0xff]  ;;  %v10466_v18 = vld [vmem:[#allocation231_spill] sm:$0xff]  ;;  %v2209_v13 = vmul.f32 %v10463_v44, %v10467_v40  ;;  %v10468_v61 = vld [vmem:[#allocation50_spill] sm:$0xff] }
 0x27b   :  { %v1647_v33 = vmul.f32 %v10464_v22, %v1423_v59  ;;  %v1649_v42 = vmul.f32 %v10466_v18, %v1425_v32  ;;  %v1868_v9 = vadd.f32 %v7246_v37, %v1644_v24  ;;  %v2210_v5 = vmul.f32 %v10463_v44, %v10468_v61  ;;  %v10469_v32 = vld [vmem:[#allocation53_spill] sm:$0xff]  ;;  %v4321_v61 = vld [vmem:[#allocation8 + $0xa0] ss:$16 sps:$4 sm:$0xff]  }
 0x27c   :  { %v1648_v38 = vmul.f32 %v10465_v0, %v1424_v12  ;;  %v1869_v48 = vadd.f32 %v7249_v43, %v1645_v6  ;;  %v1870_v31 = vadd.f32 %v7252_v46, %v1646_v20  ;;  %v2211_v18 = vmul.f32 %v10463_v44, %v10469_v32  ;;  %v10470_v40 = vld [vmem:[#allocation209_spill] sm:$0xff]  ;;  %v10471_v20 = vld [vmem:[#allocation166_spill] sm:$0xff]  ;;  %3790 = vmatpush1.bf16.msra.mxu0 %v4321_v61 }
 0x27d   :  { %v1871_v25 = vadd.f32 %v7255_v11, %v1647_v33  ;;  %v1873_v12 = vadd.f32 %v7262_v63, %v1649_v42  ;;  %v2202_v0 = vmul.f32 %v10470_v40, %v1868_v9  ;;  %v2212_v46 = vmul.f32 %v10463_v44, %v10471_v20  ;;  %v4322_v43 = vld [vmem:[#allocation8 + $0xa8] ss:$16 sps:$4 sm:$0xff]  }
 0x27e   :  { %v1872_v59 = vadd.f32 %v7257_v8, %v1648_v38  ;;  %v2203_v24 = vmul.f32 %v10470_v40, %v1869_v48  ;;  %v2204_v6 = vmul.f32 %v10470_v40, %v1870_v31  ;;  %v10472_v63 = vld [vmem:[#allocation169_spill] sm:$0xff]  ;;  %v1101_v8 = vpop.xlane.xlu1 %1100  ;;  %v7853_v9 = vmul.f32 %v2081_v56, %v7662_v51  ;;  %3913 = vmatpush1.bf16.msra.mxu1 %v4322_v43  ;;  %v10475_v43 = vld [vmem:[#allocation59_spill] sm:$0xff] }
 0x27f   :  { %v2205_v33 = vmul.f32 %v10470_v40, %v1871_v25  ;;  %v2207_v42 = vmul.f32 %v10470_v40, %v1873_v12  ;;  %v2213_v32 = vmul.f32 %v10463_v44, %v10472_v63  ;;  %v7856_v48 = vmul.f32 %v2081_v56, %v7670_v7  ;;  %v10473_v7 = vld [vmem:[#allocation54_spill] sm:$0xff] }
 0x280   :  { %v2206_v38 = vmul.f32 %v10470_v40, %v1872_v59  ;;  %v7859_v31 = vmul.f32 %v2081_v56, %v7666_v26  ;;  %v7862_v20 = vmul.f32 %v2081_v56, %v7678_v49  ;;  %v7865_v25 = vmul.f32 %v2081_v56, %v7682_v14 }
 0x281   :  { %v2424_v59 = vadd.f32 %v2208_v53, %v2202_v0  ;;  %v2445_v12 = vadd.f32 %v2209_v13, %v2203_v24  ;;  %v2466_v63 = vadd.f32 %v2210_v5, %v2204_v6  ;;  %v2487_v44 = vadd.f32 %v2211_v18, %v2205_v33  ;;  %v10474_v0 = vld [vmem:[#allocation167_spill] sm:$0xff]  ;;  %v10476_v18 = vld [vmem:[#allocation45_spill] sm:$0xff]  ;;  %v4323_v5 = vld [vmem:[#allocation8 + $0xc4] ss:$16 sps:$4 sm:$0xff]  }
 0x282   :  { %v2508_v51 = vadd.f32 %v2212_v46, %v2206_v38  ;;  %v2529_v40 = vadd.f32 %v2213_v32, %v2207_v42  ;;  %v1241_v11 = vmul.f32 0.0013020834, %v1101_v8  ;;  %v7868_v37 = vmul.f32 %v2081_v56, %v10473_v7  ;;  %v4325_v8 = vld [vmem:[#allocation8 + $0xcc] ss:$16 sps:$4 sm:$0xff]   ;;  %3791 = vmatprep.subr.bf16.mxu0 %v4323_v5  ;;  %v10488_v5 = vld [vmem:[#allocation150_spill] sm:$0xff] }
 0x283   :  { %v2425_v26 = vadd.f32 %v2424_v59, %v7685_v15  ;;  %v2446_v49 = vadd.f32 %v2445_v12, %v7688_v55  ;;  %v2467_v61 = vadd.f32 %v2466_v63, %v7691_v45  ;;  %v2488_v14 = vadd.f32 %v2487_v44, %v7694_v19  ;;  %v10477_v55 = vld [vmem:[#allocation172_spill] sm:$0xff]  ;;  %v10478_v6 = vld [vmem:[#allocation55_spill] sm:$0xff]  ;;  %3914 = vmatprep.subr.bf16.mxu1 %v4325_v8  ;;  %v10481_v44 = vld [vmem:[#allocation66_spill] sm:$0xff] }
 0x284   :  { %v2509_v53 = vadd.f32 %v2508_v51, %v7697_v28  ;;  %v2530_v13 = vadd.f32 %v2529_v40, %v10474_v0  ;;  %v1480_v46 = vmul.f32 %v10476_v18, %v10475_v43  ;;  %v1481_v45 = vmul.f32 %v10476_v18, %v10477_v55  ;;  %v10480_v12 = vld [vmem:[#allocation63_spill] sm:$0xff]  ;;  %v10482_v40 = vld [vmem:[#allocation177_spill] sm:$0xff]  ;;  %v10486_v43 = vld [vmem:[#allocation58_spill] sm:$0xff] }
 0x285   :  { %v2426_v56 = vadd.f32 %v2425_v26, %v7703_v35  ;;  %v2447_v24 = vadd.f32 %v2446_v49, %v7706_v58  ;;  %v2468_v15 = vadd.f32 %v2467_v61, %v7709_v3  ;;  %v2489_v19 = vadd.f32 %v2488_v14, %v7712_v60  ;;  %v10479_v3 = vld [vmem:[#allocation60_spill] sm:$0xff]  ;;  %v4328_v14 = vld [vmem:[#allocation8 + $0xc8] ss:$16 sps:$4 sm:$0xff]  }
 0x286   :  { %v2510_v28 = vadd.f32 %v2509_v53, %v7715_v54  ;;  %v2531_v33 = vadd.f32 %v2530_v13, %v10478_v6  ;;  %v7886_v38 = vadd.f32 1e-12, %v1241_v11  ;;  %v1482_v32 = vmul.f32 %v10476_v18, %v10479_v3  ;;  %v10484_v53 = vld [vmem:[#allocation56_spill] sm:$0xff]  ;;  %v10489_v8 = vld [vmem:[#allocation153_spill] sm:$0xff]  ;;  %v10493_v6 = vld [vmem:[#allocation230_spill] sm:$0xff]  ;;  %3915 = vmatpush1.bf16.msra.mxu1 %v4328_v14 }
 0x287   :  { %v2427_v42 = vadd.f32 %v2426_v56, %v7721_v50  ;;  %v2448_v35 = vadd.f32 %v2447_v24, %v7724_v47  ;;  %v2469_v58 = vadd.f32 %v2468_v15, %v7727_v52  ;;  %v2490_v59 = vadd.f32 %v2489_v19, %v7730_v41  ;;  %v10485_v13 = vld [vmem:[#allocation168_spill] sm:$0xff]  ;;  %v10505_v14 = vld [vmem:[#allocation47_spill] sm:$0xff] }
 0x288   :  { %v2511_v60 = vadd.f32 %v2510_v28, %v7733_v1  ;;  %v2532_v54 = vadd.f32 %v2531_v33, %v7736_v17  ;;  %v1483_v11 = vmul.f32 %v10476_v18, %v10480_v12  ;;  %v1484_v52 = vmul.f32 %v10476_v18, %v10481_v44  ;;  %v10490_v24 = vld [vmem:[#allocation40_spill] sm:$0xff]  ;;  %v1108_v12 = vpop.xlane.xlu1 %1107 }
 0x289   :  { %v2428_v63 = vadd.f32 %v2427_v42, %v7739_v39  ;;  %v2449_v50 = vadd.f32 %v2448_v35, %v7742_v57  ;;  %v2470_v47 = vadd.f32 %v2469_v58, %v7745_v30  ;;  %v2491_v51 = vadd.f32 %v2490_v59, %v7748_v62  ;;  %v10483_v62 = vld [vmem:[#allocation174_spill] sm:$0xff]  ;;  %v10491_v55 = vld [vmem:[#allocation144_spill] sm:$0xff]  ;;  %v10495_v58 = vld [vmem:[#allocation157_spill] sm:$0xff] }
 0x28a   :  { %v2512_v41 = vadd.f32 %v2511_v60, %v7751_v34  ;;  %v2533_v1 = vadd.f32 %v2532_v54, %v7754_v2  ;;  %v1485_v17 = vmul.f32 %v10476_v18, %v10482_v40  ;;  %v1704_v30 = vmul.f32 %v7230_v27, %v1480_v46  ;;  %v4327_v2 = vld [vmem:[#allocation8 + $0xc0] ss:$16 sps:$4 sm:$0xff]   ;;  %v10487_v18 = vld [vmem:[#allocation173_spill] sm:$0xff]  ;;  %v10497_v60 = vld [vmem:[#allocation231_spill] sm:$0xff] }
 0x28b   :  { %v2429_v7 = vadd.f32 %v2428_v63, %v7757_v23  ;;  %v2450_v39 = vadd.f32 %v2449_v50, %v7760_v16  ;;  %v2471_v57 = vadd.f32 %v2470_v47, %v7763_v36  ;;  %v2492_v26 = vadd.f32 %v2491_v51, %v7766_v29  ;;  %3792 = vmatpush1.bf16.msra.mxu0 %v4327_v2  ;;  %v10492_v19 = vld [vmem:[#allocation148_spill] sm:$0xff]  ;;  %v10494_v42 = vld [vmem:[#allocation154_spill] sm:$0xff]  ;;  %v2085_v51 = vpop.permute.xlu0 %2084  ;;  %v10499_v40 = vld [vmem:[#allocation233_spill] sm:$0xff] }
 0x28c   :  { %v2513_v49 = vadd.f32 %v2512_v41, %v7769_v10  ;;  %v2534_v61 = vadd.f32 %v2533_v1, %v10483_v62  ;;  %v1705_v34 = vmul.f32 %v7233_v21, %v1481_v45  ;;  %v1706_v36 = vmul.f32 %v10461_v4, %v1482_v32  ;;  %v10496_v32 = vld [vmem:[#allocation42_spill] sm:$0xff]  ;;  %v10498_v47 = vld [vmem:[#allocation232_spill] sm:$0xff] }
 0x28d   :  { %v2430_v0 = vadd.f32 %v2429_v7, %v10484_v53  ;;  %v2451_v23 = vadd.f32 %v2450_v39, %v10485_v13  ;;  %v2472_v16 = vadd.f32 %v2471_v57, %v10486_v43  ;;  %v2493_v46 = vadd.f32 %v2492_v26, %v10487_v18  ;;  %v10500_v39 = vld [vmem:[#allocation234_spill] sm:$0xff]  ;;  %v10501_v57 = vld [vmem:[#allocation235_spill] sm:$0xff]  ;;  %v10506_v43 = vld [vmem:[#allocation61_spill] sm:$0xff] }
 0x28e   :  { %v2514_v29 = vadd.f32 %v2513_v49, %v10488_v5  ;;  %v2535_v10 = vadd.f32 %v2534_v61, %v10489_v8  ;;  %v1707_v56 = vmul.f32 %v10464_v22, %v1483_v11  ;;  %v1708_v33 = vmul.f32 %v10493_v6, %v1484_v52  ;;  %v10504_v2 = vld [vmem:[#allocation62_spill] sm:$0xff] }
 0x28f   :  { %v2431_v15 = vadd.f32 %v2430_v0, %v10490_v24  ;;  %v2452_v45 = vadd.f32 %v2451_v23, %v10491_v55  ;;  %v2473_v28 = vadd.f32 %v2472_v16, %v10492_v19  ;;  %v2494_v35 = vadd.f32 %v2493_v46, %v10494_v42  ;;  %v4329_v18 = vld [vmem:[#allocation8 + $0xe4] ss:$16 sps:$4 sm:$0xff]   ;;  %v4331_v46 = vld [vmem:[#allocation8 + $0xec] ss:$16 sps:$4 sm:$0xff]  }
 0x290   :  { %v2515_v3 = vadd.f32 %v2514_v29, %v10495_v58  ;;  %v2536_v59 = vadd.f32 %v2535_v10, %v10496_v32  ;;  %v1709_v54 = vmul.f32 %v10497_v60, %v1485_v17  ;;  %v1928_v44 = vadd.f32 %v10498_v47, %v1704_v30  ;;  %3793 = vmatprep.subr.bf16.mxu0 %v4329_v18 }
 0x291   :  { %v2432_v11 = vadd.f32 %v2431_v15, %v7853_v9  ;;  %v2453_v63 = vadd.f32 %v2452_v45, %v7856_v48  ;;  %v2474_v50 = vadd.f32 %v2473_v28, %v7859_v31  ;;  %v2495_v52 = vadd.f32 %v2494_v35, %v7868_v37  ;;  %v10502_v9 = vld [vmem:[#allocation236_spill] sm:$0xff]  ;;  %v10503_v48 = vld [vmem:[#allocation81_spill] sm:$0xff]  ;;  %3916 = vmatprep.subr.bf16.mxu1 %v4331_v46 }
 0x292   :  { %v2516_v41 = vadd.f32 %v2515_v3, %v7862_v20  ;;  %v2537_v1 = vadd.f32 %v2536_v59, %v7865_v25  ;;  %v1929_v7 = vadd.f32 %v10499_v40, %v1705_v34  ;;  %v1930_v17 = vadd.f32 %v10500_v39, %v1706_v36  ;;  %v1115_v36 = vpop.xlane.xlu1 %1114  ;;  %v10508_v15 = vld [vmem:[#allocation176_spill] sm:$0xff]  ;;  %v10509_v45 = vld [vmem:[#allocation69_spill] sm:$0xff]  ;;  %v2089_v59 = vpop.permute.xlu0 %2088 }
 0x293   :  { %v1931_v26 = vadd.f32 %v10501_v57, %v1707_v56  ;;  %v1932_v49 = vadd.f32 %v10502_v9, %v1708_v33  ;;  %v1933_v62 = vadd.f32 %v10503_v48, %v1709_v54  ;;  %v2262_v31 = vmul.f32 %v2085_v51, %v1928_v44  ;;  %v10507_v56 = vld [vmem:[#allocation64_spill] sm:$0xff] }
 0x294   :  { %v2263_v61 = vmul.f32 %v2085_v51, %v1929_v7  ;;  %v1242_v30 = vmul.f32 0.0013020834, %v1108_v12  ;;  %v1486_v37 = vmul.f32 %v10505_v14, %v10504_v2  ;;  %v2264_v53 = vmul.f32 %v2085_v51, %v1930_v17  ;;  %v10510_v28 = vld [vmem:[#allocation180_spill] sm:$0xff]  ;;  %v10514_v2 = vld [vmem:[#allocation67_spill] sm:$0xff] }
 0x295   :  { %v2265_v20 = vmul.f32 %v2085_v51, %v1931_v26  ;;  %v2266_v0 = vmul.f32 %v2085_v51, %v1932_v49  ;;  %v2267_v25 = vmul.f32 %v2085_v51, %v1933_v62  ;;  %v2433_v13 = vadd.f32 %v2432_v11, %v2262_v31  ;;  %v10513_v49 = vld [vmem:[#allocation175_spill] sm:$0xff]  ;;  %v10516_v46 = vld [vmem:[#allocation72_spill] sm:$0xff] }
 0x296   :  { %v2454_v34 = vadd.f32 %v2453_v63, %v2263_v61  ;;  %v1274_v23 = vadd.f32 1e-12, %v1242_v30  ;;  %v1487_v16 = vmul.f32 %v10505_v14, %v10506_v43  ;;  %v2475_v5 = vadd.f32 %v2474_v50, %v2264_v53  ;;  %v4335_v43 = vld [vmem:[#allocation8 + $0x104] ss:$16 sps:$4 sm:$0xff]  }
 0x297   :  { %v2496_v29 = vadd.f32 %v2495_v52, %v2265_v20  ;;  %v2517_v8 = vadd.f32 %v2516_v41, %v2266_v0  ;;  %v2538_v10 = vadd.f32 %v2537_v1, %v2267_v25  ;;  %4635 = vrsqrt.f32 %v7886_v38  ;;  %v10511_v52 = vld [vmem:[#allocation65_spill] sm:$0xff]  ;;  %v10515_v20 = vld [vmem:[#allocation178_spill] sm:$0xff] }
 0x298   :  { %v1488_v24 = vmul.f32 %v10505_v14, %v10507_v56  ;;  %v1489_v55 = vmul.f32 %v10505_v14, %v10508_v15  ;;  %v1490_v19 = vmul.f32 %v10505_v14, %v10509_v45  ;;  %v1491_v33 = vmul.f32 %v10505_v14, %v10510_v28  ;;  %v10512_v41 = vld [vmem:[#allocation49_spill] sm:$0xff]  ;;  %v4333_v25 = vld [vmem:[#allocation8 + $0xe0] ss:$16 sps:$4 sm:$0xff]  }
 0x299   :  { %v1710_v42 = vmul.f32 %v7230_v27, %v1486_v37  ;;  %v1711_v35 = vmul.f32 %v7233_v21, %v1487_v16  ;;  %v1243_v58 = vmul.f32 0.0013020834, %v1115_v36  ;;  %4637 = vrsqrt.f32 %v1274_v23  ;;  %v4334_v23 = vld [vmem:[#allocation8 + $0xe8] ss:$16 sps:$4 sm:$0xff]   ;;  %3794 = vmatpush1.bf16.msra.mxu0 %v4333_v25 }
 0x29a   :  { %v1712_v38 = vmul.f32 %v10461_v4, %v1488_v24  ;;  %v1713_v3 = vmul.f32 %v10464_v22, %v1489_v55  ;;  %v1714_v32 = vmul.f32 %v10493_v6, %v1490_v19  ;;  %v1715_v54 = vmul.f32 %v10497_v60, %v1491_v33  ;;  %v4337_v24 = vld [vmem:[#allocation8 + $0x10c] ss:$16 sps:$4 sm:$0xff]   ;;  %v10517_v55 = vld [vmem:[#allocation182_spill] sm:$0xff]  ;;  %3917 = vmatpush1.bf16.msra.mxu1 %v4334_v23 }
 0x29b   :  { %v1934_v12 = vadd.f32 %v10498_v47, %v1710_v42  ;;  %v1935_v11 = vadd.f32 %v10499_v40, %v1711_v35  ;;  %v1275_v63 = vadd.f32 1e-12, %v1243_v58  ;;  %v1492_v1 = vmul.f32 %v10512_v41, %v10511_v52  ;;  %v2093_v42 = vpop.permute.xlu0 %2092  ;;  %3795 = vmatprep.subr.bf16.mxu0 %v4335_v43  ;;  %3918 = vmatprep.subr.bf16.mxu1 %v4337_v24  ;;  %v10523_v52 = vld [vmem:[#allocation84_spill] sm:$0xff]  ;;  %v4340_v43 = vld [vmem:[#allocation8 + $0x108] ss:$16 sps:$4 sm:$0xff]  }
 0x29c   :  { %v1936_v50 = vadd.f32 %v10500_v39, %v1712_v38  ;;  %v1937_v44 = vadd.f32 %v10501_v57, %v1713_v3  ;;  %v1938_v51 = vadd.f32 %v10502_v9, %v1714_v32  ;;  %v1939_v7 = vadd.f32 %v10503_v48, %v1715_v54  ;;  %v10519_v38 = vld [vmem:[#allocation79_spill] sm:$0xff]  ;;  %v10520_v3 = vld [vmem:[#allocation142_spill] sm:$0xff]  ;;  %v10535_v24 = vld [vmem:[#allocation41_spill] sm:$0xff] }
 0x29d   :  { %v2268_v17 = vmul.f32 %v2089_v59, %v1934_v12  ;;  %v2269_v26 = vmul.f32 %v2089_v59, %v1935_v11  ;;  %v1493_v62 = vmul.f32 %v10512_v41, %v10513_v49  ;;  %v1494_v14 = vmul.f32 %v10512_v41, %v10514_v2  ;;  %v10522_v11 = vld [vmem:[#allocation80_spill] sm:$0xff] }
 0x29e   :  { %v2270_v31 = vmul.f32 %v2089_v59, %v1936_v50  ;;  %v2271_v61 = vmul.f32 %v2089_v59, %v1937_v44  ;;  %v2272_v30 = vmul.f32 %v2089_v59, %v1938_v51  ;;  %v2273_v37 = vmul.f32 %v2089_v59, %v1939_v7  ;;  %v4339_v23 = vld [vmem:[#allocation8 + $0x100] ss:$16 sps:$4 sm:$0xff]   ;;  %3919 = vmatpush1.bf16.msra.mxu1 %v4340_v43 }
 0x29f   :  { %v2434_v53 = vadd.f32 %v2433_v13, %v2268_v17  ;;  %4639 = vrsqrt.f32 %v1275_v63  ;;  %v1495_v0 = vmul.f32 %v10512_v41, %v10515_v20  ;;  %v2455_v16 = vadd.f32 %v2454_v34, %v2269_v26  ;;  %v10524_v26 = vld [vmem:[#allocation86_spill] sm:$0xff]  ;;  %3796 = vmatpush1.bf16.msra.mxu0 %v4339_v23  ;;  %v10552_v23 = vld [vmem:[#allocation115_spill] sm:$0xff] }
 0x2a0   :  { %v2476_v36 = vadd.f32 %v2475_v5, %v2270_v31  ;;  %v2518_v18 = vadd.f32 %v2517_v8, %v2272_v30  ;;  %v1496_v56 = vmul.f32 %v10512_v41, %v10516_v46  ;;  %v2539_v15 = vadd.f32 %v2538_v10, %v2273_v37  ;;  %v10527_v30 = vld [vmem:[#allocation87_spill] sm:$0xff] }
 0x2a1   :  { %v1497_v45 = vmul.f32 %v10512_v41, %v10517_v55  ;;  %v1716_v13 = vmul.f32 %v7230_v27, %v1492_v1  ;;  %v1717_v19 = vmul.f32 %v7233_v21, %v1493_v62  ;;  %v7983_v28 = vpop.eup %4635  ;;  %v2497_v33 = vadd.f32 %v2496_v29, %v2271_v61 }
 0x2a2   :  { %10518 = vst [vmem:[#allocation155_spill] sm:$0xff] %v7983_v28  ;;  %v1718_v34 = vmul.f32 %v10461_v4, %v1494_v14  ;;  %v1719_v5 = vmul.f32 %v10464_v22, %v1495_v0  ;;  %v1720_v8 = vmul.f32 %v10493_v6, %v1496_v56  ;;  %v7993_v32 = vmul.f32 %v10520_v3, %v10519_v38  ;;  %v10531_v0 = vld [vmem:[#allocation88_spill] sm:$0xff]  ;;  %v10543_v38 = vld [vmem:[#allocation99_spill] sm:$0xff]  ;;  %v10567_v28 = vld [vmem:[#allocation129_spill] sm:$0xff] }
 0x2a3   :  { %v1721_v10 = vmul.f32 %v10497_v60, %v1497_v45  ;;  %v1940_v35 = vadd.f32 %v10498_v47, %v1716_v13  ;;  %v1941_v58 = vadd.f32 %v10499_v40, %v1717_v19  ;;  %v7995_v29 = vpop.eup %4637  ;;  %v8002_v63 = vmul.f32 %v10520_v3, %v10522_v11  ;;  %v10534_v56 = vld [vmem:[#allocation92_spill] sm:$0xff]  ;;  %v4343_v19 = vld [vmem:[#allocation8 + $0x12c] ss:$16 sps:$4 sm:$0xff]  }
 0x2a4   :  { %10521 = vst [vmem:[#allocation149_spill] sm:$0xff] %v7995_v29  ;;  %v1942_v59 = vadd.f32 %v10500_v39, %v1718_v34  ;;  %v1943_v54 = vadd.f32 %v10501_v57, %v1719_v5  ;;  %v1944_v12 = vadd.f32 %v10502_v9, %v1720_v8  ;;  %v8007_v41 = vmul.f32 %v10520_v3, %v10523_v52  ;;  %v10539_v5 = vld [vmem:[#allocation104_spill] sm:$0xff]  ;;  %v10540_v8 = vld [vmem:[#allocation105_spill] sm:$0xff]  ;;  %v10566_v29 = vld [vmem:[#allocation123_spill] sm:$0xff] }
 0x2a5   :  { %v1945_v50 = vadd.f32 %v10503_v48, %v1721_v10  ;;  %v2274_v44 = vmul.f32 %v2093_v42, %v1940_v35  ;;  %v2275_v51 = vmul.f32 %v2093_v42, %v1941_v58  ;;  %v8011_v49 = vmul.f32 %v10520_v3, %v10524_v26  ;;  %v10541_v10 = vld [vmem:[#allocation98_spill] sm:$0xff]  ;;  %v10542_v35 = vld [vmem:[#allocation151_spill] sm:$0xff]  ;;  %v10550_v26 = vld [vmem:[#allocation101_spill] sm:$0xff]  ;;  %3920 = vmatprep.subr.bf16.mxu1 %v4343_v19 }
 0x2a6   :  { %v2276_v1 = vmul.f32 %v2093_v42, %v1942_v59  ;;  %v2277_v7 = vmul.f32 %v2093_v42, %v1943_v54  ;;  %v2278_v17 = vmul.f32 %v2093_v42, %v1944_v12  ;;  %v8019_v2 = vmul.f32 %v10520_v3, %v10527_v30  ;;  %v10544_v59 = vld [vmem:[#allocation106_spill] sm:$0xff]  ;;  %v10545_v12 = vld [vmem:[#allocation112_spill] sm:$0xff]  ;;  %v10551_v30 = vld [vmem:[#allocation107_spill] sm:$0xff] }
 0x2a7   :  { %v2279_v62 = vmul.f32 %v2093_v42, %v1945_v50  ;;  %v8013_v31 = vadd.f32 %v2434_v53, %v2274_v44  ;;  %v8015_v61 = vadd.f32 %v2455_v16, %v2275_v51  ;;  %v8029_v25 = vmul.f32 %v10520_v3, %v10531_v0  ;;  %v4341_v53 = vld [vmem:[#allocation8 + $0x124] ss:$16 sps:$4 sm:$0xff]   ;;  %v10546_v50 = vld [vmem:[#allocation113_spill] sm:$0xff]  ;;  %v10585_v39 = vld [vmem:[#allocation15_spill] sm:$0xff] }
 0x2a8   :  { %v8021_v14 = vadd.f32 %v2476_v36, %v2276_v1  ;;  %v8023_v37 = vadd.f32 %v2497_v33, %v2277_v7  ;;  %v8025_v20 = vadd.f32 %v2518_v18, %v2278_v17  ;;  %v8037_v55 = vmul.f32 %v10535_v24, %v10534_v56  ;;  %v10536_v36 = vld [vmem:[#allocation94_spill] sm:$0xff]  ;;  %v10538_v33 = vld [vmem:[#allocation103_spill] sm:$0xff]  ;;  %v10548_v1 = vld [vmem:[#allocation100_spill] sm:$0xff]  ;;  %3797 = vmatprep.subr.bf16.mxu0 %v4341_v53 }
 0x2a9   :  { %10525 = vst [vmem:[#allocation159_spill] sm:$0xff] %v8013_v31  ;;  %10526 = vst [vmem:[#allocation44_spill] sm:$0xff] %v8015_v61  ;;  %v8031_v46 = vpop.eup %4639  ;;  %v8033_v16 = vadd.f32 %v2539_v15, %v2279_v62  ;;  %v8041_v45 = vmul.f32 %v10535_v24, %v10536_v36  ;;  %v10537_v18 = vld [vmem:[#allocation102_spill] sm:$0xff]  ;;  %v8049_v34 = vmul.f32 %v10535_v24, %v10538_v33  ;;  %v10549_v7 = vld [vmem:[#allocation43_spill] sm:$0xff] }
 0x2aa   :  { %10528 = vst [vmem:[#allocation83_spill] sm:$0xff] %v8021_v14  ;;  %10529 = vst [vmem:[#allocation156_spill] sm:$0xff] %v8023_v37  ;;  %v8045_v13 = vmul.f32 %v10535_v24, %v10537_v18  ;;  %v8053_v15 = vmul.f32 %v10535_v24, %v10539_v5  ;;  %v8057_v42 = vmul.f32 %v10535_v24, %v10540_v8  ;;  %v10547_v51 = vld [vmem:[#allocation114_spill] sm:$0xff]  ;;  %v10553_v56 = vld [vmem:[#allocation121_spill] sm:$0xff] }
 0x2ab   :  { %10530 = vst [vmem:[#allocation160_spill] sm:$0xff] %v8025_v20  ;;  %10532 = vst [vmem:[#allocation46_spill] sm:$0xff] %v8031_v46  ;;  %v8061_v58 = vmul.f32 %v10542_v35, %v10541_v10  ;;  %v8065_v3 = vmul.f32 %v10542_v35, %v10543_v38  ;;  %v8069_v54 = vmul.f32 %v10542_v35, %v10544_v59  ;;  %v10554_v36 = vld [vmem:[#allocation125_spill] sm:$0xff]  ;;  %v10555_v33 = vld [vmem:[#allocation108_spill] sm:$0xff] }
 0x2ac   :  { %10533 = vst [vmem:[#allocation208_spill] sm:$0xff] %v8033_v16  ;;  %v8073_v11 = vmul.f32 %v10542_v35, %v10545_v12  ;;  %v8077_v44 = vmul.f32 %v10542_v35, %v10546_v50  ;;  %v8081_v52 = vmul.f32 %v10542_v35, %v10547_v51  ;;  %v8085_v17 = vmul.f32 %v10549_v7, %v10548_v1  ;;  %v10556_v5 = vld [vmem:[#allocation152_spill] sm:$0xff]  ;;  %v4346_v35 = vld [vmem:[#allocation8 + $0x128] ss:$16 sps:$4 sm:$0xff]   ;;  %v10559_v51 = vld [vmem:[#allocation122_spill] sm:$0xff] }
 0x2ad   :  { %v8089_v62 = vmul.f32 %v10549_v7, %v10550_v26  ;;  %v8093_v0 = vmul.f32 %v10549_v7, %v10551_v30  ;;  %v8097_v43 = vmul.f32 %v10549_v7, %v10552_v23  ;;  %v8101_v24 = vmul.f32 %v10549_v7, %v10553_v56  ;;  %v4345_v10 = vld [vmem:[#allocation8 + $0x120] ss:$16 sps:$4 sm:$0xff]   ;;  %v4347_v53 = vld [vmem:[#allocation8 + $0x144] ss:$16 sps:$4 sm:$0xff]   ;;  %v10557_v38 = vld [vmem:[#allocation109_spill] sm:$0xff]  ;;  %3921 = vmatpush1.bf16.msra.mxu1 %v4346_v35 }
 0x2ae   :  { %v8105_v18 = vmul.f32 %v10549_v7, %v10554_v36  ;;  %v8109_v8 = vmul.f32 %v10556_v5, %v10555_v33  ;;  %v8113_v59 = vmul.f32 %v10556_v5, %v10557_v38  ;;  %v10558_v12 = vld [vmem:[#allocation116_spill] sm:$0xff]  ;;  %v8121_v1 = vmul.f32 %v10556_v5, %v10559_v51  ;;  %v10560_v7 = vld [vmem:[#allocation126_spill] sm:$0xff]  ;;  %v4349_v19 = vld [vmem:[#allocation8 + $0x14c] ss:$16 sps:$4 sm:$0xff]   ;;  %3798 = vmatpush1.bf16.msra.mxu0 %v4345_v10 }
 0x2af   :  { %v8117_v50 = vmul.f32 %v10556_v5, %v10558_v12  ;;  %v8125_v26 = vmul.f32 %v10556_v5, %v10560_v7  ;;  %v10561_v30 = vld [vmem:[#allocation128_spill] sm:$0xff]  ;;  %v10562_v56 = vld [vmem:[#allocation110_spill] sm:$0xff]  ;;  %v10563_v36 = vld [vmem:[#allocation163_spill] sm:$0xff]  ;;  %3799 = vmatprep.subr.bf16.mxu0 %v4347_v53  ;;  %3922 = vmatprep.subr.bf16.mxu1 %v4349_v19 }
 0x2b0   :  { %v1359_v23 = vmul.f32 %v10556_v5, %v10561_v30  ;;  %v8131_v33 = vmul.f32 %v10563_v36, %v10562_v56  ;;  %v10564_v38 = vld [vmem:[#allocation111_spill] sm:$0xff]  ;;  %v10565_v46 = vld [vmem:[#allocation117_spill] sm:$0xff]  ;;  %v8143_v7 = vmul.f32 %v10563_v36, %v10566_v29  ;;  %v8147_v5 = vmul.f32 %v10563_v36, %v10567_v28  ;;  %v10569_v37 = vld [vmem:[#allocation118_spill] sm:$0xff] }
 0x2b1   :  { %v8135_v12 = vmul.f32 %v10563_v36, %v10564_v38  ;;  %v8139_v51 = vmul.f32 %v10563_v36, %v10565_v46  ;;  %v10568_v30 = vld [vmem:[#allocation133_spill] sm:$0xff]  ;;  %v10570_v38 = vld [vmem:[#allocation158_spill] sm:$0xff]  ;;  %v10571_v46 = vld [vmem:[#allocation119_spill] sm:$0xff] }
 0x2b2   :  { %v8151_v56 = vmul.f32 %v10563_v36, %v10568_v30  ;;  %v8155_v16 = vmul.f32 %v10570_v38, %v10569_v37  ;;  %v8159_v10 = vmul.f32 %v10570_v38, %v10571_v46  ;;  %v10572_v20 = vld [vmem:[#allocation127_spill] sm:$0xff]  ;;  %v10573_v14 = vld [vmem:[#allocation130_spill] sm:$0xff]  ;;  %v10578_v48 = vld [vmem:[#allocation132_spill] sm:$0xff] }
 0x2b3   :  { %v8163_v29 = vmul.f32 %v10570_v38, %v10572_v20  ;;  %v8167_v28 = vmul.f32 %v10570_v38, %v10573_v14  ;;  %v10574_v61 = vld [vmem:[#allocation134_spill] sm:$0xff]  ;;  %v10575_v37 = vld [vmem:[#allocation135_spill] sm:$0xff]  ;;  %v10579_v9 = vld [vmem:[#allocation136_spill] sm:$0xff] }
 0x2b4   :  { %v8171_v36 = vmul.f32 %v10570_v38, %v10574_v61  ;;  %v8175_v35 = vmul.f32 %v10570_v38, %v10575_v37  ;;  %v10576_v30 = vld [vmem:[#allocation131_spill] sm:$0xff]  ;;  %v10577_v46 = vld [vmem:[#allocation162_spill] sm:$0xff]  ;;  %v10580_v61 = vld [vmem:[#allocation137_spill] sm:$0xff] }
 0x2b5   :  { %v8179_v31 = vmul.f32 %v10577_v46, %v10576_v30  ;;  %v8183_v20 = vmul.f32 %v10577_v46, %v10578_v48  ;;  %v8187_v14 = vmul.f32 %v10577_v46, %v10579_v9  ;;  %v8191_v53 = vmul.f32 %v10577_v46, %v10580_v61  ;;  %v10582_v57 = vld [vmem:[#allocation138_spill] sm:$0xff]  ;;  %v10584_v37 = vld [vmem:[#allocation139_spill] sm:$0xff]  ;;  %v10586_v48 = vld [vmem:[#allocation48_spill] sm:$0xff] }
 0x2b6   :  { %v8195_v38 = vmul.f32 %v10577_v46, %v10582_v57  ;;  %v8199_v30 = vmul.f32 %v10577_v46, %v10584_v37  ;;  %v8203_v40 = vmul.f32 %v10586_v48, %v10585_v39  ;;  %v10587_v47 = vld [vmem:[#allocation141_spill] sm:$0xff]  ;;  %v10588_v19 = vld [vmem:[#allocation16_spill] sm:$0xff]  ;;  %v10591_v37 = vld [vmem:[#allocation183_spill] sm:$0xff] }
 0x2b7   :  { %10581 = vst [vmem:[#allocation210_spill] sm:$0xff] %v8191_v53  ;;  %v8207_v9 = vmul.f32 %v10586_v48, %v10587_v47  ;;  %v8211_v61 = vmul.f32 %v10586_v48, %v10588_v19  ;;  %v10589_v53 = vld [vmem:[#allocation145_spill] sm:$0xff]  ;;  %v8223_v39 = vmul.f32 %v10586_v48, %v10591_v37  ;;  %v8227_v47 = vmul.f32 %v7230_v27, %v7993_v32  ;;  %v10593_v37 = vld [vmem:[#allocation82_spill] sm:$0xff] }
 0x2b8   :  { %10583 = vst [vmem:[#allocation212_spill] sm:$0xff] %v8195_v38  ;;  %v8215_v57 = vmul.f32 %v10586_v48, %v10589_v53  ;;  %v10590_v38 = vld [vmem:[#allocation20_spill] sm:$0xff]  ;;  %v8231_v19 = vmul.f32 %v7233_v21, %v8002_v63  ;;  %v8235_v53 = vmul.f32 %v10461_v4, %v8007_v41  ;;  %v8247_v32 = vmul.f32 %v10493_v6, %v10593_v37 }
 0x2b9   :  { %v8219_v46 = vmul.f32 %v10586_v48, %v10590_v38  ;;  %10592 = vst [vmem:[#allocation214_spill] sm:$0xff] %v8227_v47  ;;  %v8239_v38 = vmul.f32 %v10493_v6, %v8019_v2  ;;  %v8243_v48 = vmul.f32 %v10497_v60, %v8029_v25  ;;  %v10594_v47 = vld [vmem:[#allocation90_spill] sm:$0xff]  ;;  %v8255_v41 = vmul.f32 %v10464_v22, %v8011_v49 }
 0x2ba   :  { %v8251_v63 = vmul.f32 %v10497_v60, %v10594_v47  ;;  %v8259_v2 = vmul.f32 %v7230_v27, %v8037_v55  ;;  %v8263_v25 = vmul.f32 %v7233_v21, %v8041_v45  ;;  %v8267_v37 = vmul.f32 %v10461_v4, %v8045_v13 }
 0x2bb   :  { %v8271_v47 = vmul.f32 %v10464_v22, %v8049_v34  ;;  %v8275_v49 = vmul.f32 %v10493_v6, %v8053_v15  ;;  %v8279_v55 = vmul.f32 %v10497_v60, %v8057_v42  ;;  %v8283_v45 = vmul.f32 %v7230_v27, %v8061_v58 }
 0x2bc   :  { %v8287_v13 = vmul.f32 %v7233_v21, %v8065_v3  ;;  %v8291_v34 = vmul.f32 %v10461_v4, %v8069_v54  ;;  %v8295_v15 = vmul.f32 %v10493_v6, %v8077_v44  ;;  %v8299_v42 = vmul.f32 %v10497_v60, %v8081_v52 }
 0x2bd   :  { %10595 = vst [vmem:[#allocation216_spill] sm:$0xff] %v8275_v49  ;;  %10596 = vst [vmem:[#allocation218_spill] sm:$0xff] %v8279_v55  ;;  %v4351_v55 = vld [vmem:[#allocation8 + $0x140] ss:$16 sps:$4 sm:$0xff]   ;;  %v4352_v49 = vld [vmem:[#allocation8 + $0x148] ss:$16 sps:$4 sm:$0xff]   ;;  %v8303_v58 = vmul.f32 %v10464_v22, %v8073_v11  ;;  %v8307_v3 = vmul.f32 %v7230_v27, %v8085_v17  ;;  %v8311_v54 = vmul.f32 %v7233_v21, %v8089_v62 }
 0x2be   :  { %v8315_v44 = vmul.f32 %v10461_v4, %v8093_v0  ;;  %v8319_v52 = vmul.f32 %v10464_v22, %v8097_v43  ;;  %v8323_v11 = vmul.f32 %v10493_v6, %v8101_v24  ;;  %v8327_v17 = vmul.f32 %v10497_v60, %v8105_v18  ;;  %3800 = vmatpush1.bf16.msra.mxu0 %v4351_v55 }
 0x2bf   :  { %v8331_v62 = vmul.f32 %v7230_v27, %v8109_v8  ;;  %v8335_v0 = vmul.f32 %v7233_v21, %v8113_v59  ;;  %v8339_v43 = vmul.f32 %v10461_v4, %v8117_v50  ;;  %v8343_v24 = vmul.f32 %v10493_v6, %v8125_v26  ;;  %3923 = vmatpush1.bf16.msra.mxu1 %v4352_v49  ;;  %v4355_v8 = vld [vmem:[#allocation8 + $0x16c] ss:$16 sps:$4 sm:$0xff]   ;;  %v4358_v49 = vld [vmem:[#allocation8 + $0x168] ss:$16 sps:$4 sm:$0xff]  }
 0x2c0   :  { %10597 = vst [vmem:[#allocation220_spill] sm:$0xff] %v8327_v17  ;;  %v8346_v18 = vmul.f32 %v10497_v60, %v1359_v23  ;;  %v4353_v17 = vld [vmem:[#allocation8 + $0x164] ss:$16 sps:$4 sm:$0xff]   ;;  %v8350_v55 = vmul.f32 %v10464_v22, %v8121_v1  ;;  %v8354_v59 = vmul.f32 %v7230_v27, %v8131_v33  ;;  %v8358_v50 = vmul.f32 %v7233_v21, %v8135_v12  ;;  %v4357_v23 = vld [vmem:[#allocation8 + $0x160] ss:$16 sps:$4 sm:$0xff]  }
 0x2c1   :  { %v8362_v26 = vmul.f32 %v10461_v4, %v8139_v51  ;;  %v8370_v1 = vmul.f32 %v10493_v6, %v8147_v5  ;;  %v8374_v33 = vmul.f32 %v10497_v60, %v8151_v56  ;;  %v8378_v12 = vmul.f32 %v7230_v27, %v8155_v16  ;;  %3801 = vmatprep.subr.bf16.mxu0 %v4353_v17  ;;  %v4359_v51 = vld [vmem:[#allocation8 + $0x184] ss:$16 sps:$4 sm:$0xff]   ;;  %v4361_v16 = vld [vmem:[#allocation8 + $0x18c] ss:$16 sps:$4 sm:$0xff]  }
 0x2c2   :  { %10598 = vst [vmem:[#allocation140_spill] sm:$0xff] %v8346_v18  ;;  %v8366_v18 = vmul.f32 %v10464_v22, %v8143_v7  ;;  %v8386_v7 = vmul.f32 %v10461_v4, %v8163_v29  ;;  %v8390_v5 = vmul.f32 %v10493_v6, %v8171_v36  ;;  %v8394_v56 = vmul.f32 %v10497_v60, %v8175_v35  ;;  %v4363_v35 = vld [vmem:[#allocation8 + $0x180] ss:$16 sps:$4 sm:$0xff]  }
 0x2c3   :  { %10599 = vst [vmem:[#allocation39_spill] sm:$0xff] %v8362_v26  ;;  %v8382_v26 = vmul.f32 %v7233_v21, %v8159_v10  ;;  %3924 = vmatprep.subr.bf16.mxu1 %v4355_v8  ;;  %v8398_v17 = vmul.f32 %v10464_v22, %v8167_v28  ;;  %v8402_v10 = vmul.f32 %v7230_v27, %v8179_v31  ;;  %v10602_v8 = vld [vmem:[#allocation210_spill] sm:$0xff]  ;;  %v10603_v28 = vld [vmem:[#allocation212_spill] sm:$0xff] }
 0x2c4   :  { %10600 = vst [vmem:[#allocation143_spill] sm:$0xff] %v8394_v56  ;;  %v8406_v29 = vmul.f32 %v7233_v21, %v8183_v20  ;;  %v8410_v36 = vmul.f32 %v10461_v4, %v8187_v14  ;;  %3802 = vmatpush1.bf16.msra.mxu0 %v4357_v23  ;;  %v8414_v56 = vmul.f32 %v10464_v22, %v10602_v8  ;;  %v4364_v14 = vld [vmem:[#allocation8 + $0x188] ss:$16 sps:$4 sm:$0xff]  }
 0x2c5   :  { %10601 = vst [vmem:[#allocation36_spill] sm:$0xff] %v8398_v17  ;;  %v8418_v17 = vmul.f32 %v10493_v6, %v10603_v28  ;;  %v8422_v31 = vmul.f32 %v10497_v60, %v8199_v30  ;;  %v8426_v20 = vmul.f32 %v7230_v27, %v8203_v40  ;;  %3925 = vmatpush1.bf16.msra.mxu1 %v4358_v49  ;;  %v4365_v40 = vld [vmem:[#allocation8 + $0x1a4] ss:$16 sps:$4 sm:$0xff]  }
 0x2c6   :  { %v8430_v23 = vmul.f32 %v7233_v21, %v8207_v9  ;;  %v8434_v8 = vmul.f32 %v10461_v4, %v8211_v61  ;;  %v8438_v28 = vmul.f32 %v10493_v6, %v8219_v46  ;;  %v8442_v30 = vmul.f32 %v10497_v60, %v8223_v39  ;;  %3803 = vmatprep.subr.bf16.mxu0 %v4359_v51  ;;  %v10604_v9 = vld [vmem:[#allocation214_spill] sm:$0xff]  ;;  %v10605_v21 = vld [vmem:[#allocation232_spill] sm:$0xff]  ;;  %v10607_v61 = vld [vmem:[#allocation233_spill] sm:$0xff] }
 0x2c7   :  { %v8446_v49 = vmul.f32 %v10464_v22, %v8215_v57  ;;  %v8450_v27 = vadd.f32 %v10605_v21, %v10604_v9  ;;  %v8454_v4 = vadd.f32 %v10607_v61, %v8231_v19  ;;  %v10609_v46 = vld [vmem:[#allocation234_spill] sm:$0xff]  ;;  %3926 = vmatprep.subr.bf16.mxu1 %v4361_v16  ;;  %v4367_v39 = vld [vmem:[#allocation8 + $0x1ac] ss:$16 sps:$4 sm:$0xff]   ;;  %v10613_v57 = vld [vmem:[#allocation236_spill] sm:$0xff] }
 0x2c8   :  { %v8458_v6 = vadd.f32 %v10609_v46, %v8235_v53  ;;  %v10611_v51 = vld [vmem:[#allocation235_spill] sm:$0xff]  ;;  %v8466_v22 = vadd.f32 %v10613_v57, %v8239_v38  ;;  %v10614_v9 = vld [vmem:[#allocation81_spill] sm:$0xff]  ;;  %3804 = vmatpush1.bf16.msra.mxu0 %v4363_v35  ;;  %v4369_v53 = vld [vmem:[#allocation8 + $0x1a0] ss:$16 sps:$4 sm:$0xff]   ;;  %v8486_v38 = vadd.f32 %v10613_v57, %v8247_v32  ;;  %v8506_v32 = vadd.f32 %v10609_v46, %v8267_v37 }
 0x2c9   :  { %10606 = vst [vmem:[#allocation146_spill] sm:$0xff] %v8450_v27  ;;  %10608 = vst [vmem:[#allocation37_spill] sm:$0xff] %v8454_v4  ;;  %v8462_v60 = vadd.f32 %v10611_v51, %v8255_v41  ;;  %v8470_v27 = vadd.f32 %v10614_v9, %v8243_v48  ;;  %v10615_v19 = vld [vmem:[#allocation91_spill] sm:$0xff]  ;;  %v10617_v16 = vld [vmem:[#allocation96_spill] sm:$0xff]  ;;  %v8490_v48 = vadd.f32 %v10614_v9, %v8251_v63  ;;  %3927 = vmatpush1.bf16.msra.mxu1 %v4364_v14 }
 0x2ca   :  { %10610 = vst [vmem:[#allocation147_spill] sm:$0xff] %v8458_v6  ;;  %v8474_v4 = vadd.f32 %v10605_v21, %v10615_v19  ;;  %v8478_v6 = vadd.f32 %v10607_v61, %v10617_v16  ;;  %v10618_v41 = vld [vmem:[#allocation97_spill] sm:$0xff]  ;;  %v10620_v35 = vld [vmem:[#allocation38_spill] sm:$0xff]  ;;  %v8498_v16 = vadd.f32 %v10605_v21, %v8259_v2  ;;  %3805 = vmatprep.subr.bf16.mxu0 %v4365_v40 }
 0x2cb   :  { %10612 = vst [vmem:[#allocation164_spill] sm:$0xff] %v8462_v60  ;;  %v8482_v60 = vadd.f32 %v10609_v46, %v10618_v41  ;;  %10619 = vst [vmem:[#allocation161_spill] sm:$0xff] %v8490_v48  ;;  %v4370_v19 = vld [vmem:[#allocation8 + $0x1a8] ss:$16 sps:$4 sm:$0xff]   ;;  %v8502_v41 = vadd.f32 %v10607_v61, %v8263_v25  ;;  %v4371_v63 = vld [vmem:[#allocation8 + $0x1c4] ss:$16 sps:$4 sm:$0xff]   ;;  %v8510_v14 = vadd.f32 %v10611_v51, %v8271_v47  ;;  %3928 = vmatprep.subr.bf16.mxu1 %v4367_v39 }
 0x2cc   :  { %10616 = vst [vmem:[#allocation211_spill] sm:$0xff] %v8474_v4  ;;  %v8494_v4 = vadd.f32 %v10611_v51, %v10620_v35  ;;  %10621 = vst [vmem:[#allocation50_spill] sm:$0xff] %v8498_v16  ;;  %v10622_v35 = vld [vmem:[#allocation216_spill] sm:$0xff]  ;;  %v10623_v2 = vld [vmem:[#allocation218_spill] sm:$0xff]  ;;  %v8522_v25 = vadd.f32 %v10605_v21, %v8283_v45  ;;  %v8526_v40 = vadd.f32 %v10607_v61, %v8287_v13  ;;  %3806 = vmatpush1.bf16.msra.mxu0 %v4369_v53 }
 0x2cd   :  { %v8514_v48 = vadd.f32 %v10613_v57, %v10622_v35  ;;  %v8518_v16 = vadd.f32 %v10614_v9, %v10623_v2  ;;  %v4373_v37 = vld [vmem:[#allocation8 + $0x1cc] ss:$16 sps:$4 sm:$0xff]   ;;  %v8530_v47 = vadd.f32 %v10609_v46, %v8291_v34  ;;  %v8534_v35 = vadd.f32 %v10613_v57, %v8295_v15  ;;  %v4375_v45 = vld [vmem:[#allocation8 + $0x1c0] ss:$16 sps:$4 sm:$0xff]   ;;  %3929 = vmatpush1.bf16.msra.mxu1 %v4370_v19 }
 0x2ce   :  { %v8538_v2 = vadd.f32 %v10614_v9, %v8299_v42  ;;  %v8542_v39 = vadd.f32 %v10611_v51, %v8303_v58  ;;  %v8546_v13 = vadd.f32 %v10605_v21, %v8307_v3  ;;  %v8550_v34 = vadd.f32 %v10607_v61, %v8311_v54  ;;  %v4376_v42 = vld [vmem:[#allocation8 + $0x1c8] ss:$16 sps:$4 sm:$0xff]   ;;  %v10625_v3 = vld [vmem:[#allocation220_spill] sm:$0xff]  ;;  %3807 = vmatprep.subr.bf16.mxu0 %v4371_v63 }
 0x2cf   :  { %v8554_v15 = vadd.f32 %v10609_v46, %v8315_v44  ;;  %v8558_v53 = vadd.f32 %v10611_v51, %v8319_v52  ;;  %v8562_v58 = vadd.f32 %v10613_v57, %v8323_v11  ;;  %v8570_v54 = vadd.f32 %v10605_v21, %v8331_v62  ;;  %v4377_v44 = vld [vmem:[#allocation8 + $0x1e4] ss:$16 sps:$4 sm:$0xff]   ;;  %3930 = vmatprep.subr.bf16.mxu1 %v4373_v37  ;;  %v4379_v62 = vld [vmem:[#allocation8 + $0x1ec] ss:$16 sps:$4 sm:$0xff]  }
 0x2d0   :  { %10624 = vst [vmem:[#allocation53_spill] sm:$0xff] %v8546_v13  ;;  %v8566_v13 = vadd.f32 %v10614_v9, %v10625_v3  ;;  %v8574_v19 = vadd.f32 %v10607_v61, %v8335_v0  ;;  %v8578_v52 = vadd.f32 %v10609_v46, %v8339_v43  ;;  %v8582_v11 = vadd.f32 %v10613_v57, %v8343_v24  ;;  %v10628_v3 = vld [vmem:[#allocation140_spill] sm:$0xff]  ;;  %v10629_v24 = vld [vmem:[#allocation39_spill] sm:$0xff] }
 0x2d1   :  { %v8590_v63 = vadd.f32 %v10611_v51, %v8350_v55  ;;  %v8594_v0 = vadd.f32 %v10605_v21, %v8354_v59  ;;  %v8598_v43 = vadd.f32 %v10607_v61, %v8358_v50  ;;  %3808 = vmatpush1.bf16.msra.mxu0 %v4375_v45  ;;  %v8606_v37 = vadd.f32 %v10611_v51, %v8366_v18 }
 0x2d2   :  { %10626 = vst [vmem:[#allocation209_spill] sm:$0xff] %v8566_v13  ;;  %10627 = vst [vmem:[#allocation166_spill] sm:$0xff] %v8582_v11  ;;  %v8586_v13 = vadd.f32 %v10614_v9, %v10628_v3  ;;  %v8602_v11 = vadd.f32 %v10609_v46, %v10629_v24  ;;  %v4381_v3 = vld [vmem:[#allocation8 + $0x1e0] ss:$16 sps:$4 sm:$0xff]   ;;  %v8610_v55 = vadd.f32 %v10613_v57, %v8370_v1  ;;  %3931 = vmatpush1.bf16.msra.mxu1 %v4376_v42  ;;  %v4382_v24 = vld [vmem:[#allocation8 + $0x1e8] ss:$16 sps:$4 sm:$0xff]  }
 0x2d3   :  { %v8614_v59 = vadd.f32 %v10614_v9, %v8374_v33  ;;  %v8618_v50 = vadd.f32 %v10605_v21, %v8378_v12  ;;  %v8622_v45 = vadd.f32 %v10607_v61, %v8382_v26  ;;  %v8626_v18 = vadd.f32 %v10609_v46, %v8386_v7  ;;  %v10632_v33 = vld [vmem:[#allocation143_spill] sm:$0xff]  ;;  %3809 = vmatprep.subr.bf16.mxu0 %v4377_v44  ;;  %v4385_v12 = vld [vmem:[#allocation8 + $0x204] ss:$16 sps:$4 sm:$0xff]  }
 0x2d4   :  { %v8630_v1 = vadd.f32 %v10613_v57, %v8390_v5  ;;  %v10633_v42 = vld [vmem:[#allocation36_spill] sm:$0xff]  ;;  %v8642_v26 = vadd.f32 %v10605_v21, %v8402_v10  ;;  %v8646_v7 = vadd.f32 %v10607_v61, %v8406_v29  ;;  %v8650_v5 = vadd.f32 %v10609_v46, %v8410_v36  ;;  %3932 = vmatprep.subr.bf16.mxu1 %v4379_v62  ;;  %v10640_v62 = vld [vmem:[#allocation146_spill] sm:$0xff] }
 0x2d5   :  { %10630 = vst [vmem:[#allocation169_spill] sm:$0xff] %v8614_v59  ;;  %10631 = vst [vmem:[#allocation54_spill] sm:$0xff] %v8618_v50  ;;  %v8634_v59 = vadd.f32 %v10614_v9, %v10632_v33  ;;  %v8638_v50 = vadd.f32 %v10611_v51, %v10633_v42  ;;  %v4388_v33 = vld [vmem:[#allocation8 + $0x20c] ss:$16 sps:$4 sm:$0xff]   ;;  %v8654_v44 = vadd.f32 %v10611_v51, %v8414_v56  ;;  %3810 = vmatpush1.bf16.msra.mxu0 %v4381_v3 }
 0x2d6   :  { %v8658_v42 = vadd.f32 %v10613_v57, %v8418_v17  ;;  %v8662_v10 = vadd.f32 %v10614_v9, %v8422_v31  ;;  %v8666_v29 = vadd.f32 %v10605_v21, %v8426_v20  ;;  %v8670_v36 = vadd.f32 %v10607_v61, %v8430_v23  ;;  %3933 = vmatpush1.bf16.msra.mxu1 %v4382_v24  ;;  %v10641_v23 = vld [vmem:[#allocation120_spill] sm:$0xff]  ;;  %v10642_v61 = vld [vmem:[#allocation37_spill] sm:$0xff]  ;;  %v10645_v24 = vld [vmem:[#allocation211_spill] sm:$0xff] }
 0x2d7   :  { %v8674_v56 = vadd.f32 %v10609_v46, %v8434_v8  ;;  %v8678_v17 = vadd.f32 %v10613_v57, %v8438_v28  ;;  %v8682_v31 = vadd.f32 %v10614_v9, %v8442_v30  ;;  %v8686_v20 = vadd.f32 %v10611_v51, %v8446_v49  ;;  %v10643_v46 = vld [vmem:[#allocation147_spill] sm:$0xff]  ;;  %3820 = vmatprep.subr.bf16.mxu0 %v4385_v12  ;;  %v10644_v28 = vld [vmem:[#allocation164_spill] sm:$0xff] }
 0x2d8   :  { %10634 = vst [vmem:[#allocation167_spill] sm:$0xff] %v8666_v29  ;;  %10635 = vst [vmem:[#allocation59_spill] sm:$0xff] %v8670_v36  ;;  %v2106_v3 = vmul.f32 %v10641_v23, %v10640_v62  ;;  %v2107_v8 = vmul.f32 %v10641_v23, %v10642_v61  ;;  %v2108_v21 = vmul.f32 %v10641_v23, %v10643_v46  ;;  %v10646_v9 = vld [vmem:[#allocation124_spill] sm:$0xff]  ;;  %3943 = vmatprep.subr.bf16.mxu1 %v4388_v33 }
 0x2d9   :  { %10636 = vst [vmem:[#allocation45_spill] sm:$0xff] %v8674_v56  ;;  %10637 = vst [vmem:[#allocation172_spill] sm:$0xff] %v8678_v17  ;;  %v2109_v57 = vmul.f32 %v10641_v23, %v10644_v28  ;;  %v2110_v30 = vmul.f32 %v10641_v23, %v8466_v22  ;;  %v2111_v49 = vmul.f32 %v10641_v23, %v8470_v27  ;;  %v10647_v22 = vld [vmem:[#allocation161_spill] sm:$0xff]  ;;  %v10648_v27 = vld [vmem:[#allocation50_spill] sm:$0xff] }
 0x2da   :  { %10638 = vst [vmem:[#allocation55_spill] sm:$0xff] %v8682_v31  ;;  %10639 = vst [vmem:[#allocation60_spill] sm:$0xff] %v8686_v20  ;;  %v2112_v51 = vmul.f32 %v10646_v9, %v10645_v24  ;;  %v2113_v61 = vmul.f32 %v10646_v9, %v8478_v6  ;;  %v2114_v46 = vmul.f32 %v10646_v9, %v8482_v60  ;;  %v10649_v23 = vld [vmem:[#allocation213_spill] sm:$0xff]  ;;  %v10655_v20 = vld [vmem:[#allocation166_spill] sm:$0xff] }
 0x2db   :  { %v2115_v12 = vmul.f32 %v10646_v9, %v8494_v4  ;;  %v2116_v62 = vmul.f32 %v10646_v9, %v8486_v38  ;;  %v2117_v28 = vmul.f32 %v10646_v9, %v10647_v22  ;;  %v2118_v31 = vmul.f32 %v10649_v23, %v10648_v27  ;;  %v10650_v9 = vld [vmem:[#allocation215_spill] sm:$0xff]  ;;  %v10651_v27 = vld [vmem:[#allocation53_spill] sm:$0xff] }
 0x2dc   :  { %v2119_v33 = vmul.f32 %v10649_v23, %v8502_v41  ;;  %v2120_v6 = vmul.f32 %v10649_v23, %v8506_v32  ;;  %v2121_v60 = vmul.f32 %v10649_v23, %v8510_v14  ;;  %v2122_v4 = vmul.f32 %v10649_v23, %v8514_v48  ;;  %v10653_v17 = vld [vmem:[#allocation209_spill] sm:$0xff] }
 0x2dd   :  { %v2123_v38 = vmul.f32 %v10649_v23, %v8518_v16  ;;  %v2124_v24 = vmul.f32 %v10650_v9, %v8522_v25  ;;  %v2125_v22 = vmul.f32 %v10650_v9, %v8526_v40  ;;  %v2126_v41 = vmul.f32 %v10650_v9, %v8530_v47  ;;  %v10652_v16 = vld [vmem:[#allocation217_spill] sm:$0xff] }
 0x2de   :  { %v2127_v32 = vmul.f32 %v10650_v9, %v8542_v39  ;;  %v2128_v14 = vmul.f32 %v10650_v9, %v8534_v35  ;;  %v2129_v48 = vmul.f32 %v10650_v9, %v8538_v2  ;;  %v2130_v23 = vmul.f32 %v10652_v16, %v10651_v27  ;;  %v10654_v2 = vld [vmem:[#allocation219_spill] sm:$0xff] }
 0x2df   :  { %v2131_v25 = vmul.f32 %v10652_v16, %v8550_v34  ;;  %v2132_v40 = vmul.f32 %v10652_v16, %v8554_v15  ;;  %v2133_v47 = vmul.f32 %v10652_v16, %v8558_v53  ;;  %v2134_v39 = vmul.f32 %v10652_v16, %v8562_v58 }
 0x2e0   :  { %v2135_v35 = vmul.f32 %v10652_v16, %v10653_v17  ;;  %v2136_v9 = vmul.f32 %v10654_v2, %v8570_v54  ;;  %v2137_v27 = vmul.f32 %v10654_v2, %v8574_v19  ;;  %v2138_v34 = vmul.f32 %v10654_v2, %v8578_v52  ;;  %v10656_v17 = vld [vmem:[#allocation221_spill] sm:$0xff] }
 0x2e1   :  { %v2139_v15 = vmul.f32 %v10654_v2, %v8590_v63  ;;  %v2140_v53 = vmul.f32 %v10654_v2, %v10655_v20  ;;  %v2141_v58 = vmul.f32 %v10654_v2, %v8586_v13  ;;  %v2142_v16 = vmul.f32 %v10656_v17, %v8594_v0  ;;  %v10658_v20 = vld [vmem:[#allocation169_spill] sm:$0xff]  ;;  %v10659_v13 = vld [vmem:[#allocation54_spill] sm:$0xff] }
 0x2e2   :  { %v2143_v54 = vmul.f32 %v10656_v17, %v8598_v43  ;;  %v2144_v19 = vmul.f32 %v10656_v17, %v8602_v11  ;;  %v8768_v52 = vmul.f32 %v10656_v17, %v8606_v37  ;;  %v2146_v63 = vmul.f32 %v10656_v17, %v8610_v55  ;;  %v10660_v2 = vld [vmem:[#allocation222_spill] sm:$0xff] }
 0x2e3   :  { %v2147_v56 = vmul.f32 %v10656_v17, %v10658_v20  ;;  %v2148_v36 = vmul.f32 %v10660_v2, %v10659_v13  ;;  %v2149_v0 = vmul.f32 %v10660_v2, %v8622_v45  ;;  %v2150_v43 = vmul.f32 %v10660_v2, %v8626_v18  ;;  %v10662_v17 = vld [vmem:[#allocation225_spill] sm:$0xff]  ;;  %v2014_v18 = vpop.permute.xlu1 %2013 }
 0x2e4   :  { %10657 = vst [vmem:[#allocation63_spill] sm:$0xff] %v8768_v52  ;;  %v8782_v11 = vmul.f32 %v10660_v2, %v8638_v50  ;;  %v2152_v37 = vmul.f32 %v10660_v2, %v8630_v1  ;;  %v2153_v55 = vmul.f32 %v10660_v2, %v8634_v59  ;;  %v2154_v20 = vmul.f32 %v10662_v17, %v8642_v26 }
 0x2e5   :  { %v8792_v13 = vmul.f32 %v10662_v17, %v8646_v7  ;;  %v8796_v45 = vmul.f32 %v10662_v17, %v8650_v5  ;;  %v8800_v50 = vmul.f32 %v10662_v17, %v8654_v44  ;;  %v2158_v1 = vmul.f32 %v10662_v17, %v8658_v42 }
 0x2e6   :  { %10661 = vst [vmem:[#allocation66_spill] sm:$0xff] %v8782_v11  ;;  %v2298_v59 = vadd.f32 %v2112_v51, %v2106_v3  ;;  %v2319_v2 = vadd.f32 %v2113_v61, %v2107_v8  ;;  %v2159_v26 = vmul.f32 %v10662_v17, %v8662_v10  ;;  %v2340_v11 = vadd.f32 %v2114_v46, %v2108_v21  ;;  %v10667_v51 = vld [vmem:[#allocation59_spill] sm:$0xff]  ;;  %v10668_v21 = vld [vmem:[#allocation45_spill] sm:$0xff] }
 0x2e7   :  { %10663 = vst [vmem:[#allocation177_spill] sm:$0xff] %v8792_v13  ;;  %10664 = vst [vmem:[#allocation174_spill] sm:$0xff] %v8796_v45  ;;  %v2382_v7 = vadd.f32 %v2116_v62, %v2110_v30  ;;  %v2403_v13 = vadd.f32 %v2117_v28, %v2111_v49  ;;  %v2361_v5 = vadd.f32 %v2115_v12, %v2109_v57  ;;  %v10666_v45 = vld [vmem:[#allocation167_spill] sm:$0xff]  ;;  %v10669_v49 = vld [vmem:[#allocation60_spill] sm:$0xff] }
 0x2e8   :  { %10665 = vst [vmem:[#allocation56_spill] sm:$0xff] %v8800_v50  ;;  %v2299_v52 = vadd.f32 %v2298_v59, %v2118_v31  ;;  %v2320_v29 = vadd.f32 %v2319_v2, %v2119_v33  ;;  %v2160_v44 = vmul.f32 %v2014_v18, %v10666_v45  ;;  %v2341_v50 = vadd.f32 %v2340_v11, %v2120_v6  ;;  %v10670_v12 = vld [vmem:[#allocation172_spill] sm:$0xff]  ;;  %v10671_v11 = vld [vmem:[#allocation55_spill] sm:$0xff] }
 0x2e9   :  { %v2383_v42 = vadd.f32 %v2382_v7, %v2122_v4  ;;  %v2404_v3 = vadd.f32 %v2403_v13, %v2123_v38  ;;  %v2161_v8 = vmul.f32 %v2014_v18, %v10667_v51  ;;  %v2362_v17 = vadd.f32 %v2361_v5, %v2121_v60  ;;  %v10674_v2 = vld [vmem:[#allocation179_spill] sm:$0xff] }
 0x2ea   :  { %v2300_v61 = vadd.f32 %v2299_v52, %v2124_v24  ;;  %v2321_v10 = vadd.f32 %v2320_v29, %v2125_v22  ;;  %v2162_v46 = vmul.f32 %v2014_v18, %v10668_v21  ;;  %v2342_v30 = vadd.f32 %v2341_v50, %v2126_v41  ;;  %v10672_v22 = vld [vmem:[#allocation68_spill] sm:$0xff]  ;;  %v10673_v52 = vld [vmem:[#allocation51_spill] sm:$0xff] }
 0x2eb   :  { %v2384_v62 = vadd.f32 %v2383_v42, %v2128_v14  ;;  %v2405_v28 = vadd.f32 %v2404_v3, %v2129_v48  ;;  %v2163_v31 = vmul.f32 %v2014_v18, %v10669_v49  ;;  %v2363_v57 = vadd.f32 %v2362_v17, %v2127_v32  ;;  %v10682_v21 = vld [vmem:[#allocation227_spill] sm:$0xff] }
 0x2ec   :  { %v2301_v59 = vadd.f32 %v2300_v61, %v2130_v23  ;;  %v2322_v33 = vadd.f32 %v2321_v10, %v2131_v25  ;;  %v2164_v45 = vmul.f32 %v2014_v18, %v10670_v12  ;;  %v2343_v6 = vadd.f32 %v2342_v30, %v2132_v40  ;;  %v10675_v40 = vld [vmem:[#allocation70_spill] sm:$0xff]  ;;  %v10687_v12 = vld [vmem:[#allocation229_spill] sm:$0xff] }
 0x2ed   :  { %v2385_v4 = vadd.f32 %v2384_v62, %v2134_v39  ;;  %v2406_v38 = vadd.f32 %v2405_v28, %v2135_v35  ;;  %v2165_v13 = vmul.f32 %v2014_v18, %v10671_v11  ;;  %v2364_v60 = vadd.f32 %v2363_v57, %v2133_v47 }
 0x2ee   :  { %v2302_v24 = vadd.f32 %v2301_v59, %v2136_v9  ;;  %v2323_v29 = vadd.f32 %v2322_v33, %v2137_v27  ;;  %v1498_v41 = vmul.f32 %v10673_v52, %v10672_v22  ;;  %v2344_v14 = vadd.f32 %v2343_v6, %v2138_v34  ;;  %v10676_v27 = vld [vmem:[#allocation184_spill] sm:$0xff]  ;;  %v10677_v34 = vld [vmem:[#allocation63_spill] sm:$0xff]  ;;  %v10684_v62 = vld [vmem:[#allocation174_spill] sm:$0xff] }
 0x2ef   :  { %v2386_v48 = vadd.f32 %v2385_v4, %v2140_v53  ;;  %v2407_v50 = vadd.f32 %v2406_v38, %v2141_v58  ;;  %v1499_v23 = vmul.f32 %v10673_v52, %v10674_v2  ;;  %v2365_v7 = vadd.f32 %v2364_v60, %v2139_v15  ;;  %v10678_v58 = vld [vmem:[#allocation75_spill] sm:$0xff]  ;;  %v10679_v15 = vld [vmem:[#allocation185_spill] sm:$0xff]  ;;  %v10685_v33 = vld [vmem:[#allocation56_spill] sm:$0xff] }
 0x2f0   :  { %v2303_v32 = vadd.f32 %v2302_v24, %v2142_v16  ;;  %v2324_v25 = vadd.f32 %v2323_v29, %v2143_v54  ;;  %v1500_v39 = vmul.f32 %v10673_v52, %v10675_v40  ;;  %v2345_v35 = vadd.f32 %v2344_v14, %v2144_v19  ;;  %v10680_v19 = vld [vmem:[#allocation66_spill] sm:$0xff]  ;;  %v2097_v24 = vpop.permute.xlu0 %2096  ;;  %v10689_v22 = vld [vmem:[#allocation231_spill] sm:$0xff] }
 0x2f1   :  { %v2387_v18 = vadd.f32 %v2386_v48, %v2146_v63  ;;  %v2408_v9 = vadd.f32 %v2407_v50, %v2147_v56  ;;  %v1501_v47 = vmul.f32 %v10673_v52, %v10676_v27  ;;  %v2366_v53 = vadd.f32 %v2365_v7, %v10677_v34  ;;  %v10681_v56 = vld [vmem:[#allocation226_spill] sm:$0xff]  ;;  %v10698_v7 = vld [vmem:[#allocation81_spill] sm:$0xff] }
 0x2f2   :  { %v2304_v5 = vadd.f32 %v2303_v32, %v2148_v36  ;;  %v2325_v42 = vadd.f32 %v2324_v25, %v2149_v0  ;;  %v1502_v3 = vmul.f32 %v10673_v52, %v10678_v58  ;;  %v2346_v51 = vadd.f32 %v2345_v35, %v2150_v43  ;;  %v10683_v36 = vld [vmem:[#allocation177_spill] sm:$0xff]  ;;  %v10688_v29 = vld [vmem:[#allocation230_spill] sm:$0xff] }
 0x2f3   :  { %v2388_v16 = vadd.f32 %v2387_v18, %v2152_v37  ;;  %v2409_v54 = vadd.f32 %v2408_v9, %v2153_v55  ;;  %v1503_v61 = vmul.f32 %v10673_v52, %v10679_v15  ;;  %v2367_v63 = vadd.f32 %v2366_v53, %v10680_v19  ;;  %v10686_v55 = vld [vmem:[#allocation228_spill] sm:$0xff]  ;;  %v10692_v48 = vld [vmem:[#allocation234_spill] sm:$0xff]  ;;  %v10695_v32 = vld [vmem:[#allocation165_spill] sm:$0xff] }
 0x2f4   :  { %v2305_v10 = vadd.f32 %v2304_v5, %v2154_v20  ;;  %v1722_v17 = vmul.f32 %v10681_v56, %v1498_v41  ;;  %v1723_v30 = vmul.f32 %v10682_v21, %v1499_v23  ;;  %v2326_v0 = vadd.f32 %v2325_v42, %v10683_v36  ;;  %v10690_v41 = vld [vmem:[#allocation232_spill] sm:$0xff]  ;;  %v10694_v23 = vld [vmem:[#allocation17_spill] sm:$0xff]  ;;  %v10699_v27 = vld [vmem:[#allocation18_spill] sm:$0xff] }
 0x2f5   :  { %v2347_v28 = vadd.f32 %v2346_v51, %v10684_v62  ;;  %v2389_v49 = vadd.f32 %v2388_v16, %v2158_v1  ;;  %v2410_v59 = vadd.f32 %v2409_v54, %v2159_v26  ;;  %v2368_v43 = vadd.f32 %v2367_v63, %v10685_v33  ;;  %v10691_v1 = vld [vmem:[#allocation233_spill] sm:$0xff]  ;;  %v10700_v5 = vld [vmem:[#allocation188_spill] sm:$0xff]  ;;  %v10703_v15 = vld [vmem:[#allocation83_spill] sm:$0xff] }
 0x2f6   :  { %v2306_v37 = vadd.f32 %v2305_v10, %v2160_v44  ;;  %v1724_v57 = vmul.f32 %v10686_v55, %v1500_v39  ;;  %v1725_v6 = vmul.f32 %v10687_v12, %v1501_v47  ;;  %v2327_v20 = vadd.f32 %v2326_v0, %v2161_v8  ;;  %v10693_v44 = vld [vmem:[#allocation235_spill] sm:$0xff]  ;;  %v10696_v8 = vld [vmem:[#allocation181_spill] sm:$0xff]  ;;  %v10702_v16 = vld [vmem:[#allocation44_spill] sm:$0xff] }
 0x2f7   :  { %v2348_v4 = vadd.f32 %v2347_v28, %v2162_v46  ;;  %v2390_v38 = vadd.f32 %v2389_v49, %v2164_v45  ;;  %v2411_v11 = vadd.f32 %v2410_v59, %v2165_v13  ;;  %v1726_v60 = vmul.f32 %v10688_v29, %v1502_v3  ;;  %v10697_v45 = vld [vmem:[#allocation236_spill] sm:$0xff]  ;;  %v10701_v3 = vld [vmem:[#allocation159_spill] sm:$0xff]  ;;  %v10705_v19 = vld [vmem:[#allocation189_spill] sm:$0xff] }
 0x2f8   :  { %v1727_v52 = vmul.f32 %v10689_v22, %v1503_v61  ;;  %v1946_v14 = vadd.f32 %v10690_v41, %v1722_v17  ;;  %v1947_v26 = vadd.f32 %v10691_v1, %v1723_v30  ;;  %v1948_v50 = vadd.f32 %v10692_v48, %v1724_v57  ;;  %v10706_v17 = vld [vmem:[#allocation160_spill] sm:$0xff]  ;;  %v2018_v57 = vpop.permute.xlu1 %2017 }
 0x2f9   :  { %v1949_v2 = vadd.f32 %v10693_v44, %v1725_v6  ;;  %v1384_v25 = vmul.f32 %v10695_v32, %v10694_v23  ;;  %v1385_v46 = vmul.f32 %v10695_v32, %v10696_v8  ;;  %v1950_v13 = vadd.f32 %v10697_v45, %v1726_v60  ;;  %v10707_v36 = vld [vmem:[#allocation208_spill] sm:$0xff]  ;;  %v10708_v60 = vld [vmem:[#allocation71_spill] sm:$0xff] }
 0x2fa   :  { %v1951_v40 = vadd.f32 %v10698_v7, %v1727_v52  ;;  %v2280_v39 = vmul.f32 %v2097_v24, %v1946_v14  ;;  %v2281_v35 = vmul.f32 %v2097_v24, %v1947_v26  ;;  %v2369_v18 = vadd.f32 %v2368_v43, %v2163_v31  ;;  %v10704_v31 = vld [vmem:[#allocation23_spill] sm:$0xff]  ;;  %v10709_v52 = vld [vmem:[#allocation52_spill] sm:$0xff]  ;;  %v10710_v26 = vld [vmem:[#allocation186_spill] sm:$0xff] }
 0x2fb   :  { %v2282_v9 = vmul.f32 %v2097_v24, %v1948_v50  ;;  %v1386_v47 = vmul.f32 %v10695_v32, %v10699_v27  ;;  %v1387_v42 = vmul.f32 %v10695_v32, %v10700_v5  ;;  %v2283_v34 = vmul.f32 %v2097_v24, %v1949_v2 }
 0x2fc   :  { %v2284_v53 = vmul.f32 %v2097_v24, %v1950_v13  ;;  %v2285_v58 = vmul.f32 %v2097_v24, %v1951_v40  ;;  %v8850_v51 = vadd.f32 %v10701_v3, %v2280_v39  ;;  %v8853_v54 = vadd.f32 %v10702_v16, %v2281_v35  ;;  %v10711_v13 = vld [vmem:[#allocation73_spill] sm:$0xff]  ;;  %v10712_v39 = vld [vmem:[#allocation190_spill] sm:$0xff] }
 0x2fd   :  { %v8856_v61 = vadd.f32 %v10703_v15, %v2282_v9  ;;  %v1388_v10 = vmul.f32 %v10695_v32, %v10704_v31  ;;  %v1389_v63 = vmul.f32 %v10695_v32, %v10705_v19  ;;  %v1608_v62 = vmul.f32 %v10681_v56, %v1384_v25  ;;  %v10713_v9 = vld [vmem:[#allocation156_spill] sm:$0xff]  ;;  %v10714_v3 = vld [vmem:[#allocation77_spill] sm:$0xff] }
 0x2fe   :  { %v8863_v30 = vadd.f32 %v10706_v17, %v2284_v53  ;;  %v8866_v0 = vadd.f32 %v10707_v36, %v2285_v58  ;;  %v1609_v28 = vmul.f32 %v10682_v21, %v1385_v46  ;;  %v1610_v49 = vmul.f32 %v10686_v55, %v1386_v47  ;;  %v10715_v15 = vld [vmem:[#allocation193_spill] sm:$0xff] }
 0x2ff   :  { %v1611_v59 = vmul.f32 %v10687_v12, %v1387_v42  ;;  %v1612_v33 = vmul.f32 %v10688_v29, %v1388_v10  ;;  %v1613_v43 = vmul.f32 %v10689_v22, %v1389_v63  ;;  %v1832_v6 = vadd.f32 %v10690_v41, %v1608_v62 }
 0x300   :  { %v1833_v24 = vadd.f32 %v10691_v1, %v1609_v28  ;;  %v1504_v14 = vmul.f32 %v10709_v52, %v10708_v60  ;;  %v1505_v50 = vmul.f32 %v10709_v52, %v10710_v26  ;;  %v1834_v2 = vadd.f32 %v10692_v48, %v1610_v49 }
 0x301   :  { %v1835_v23 = vadd.f32 %v10693_v44, %v1611_v59  ;;  %v1836_v32 = vadd.f32 %v10697_v45, %v1612_v33  ;;  %v1837_v25 = vadd.f32 %v10698_v7, %v1613_v43  ;;  %v2166_v8 = vmul.f32 %v2018_v57, %v1832_v6  ;;  %v2101_v59 = vpop.permute.xlu0 %2100  ;;  %v10716_v33 = vld [vmem:[#allocation19_spill] sm:$0xff]  ;;  %v10717_v43 = vld [vmem:[#allocation170_spill] sm:$0xff] }
 0x302   :  { %v2167_v46 = vmul.f32 %v2018_v57, %v1833_v24  ;;  %v1506_v40 = vmul.f32 %v10709_v52, %v10711_v13  ;;  %v1507_v35 = vmul.f32 %v10709_v52, %v10712_v39  ;;  %v8889_v27 = vadd.f32 %v10713_v9, %v2283_v34 }
 0x303   :  { %v2168_v47 = vmul.f32 %v2018_v57, %v1834_v2  ;;  %v2170_v5 = vmul.f32 %v2018_v57, %v1836_v32  ;;  %v2171_v42 = vmul.f32 %v2018_v57, %v1837_v25  ;;  %v2169_v53 = vmul.f32 %v2018_v57, %v1835_v23 }
 0x304   :  { %v2307_v58 = vadd.f32 %v2306_v37, %v2166_v8  ;;  %v1508_v16 = vmul.f32 %v10709_v52, %v10714_v3  ;;  %v1509_v31 = vmul.f32 %v10709_v52, %v10715_v15  ;;  %v2328_v10 = vadd.f32 %v2327_v20, %v2167_v46  ;;  %v10718_v20 = vld [vmem:[#allocation187_spill] sm:$0xff]  ;;  %v2022_v15 = vpop.permute.xlu1 %2021 }
 0x305   :  { %v2349_v19 = vadd.f32 %v2348_v4, %v2168_v47  ;;  %v2391_v63 = vadd.f32 %v2390_v38, %v2170_v5  ;;  %v2412_v17 = vadd.f32 %v2411_v11, %v2171_v42  ;;  %v1728_v36 = vmul.f32 %v10681_v56, %v1504_v14  ;;  %v10719_v14 = vld [vmem:[#allocation21_spill] sm:$0xff] }
 0x306   :  { %v1729_v34 = vmul.f32 %v10682_v21, %v1505_v50  ;;  %v1730_v62 = vmul.f32 %v10686_v55, %v1506_v40  ;;  %v1731_v28 = vmul.f32 %v10687_v12, %v1507_v35  ;;  %v1732_v37 = vmul.f32 %v10688_v29, %v1508_v16  ;;  %v10720_v50 = vld [vmem:[#allocation195_spill] sm:$0xff]  ;;  %v10721_v40 = vld [vmem:[#allocation25_spill] sm:$0xff] }
 0x307   :  { %v1733_v49 = vmul.f32 %v10689_v22, %v1509_v31  ;;  %v1390_v57 = vmul.f32 %v10717_v43, %v10716_v33  ;;  %v1391_v4 = vmul.f32 %v10717_v43, %v10718_v20  ;;  %v1952_v38 = vadd.f32 %v10690_v41, %v1728_v36  ;;  %v10722_v35 = vld [vmem:[#allocation197_spill] sm:$0xff]  ;;  %v10723_v31 = vld [vmem:[#allocation74_spill] sm:$0xff]  ;;  %v10726_v20 = vld [vmem:[#allocation76_spill] sm:$0xff] }
 0x308   :  { %v1953_v11 = vadd.f32 %v10691_v1, %v1729_v34  ;;  %v1954_v6 = vadd.f32 %v10692_v48, %v1730_v62  ;;  %v1955_v24 = vadd.f32 %v10693_v44, %v1731_v28  ;;  %v1956_v60 = vadd.f32 %v10697_v45, %v1732_v37  ;;  %v10724_v36 = vld [vmem:[#allocation57_spill] sm:$0xff] }
 0x309   :  { %v1957_v52 = vadd.f32 %v10698_v7, %v1733_v49  ;;  %v1392_v26 = vmul.f32 %v10717_v43, %v10719_v14  ;;  %v1393_v2 = vmul.f32 %v10717_v43, %v10720_v50  ;;  %v8915_v23 = vadd.f32 %v2369_v18, %v2169_v53  ;;  %v10725_v49 = vld [vmem:[#allocation191_spill] sm:$0xff] }
 0x30a   :  { %v2286_v32 = vmul.f32 %v2101_v59, %v1952_v38  ;;  %v2287_v25 = vmul.f32 %v2101_v59, %v1953_v11  ;;  %v2288_v8 = vmul.f32 %v2101_v59, %v1954_v6  ;;  %v2289_v46 = vmul.f32 %v2101_v59, %v1955_v24  ;;  %v10727_v24 = vld [vmem:[#allocation196_spill] sm:$0xff] }
 0x30b   :  { %v2290_v13 = vmul.f32 %v2101_v59, %v1956_v60  ;;  %v1394_v39 = vmul.f32 %v10717_v43, %v10721_v40  ;;  %v1395_v9 = vmul.f32 %v10717_v43, %v10722_v35  ;;  %v1614_v47 = vmul.f32 %v10681_v56, %v1390_v57 }
 0x30c   :  { %v1615_v5 = vmul.f32 %v10682_v21, %v1391_v4  ;;  %v1616_v42 = vmul.f32 %v10686_v55, %v1392_v26  ;;  %v1617_v18 = vmul.f32 %v10687_v12, %v1393_v2  ;;  %v2291_v53 = vmul.f32 %v2101_v59, %v1957_v52  ;;  %v10728_v26 = vld [vmem:[#allocation78_spill] sm:$0xff]  ;;  %v10729_v2 = vld [vmem:[#allocation200_spill] sm:$0xff] }
 0x30d   :  { %v1618_v3 = vmul.f32 %v10688_v29, %v1394_v39  ;;  %v1619_v16 = vmul.f32 %v10689_v22, %v1395_v9  ;;  %v1510_v34 = vmul.f32 %v10724_v36, %v10723_v31  ;;  %v1838_v62 = vadd.f32 %v10690_v41, %v1614_v47 }
 0x30e   :  { %v1839_v28 = vadd.f32 %v10691_v1, %v1615_v5  ;;  %v1840_v37 = vadd.f32 %v10692_v48, %v1616_v42  ;;  %v1511_v33 = vmul.f32 %v10724_v36, %v10725_v49  ;;  %v1841_v43 = vadd.f32 %v10693_v44, %v1617_v18 }
 0x30f   :  { %v1842_v59 = vadd.f32 %v10697_v45, %v1618_v3  ;;  %v1843_v57 = vadd.f32 %v10698_v7, %v1619_v16  ;;  %v1512_v4 = vmul.f32 %v10724_v36, %v10726_v20  ;;  %v2172_v38 = vmul.f32 %v2022_v15, %v1838_v62 }
 0x310   :  { %v2173_v11 = vmul.f32 %v2022_v15, %v1839_v28  ;;  %v2174_v6 = vmul.f32 %v2022_v15, %v1840_v37  ;;  %v1513_v60 = vmul.f32 %v10724_v36, %v10727_v24  ;;  %v1514_v50 = vmul.f32 %v10724_v36, %v10728_v26 }
 0x311   :  { %v2176_v52 = vmul.f32 %v2022_v15, %v1842_v59  ;;  %v2177_v14 = vmul.f32 %v2022_v15, %v1843_v57  ;;  %v1515_v40 = vmul.f32 %v10724_v36, %v10729_v2  ;;  %v2175_v39 = vmul.f32 %v2022_v15, %v1841_v43 }
 0x312   :  { %v8945_v35 = vadd.f32 %v2307_v58, %v2172_v38  ;;  %v8947_v9 = vadd.f32 %v2328_v10, %v2173_v11  ;;  %v8949_v47 = vadd.f32 %v2349_v19, %v2174_v6  ;;  %v1734_v18 = vmul.f32 %v10681_v56, %v1510_v34  ;;  %v2105_v10 = vpop.permute.xlu0 %2104 }
 0x313   :  { %v8951_v5 = vadd.f32 %v2391_v63, %v2176_v52  ;;  %v8953_v42 = vadd.f32 %v2412_v17, %v2177_v14  ;;  %v1735_v3 = vmul.f32 %v10682_v21, %v1511_v33  ;;  %v1736_v16 = vmul.f32 %v10686_v55, %v1512_v4  ;;  %v10731_v52 = vld [vmem:[#allocation171_spill] sm:$0xff]  ;;  %v10732_v14 = vld [vmem:[#allocation192_spill] sm:$0xff] }
 0x314   :  { %v1737_v31 = vmul.f32 %v10687_v12, %v1513_v60  ;;  %v1738_v15 = vmul.f32 %v10688_v29, %v1514_v50  ;;  %v1739_v58 = vmul.f32 %v10689_v22, %v1515_v40  ;;  %v1958_v19 = vadd.f32 %v10690_v41, %v1734_v18  ;;  %v10730_v60 = vld [vmem:[#allocation22_spill] sm:$0xff]  ;;  %v10733_v40 = vld [vmem:[#allocation24_spill] sm:$0xff]  ;;  %v10735_v18 = vld [vmem:[#allocation27_spill] sm:$0xff] }
 0x315   :  { %v1959_v63 = vadd.f32 %v10691_v1, %v1735_v3  ;;  %v2437_v17 = vadd.f32 %v8850_v51, %v2286_v32  ;;  %v2458_v36 = vadd.f32 %v8853_v54, %v2287_v25  ;;  %v1960_v34 = vadd.f32 %v10692_v48, %v1736_v16 }
 0x316   :  { %v1961_v62 = vadd.f32 %v10693_v44, %v1737_v31  ;;  %v1962_v28 = vadd.f32 %v10697_v45, %v1738_v15  ;;  %v1963_v37 = vadd.f32 %v10698_v7, %v1739_v58  ;;  %v2292_v49 = vmul.f32 %v2105_v10, %v1958_v19  ;;  %v10736_v15 = vld [vmem:[#allocation202_spill] sm:$0xff] }
 0x317   :  { %v2293_v33 = vmul.f32 %v2105_v10, %v1959_v63  ;;  %v2479_v43 = vadd.f32 %v8856_v61, %v2288_v8  ;;  %v2500_v59 = vadd.f32 %v8889_v27, %v2289_v46  ;;  %v2294_v57 = vmul.f32 %v2105_v10, %v1960_v34 }
 0x318   :  { %v2295_v20 = vmul.f32 %v2105_v10, %v1961_v62  ;;  %v2296_v4 = vmul.f32 %v2105_v10, %v1962_v28  ;;  %v2297_v51 = vmul.f32 %v2105_v10, %v1963_v37  ;;  %v2438_v32 = vadd.f32 %v2437_v17, %v2292_v49  ;;  %v2026_v49 = vpop.permute.xlu1 %2025 }
 0x319   :  { %v8971_v54 = vadd.f32 %v2458_v36, %v2293_v33  ;;  %v2521_v25 = vadd.f32 %v8863_v30, %v2290_v13  ;;  %v2542_v38 = vadd.f32 %v8866_v0, %v2291_v53  ;;  %v2371_v11 = vadd.f32 %v8915_v23, %v2175_v39  ;;  %v10734_v13 = vld [vmem:[#allocation199_spill] sm:$0xff] }
 0x31a   :  { %v2480_v6 = vadd.f32 %v2479_v43, %v2294_v57  ;;  %v2501_v24 = vadd.f32 %v2500_v59, %v2295_v20  ;;  %v1396_v61 = vmul.f32 %v10731_v52, %v10730_v60  ;;  %v2439_v8 = vrot.slane %v2438_v32, 4 }
 0x31b   :  { %v2522_v27 = vadd.f32 %v2521_v25, %v2296_v4  ;;  %v2543_v46 = vadd.f32 %v2542_v38, %v2297_v51  ;;  %v1397_v26 = vmul.f32 %v10731_v52, %v10732_v14  ;;  %v1398_v30 = vmul.f32 %v10731_v52, %v10733_v40 }
 0x31c   :  { %v2481_v50 = vrot.slane %v2480_v6, 4  ;;  %v2502_v2 = vrot.slane %v2501_v24, 4  ;;  %v1399_v0 = vmul.f32 %v10731_v52, %v10734_v13  ;;  %v2460_v23 = vrot.slane %v8971_v54, 4 }
 0x31d   :  { %v2523_v53 = vrot.slane %v2522_v27, 4  ;;  %v2544_v39 = vrot.slane %v2543_v46, 4  ;;  %v1400_v3 = vmul.f32 %v10731_v52, %v10735_v18  ;;  %v8987_v16 = vadd.f32 %v2439_v8, %v2438_v32  ;;  %v10737_v8 = vld [vmem:[#allocation26_spill] sm:$0xff]  ;;  %v10741_v18 = vld [vmem:[#allocation201_spill] sm:$0xff] }
 0x31e   :  { %v2482_v31 = vadd.f32 %v2481_v50, %v2480_v6  ;;  %v1401_v58 = vmul.f32 %v10731_v52, %v10736_v15  ;;  %v1620_v10 = vmul.f32 %v10681_v56, %v1396_v61  ;;  %v8992_v19 = vadd.f32 %v2502_v2, %v2501_v24  ;;  %v10739_v2 = vld [vmem:[#allocation194_spill] sm:$0xff] }
 0x31f   :  { %v8994_v63 = vadd.f32 %v2523_v53, %v2522_v27  ;;  %v1621_v17 = vmul.f32 %v10682_v21, %v1397_v26  ;;  %v1622_v36 = vmul.f32 %v10686_v55, %v1398_v30  ;;  %v1623_v62 = vmul.f32 %v10687_v12, %v1399_v0  ;;  %v10738_v27 = vld [vmem:[#allocation155_spill] sm:$0xff]  ;;  %v10740_v53 = vld [vmem:[#allocation28_spill] sm:$0xff] }
 0x320   :  { %v2483_v34 = vrot.slane %v2482_v31, 2  ;;  %v1624_v28 = vmul.f32 %v10688_v29, %v1400_v3  ;;  %v1625_v37 = vmul.f32 %v10689_v22, %v1401_v58  ;;  %v9001_v33 = vadd.f32 %v2544_v39, %v2543_v46  ;;  %v2030_v58 = vpop.permute.xlu1 %2029 }
 0x321   :  { %v1844_v43 = vadd.f32 %v10690_v41, %v1620_v10  ;;  %v1845_v59 = vadd.f32 %v10691_v1, %v1621_v17  ;;  %v1846_v57 = vadd.f32 %v10692_v48, %v1622_v36  ;;  %v2525_v20 = vrot.slane %v8994_v63, 2  ;;  %v10745_v10 = vld [vmem:[#allocation149_spill] sm:$0xff]  ;;  %v10746_v36 = vld [vmem:[#allocation198_spill] sm:$0xff] }
 0x322   :  { %v1847_v4 = vadd.f32 %v10693_v44, %v1623_v62  ;;  %v1848_v51 = vadd.f32 %v10697_v45, %v1624_v28  ;;  %v1849_v32 = vadd.f32 %v10698_v7, %v1625_v37  ;;  %v9010_v25 = vadd.f32 %v2483_v34, %v2482_v31  ;;  %v10742_v31 = vld [vmem:[#allocation31_spill] sm:$0xff] }
 0x323   :  { %v2178_v38 = vmul.f32 %v2026_v49, %v1844_v43  ;;  %v2179_v6 = vmul.f32 %v2026_v49, %v1845_v59  ;;  %v2180_v24 = vmul.f32 %v2026_v49, %v1846_v57  ;;  %v1402_v46 = vmul.f32 %v10738_v27, %v10737_v8  ;;  %v10747_v57 = vld [vmem:[#allocation30_spill] sm:$0xff]  ;;  %v10749_v8 = vld [vmem:[#allocation33_spill] sm:$0xff] }
 0x324   :  { %v2181_v60 = vmul.f32 %v2026_v49, %v1847_v4  ;;  %v2182_v52 = vmul.f32 %v2026_v49, %v1848_v51  ;;  %v2183_v61 = vmul.f32 %v2026_v49, %v1849_v32  ;;  %v1403_v40 = vmul.f32 %v10738_v27, %v10739_v2  ;;  %v10748_v51 = vld [vmem:[#allocation203_spill] sm:$0xff] }
 0x325   :  { %v2309_v14 = vadd.f32 %v8945_v35, %v2178_v38  ;;  %v2330_v26 = vadd.f32 %v8947_v9, %v2179_v6  ;;  %v2351_v50 = vadd.f32 %v8949_v47, %v2180_v24  ;;  %v1404_v39 = vmul.f32 %v10738_v27, %v10740_v53  ;;  %v10743_v9 = vld [vmem:[#allocation204_spill] sm:$0xff] }
 0x326   :  { %v2372_v30 = vadd.f32 %v2371_v11, %v2181_v60  ;;  %v2393_v13 = vadd.f32 %v8951_v5, %v2182_v52  ;;  %v2414_v0 = vadd.f32 %v8953_v42, %v2183_v61  ;;  %v1405_v3 = vmul.f32 %v10738_v27, %v10741_v18  ;;  %v10744_v42 = vld [vmem:[#allocation29_spill] sm:$0xff] }
 0x327   :  { %v1406_v35 = vmul.f32 %v10738_v27, %v10742_v31  ;;  %v1407_v47 = vmul.f32 %v10738_v27, %v10743_v9  ;;  %v1626_v15 = vmul.f32 %v10681_v56, %v1402_v46  ;;  %v1627_v11 = vmul.f32 %v10682_v21, %v1403_v40  ;;  %v10750_v46 = vld [vmem:[#allocation206_spill] sm:$0xff] }
 0x328   :  { %v1628_v5 = vmul.f32 %v10686_v55, %v1404_v39  ;;  %v1408_v17 = vmul.f32 %v10745_v10, %v10744_v42  ;;  %v1409_v34 = vmul.f32 %v10745_v10, %v10746_v36  ;;  %v1629_v62 = vmul.f32 %v10687_v12, %v1405_v3  ;;  %v2034_v42 = vpop.permute.xlu1 %2033 }
 0x329   :  { %v1630_v28 = vmul.f32 %v10688_v29, %v1406_v35  ;;  %v1631_v37 = vmul.f32 %v10689_v22, %v1407_v47  ;;  %v1850_v49 = vadd.f32 %v10690_v41, %v1626_v15  ;;  %v1851_v43 = vadd.f32 %v10691_v1, %v1627_v11 }
 0x32a   :  { %v1852_v59 = vadd.f32 %v10692_v48, %v1628_v5  ;;  %v1410_v4 = vmul.f32 %v10745_v10, %v10747_v57  ;;  %v1411_v32 = vmul.f32 %v10745_v10, %v10748_v51  ;;  %v1853_v38 = vadd.f32 %v10693_v44, %v1629_v62  ;;  %v10754_v57 = vld [vmem:[#allocation34_spill] sm:$0xff]  ;;  %v10755_v51 = vld [vmem:[#allocation205_spill] sm:$0xff] }
 0x32b   :  { %v1854_v6 = vadd.f32 %v10697_v45, %v1630_v28  ;;  %v1855_v24 = vadd.f32 %v10698_v7, %v1631_v37  ;;  %v2184_v60 = vmul.f32 %v2030_v58, %v1850_v49  ;;  %v2185_v52 = vmul.f32 %v2030_v58, %v1851_v43 }
 0x32c   :  { %v2186_v61 = vmul.f32 %v2030_v58, %v1852_v59  ;;  %v1412_v27 = vmul.f32 %v10745_v10, %v10749_v8  ;;  %v1413_v2 = vmul.f32 %v10745_v10, %v10750_v46  ;;  %v2187_v40 = vmul.f32 %v2030_v58, %v1853_v38 }
 0x32d   :  { %v2188_v53 = vmul.f32 %v2030_v58, %v1854_v6  ;;  %v2189_v39 = vmul.f32 %v2030_v58, %v1855_v24  ;;  %v2310_v18 = vadd.f32 %v2309_v14, %v2184_v60  ;;  %v2331_v3 = vadd.f32 %v2330_v26, %v2185_v52  ;;  %v10751_v58 = vld [vmem:[#allocation89_spill] sm:$0xff]  ;;  %v10756_v60 = vld [vmem:[#allocation35_spill] sm:$0xff] }
 0x32e   :  { %v2352_v31 = vadd.f32 %v2351_v50, %v2186_v61  ;;  %v1632_v35 = vmul.f32 %v10681_v56, %v1408_v17  ;;  %v1633_v9 = vmul.f32 %v10682_v21, %v1409_v34  ;;  %v2373_v47 = vadd.f32 %v2372_v30, %v2187_v40  ;;  %v10752_v17 = vld [vmem:[#allocation46_spill] sm:$0xff]  ;;  %v10757_v61 = vld [vmem:[#allocation207_spill] sm:$0xff] }
 0x32f   :  { %v2394_v15 = vadd.f32 %v2393_v13, %v2188_v53  ;;  %v2415_v11 = vadd.f32 %v2414_v0, %v2189_v39  ;;  %v1634_v5 = vmul.f32 %v10686_v55, %v1410_v4  ;;  %v1635_v36 = vmul.f32 %v10687_v12, %v1411_v32  ;;  %v10753_v13 = vld [vmem:[#allocation32_spill] sm:$0xff] }
 0x330   :  { %v1636_v10 = vmul.f32 %v10688_v29, %v1412_v27  ;;  %v1637_v62 = vmul.f32 %v10689_v22, %v1413_v2  ;;  %v1856_v14 = vadd.f32 %v10690_v41, %v1632_v35  ;;  %v1857_v26 = vadd.f32 %v10691_v1, %v1633_v9  ;;  %v2038_v9 = vpop.permute.xlu1 %2037 }
 0x331   :  { %v1858_v50 = vadd.f32 %v10692_v48, %v1634_v5  ;;  %v1414_v30 = vmul.f32 %v10752_v17, %v10751_v58  ;;  %v1415_v0 = vmul.f32 %v10752_v17, %v10753_v13  ;;  %v1859_v34 = vadd.f32 %v10693_v44, %v1635_v36 }
 0x332   :  { %v1860_v28 = vadd.f32 %v10697_v45, %v1636_v10  ;;  %v1861_v37 = vadd.f32 %v10698_v7, %v1637_v62  ;;  %v2190_v49 = vmul.f32 %v2034_v42, %v1856_v14  ;;  %v2191_v43 = vmul.f32 %v2034_v42, %v1857_v26 }
 0x333   :  { %v2192_v59 = vmul.f32 %v2034_v42, %v1858_v50  ;;  %v1416_v4 = vmul.f32 %v10752_v17, %v10754_v57  ;;  %v1417_v32 = vmul.f32 %v10752_v17, %v10755_v51  ;;  %v2193_v38 = vmul.f32 %v2034_v42, %v1859_v34 }
 0x334   :  { %v2194_v6 = vmul.f32 %v2034_v42, %v1860_v28  ;;  %v2195_v24 = vmul.f32 %v2034_v42, %v1861_v37  ;;  %v1418_v52 = vmul.f32 %v10752_v17, %v10756_v60  ;;  %v1419_v8 = vmul.f32 %v10752_v17, %v10757_v61 }
 0x335   :  { %v1638_v27 = vmul.f32 %v10681_v56, %v1414_v30  ;;  %v1639_v46 = vmul.f32 %v10682_v21, %v1415_v0  ;;  %v1640_v2 = vmul.f32 %v10686_v55, %v1416_v4  ;;  %v1641_v40 = vmul.f32 %v10687_v12, %v1417_v32 }
 0x336   :  { %v1642_v53 = vmul.f32 %v10688_v29, %v1418_v52  ;;  %v2311_v39 = vadd.f32 %v2310_v18, %v2190_v49  ;;  %v2332_v35 = vadd.f32 %v2331_v3, %v2191_v43  ;;  %v1643_v5 = vmul.f32 %v10689_v22, %v1419_v8 }
 0x337   :  { %v1862_v42 = vadd.f32 %v10690_v41, %v1638_v27  ;;  %v1863_v36 = vadd.f32 %v10691_v1, %v1639_v46  ;;  %v1864_v10 = vadd.f32 %v10692_v48, %v1640_v2  ;;  %v1865_v56 = vadd.f32 %v10693_v44, %v1641_v40 }
 0x338   :  { %v1866_v21 = vadd.f32 %v10697_v45, %v1642_v53  ;;  %v2353_v55 = vadd.f32 %v2352_v31, %v2192_v59  ;;  %v2374_v62 = vadd.f32 %v2373_v47, %v2193_v38  ;;  %v1867_v12 = vadd.f32 %v10698_v7, %v1643_v5 }
 0x339   :  { %v2395_v29 = vadd.f32 %v2394_v15, %v2194_v6  ;;  %v2416_v18 = vadd.f32 %v2415_v11, %v2195_v24  ;;  %v2196_v3 = vmul.f32 %v2038_v9, %v1862_v42  ;;  %v2197_v14 = vmul.f32 %v2038_v9, %v1863_v36 }
 0x33a   :  { %v2198_v26 = vmul.f32 %v2038_v9, %v1864_v10  ;;  %v2199_v22 = vmul.f32 %v2038_v9, %v1865_v56  ;;  %v2200_v50 = vmul.f32 %v2038_v9, %v1866_v21  ;;  %v9092_v41 = vadd.f32 %v2525_v20, %v8994_v63 }
 0x33b   :  { %v2201_v1 = vmul.f32 %v2038_v9, %v1867_v12  ;;  %v2312_v48 = vadd.f32 %v2311_v39, %v2196_v3  ;;  %v2461_v44 = vadd.f32 %v2460_v23, %v8971_v54  ;;  %v2333_v45 = vadd.f32 %v2332_v35, %v2197_v14 }
 0x33c   :  { %v2354_v7 = vadd.f32 %v2353_v55, %v2198_v26  ;;  %v2375_v31 = vadd.f32 %v2374_v62, %v2199_v22  ;;  %v2396_v47 = vadd.f32 %v2395_v29, %v2200_v50  ;;  %v2441_v17 = vrot.slane %v8987_v16, 2 }
 0x33d   :  { %v2313_v15 = vrot.slane %v2312_v48, 4  ;;  %v2417_v11 = vadd.f32 %v2416_v18, %v2201_v1  ;;  %v2462_v58 = vrot.slane %v2461_v44, 2  ;;  %v2334_v30 = vrot.slane %v2333_v45, 4 }
 0x33e   :  { %v2355_v13 = vrot.slane %v2354_v7, 4  ;;  %v2376_v0 = vrot.slane %v2375_v31, 4  ;;  %v2397_v63 = vrot.slane %v2396_v47, 4  ;;  %v2442_v37 = vadd.f32 %v2441_v17, %v8987_v16 }
 0x33f   :  { %v2314_v20 = vadd.f32 %v2313_v15, %v2312_v48  ;;  %v2418_v34 = vrot.slane %v2417_v11, 4  ;;  %v2463_v28 = vadd.f32 %v2462_v58, %v2461_v44  ;;  %v2335_v43 = vadd.f32 %v2334_v30, %v2333_v45 }
 0x340   :  { %v2356_v49 = vadd.f32 %v2355_v13, %v2354_v7  ;;  %v2377_v54 = vadd.f32 %v2376_v0, %v2375_v31  ;;  %v2398_v23 = vadd.f32 %v2397_v63, %v2396_v47  ;;  %v2443_v51 = vrot.slane %v2442_v37, 1 }
 0x341   :  { %v2419_v59 = vadd.f32 %v2418_v34, %v2417_v11  ;;  %v2464_v57 = vrot.slane %v2463_v28, 1  ;;  %v2315_v4 = vrot.slane %v2314_v20, 2  ;;  %v2336_v6 = vrot.slane %v2335_v43, 2 }
 0x342   :  { %v2357_v32 = vrot.slane %v2356_v49, 2  ;;  %v2399_v38 = vrot.slane %v2398_v23, 2  ;;  %v2378_v24 = vrot.slane %v2377_v54, 2  ;;  %v2444_v61 = vadd.f32 %v2443_v51, %v2442_v37  ;;  %v4383_v37 = vld [vmem:[#allocation8 + $0x200] ss:$16 sps:$4 sm:$0xff]  }
 0x343   :  { %v2465_v60 = vadd.f32 %v2464_v57, %v2463_v28  ;;  %v2316_v52 = vadd.f32 %v2315_v4, %v2314_v20  ;;  %v2504_v8 = vrot.slane %v8992_v19, 2  ;;  %v2337_v46 = vadd.f32 %v2336_v6, %v2335_v43  ;;  %v4391_v4 = vld [vmem:[#allocation8 + $0x224] ss:$16 sps:$4 sm:$0xff]   ;;  %v4394_v51 = vld [vmem:[#allocation8 + $0x22c] ss:$16 sps:$4 sm:$0xff]  }
 0x344   :  { %v2358_v27 = vadd.f32 %v2357_v32, %v2356_v49  ;;  %v2400_v16 = vadd.f32 %v2399_v38, %v2398_v23  ;;  %v2379_v2 = vadd.f32 %v2378_v24, %v2377_v54  ;;  %v2556_v39 = vpack.c.bf16 %v2444_v61, %v2444_v61  ;;  %v4386_v49 = vld [vmem:[#allocation8 + $0x208] ss:$16 sps:$4 sm:$0xff]  }
 0x345   :  { %v2557_v40 = vpack.c.bf16 %v2465_v60, %v2465_v60  ;;  %v2317_v53 = vrot.slane %v2316_v52, 1  ;;  %v2505_v35 = vadd.f32 %v2504_v8, %v8992_v19  ;;  %v2338_v9 = vrot.slane %v2337_v46, 1  ;;  %v4389_v60 = vld [vmem:[#allocation8 + $0x220] ss:$16 sps:$4 sm:$0xff]   ;;  %v4397_v8 = vld [vmem:[#allocation8 + $0x244] ss:$16 sps:$4 sm:$0xff]  }
 0x346   :  { %v2380_v5 = vrot.slane %v2379_v2, 1  ;;  %v2359_v42 = vrot.slane %v2358_v27, 1  ;;  %v2485_v36 = vrot.slane %v9010_v25, 1  ;;  %v2794_v21 = vunpack.c.l.b16 %v2556_v39  ;;  %v4398_v39 = vld [vmem:[#allocation8 + $0x248] ss:$16 sps:$4 sm:$0xff]  }
 0x347   :  { %v2795_v10 = vunpack.c.l.b16 %v2557_v40  ;;  %v2318_v56 = vadd.f32 %v2317_v53, %v2316_v52  ;;  %v2506_v55 = vrot.slane %v2505_v35, 1  ;;  %v2339_v62 = vadd.f32 %v2338_v9, %v2337_v46  ;;  %v4392_v52 = vld [vmem:[#allocation8 + $0x228] ss:$16 sps:$4 sm:$0xff]   ;;  %v4406_v9 = vld [vmem:[#allocation8 + $0x26c] ss:$16 sps:$4 sm:$0xff]  }
 0x348   :  { %v2381_v12 = vadd.f32 %v2380_v5, %v2379_v2  ;;  %v2360_v29 = vadd.f32 %v2359_v42, %v2358_v27  ;;  %v2486_v18 = vadd.f32 %v2485_v36, %v9010_v25  ;;  %v2420_v26 = vrot.slane %v2419_v59, 2  ;;  %v4400_v27 = vld [vmem:[#allocation8 + $0x24c] ss:$16 sps:$4 sm:$0xff]   ;;  %v4401_v42 = vld [vmem:[#allocation8 + $0x260] ss:$16 sps:$4 sm:$0xff]  }
 0x349   :  { %v2550_v3 = vpack.c.bf16 %v2318_v56, %v2318_v56  ;;  %v2507_v14 = vadd.f32 %v2506_v55, %v2505_v35  ;;  %v2546_v22 = vrot.slane %v9001_v33, 2  ;;  %v2551_v19 = vpack.c.bf16 %v2339_v62, %v2339_v62  ;;  %v4403_v35 = vld [vmem:[#allocation8 + $0x264] ss:$16 sps:$4 sm:$0xff]   ;;  %v4404_v36 = vld [vmem:[#allocation8 + $0x268] ss:$16 sps:$4 sm:$0xff]  }
 0x34a   :  { %v2553_v50 = vpack.c.bf16 %v2381_v12, %v2381_v12  ;;  %v2552_v1 = vpack.c.bf16 %v2360_v29, %v2360_v29  ;;  %v2558_v48 = vpack.c.bf16 %v2486_v18, %v2486_v18  ;;  %v2421_v7 = vadd.f32 %v2420_v26, %v2419_v59  ;;  %v4412_v56 = vld [vmem:[#allocation8 + $0x28c] ss:$16 sps:$4 sm:$0xff]   ;;  %v4410_v55 = vld [vmem:[#allocation8 + $0x288] ss:$16 sps:$4 sm:$0xff]   ;;  %v4415_v62 = vld [vmem:[#allocation8 + $0x2a4] ss:$16 sps:$4 sm:$0xff]  }
 0x34b   :  { %v2788_v44 = vunpack.c.l.b16 %v2550_v3  ;;  %v2559_v45 = vpack.c.bf16 %v2507_v14, %v2507_v14  ;;  %v2547_v31 = vadd.f32 %v2546_v22, %v9001_v33  ;;  %v2789_v47 = vunpack.c.l.b16 %v2551_v19  ;;  %v4418_v12 = vld [vmem:[#allocation8 + $0x2ac] ss:$16 sps:$4 sm:$0xff]   ;;  %v4413_v29 = vld [vmem:[#allocation8 + $0x2a0] ss:$16 sps:$4 sm:$0xff]   ;;  %v4416_v18 = vld [vmem:[#allocation8 + $0x2a8] ss:$16 sps:$4 sm:$0xff]  }
 0x34c   :  { %v2791_v15 = vunpack.c.l.b16 %v2553_v50  ;;  %v2790_v11 = vunpack.c.l.b16 %v2552_v1  ;;  %v2796_v58 = vunpack.c.l.b16 %v2558_v48  ;;  %v2422_v30 = vrot.slane %v2421_v7, 1  ;;  %v4421_v3 = vld [vmem:[#allocation8 + $0x2c4] ss:$16 sps:$4 sm:$0xff]   ;;  %v4424_v14 = vld [vmem:[#allocation8 + $0x2cc] ss:$16 sps:$4 sm:$0xff]  }
 0x34d   :  { %v2801_v25 = vsel %vm2800_vm1, %v2794_v21, %v2788_v44  ;;  %v2797_v17 = vunpack.c.l.b16 %v2559_v45  ;;  %v2548_v13 = vrot.slane %v2547_v31, 1  ;;  %v2802_v0 = vsel %vm2800_vm1, %v2795_v10, %v2789_v47  ;;  %v4409_v10 = vld [vmem:[#allocation8 + $0x284] ss:$16 sps:$4 sm:$0xff]   ;;  %v4407_v21 = vld [vmem:[#allocation8 + $0x280] ss:$16 sps:$4 sm:$0xff]  }
 0x34e   :  { %v2807_v63 = vpack.c.b16 %v2801_v25, %v2801_v25  ;;  %v9108_v20 = vsel %vm2800_vm1, %v2796_v58, %v2790_v11  ;;  %v2401_v34 = vrot.slane %v2400_v16, 1  ;;  %v2808_v28 = vpack.c.b16 %v2802_v0, %v2802_v0  ;;  %v4419_v26 = vld [vmem:[#allocation8 + $0x2c0] ss:$16 sps:$4 sm:$0xff]   ;;  %v4422_v22 = vld [vmem:[#allocation8 + $0x2c8] ss:$16 sps:$4 sm:$0xff]  }
 0x34f   :  { %v2804_v33 = vsel %vm2800_vm1, %v2797_v17, %v2791_v15  ;;  %v2423_v54 = vadd.f32 %v2422_v30, %v2421_v7  ;;  %v2549_v23 = vadd.f32 %v2548_v13, %v2547_v31  ;;  %v2527_v59 = vrot.slane %v9092_v41, 1  ;;  %v4427_v19 = vld [vmem:[#allocation8 + $0x2e4] ss:$16 sps:$4 sm:$0xff]   ;;  %v4430_v50 = vld [vmem:[#allocation8 + $0x2ec] ss:$16 sps:$4 sm:$0xff]  }
 0x350   :  { %v2402_v43 = vadd.f32 %v2401_v34, %v2400_v16  ;;  %3811 = vmatprep.mubr.bf16.mxu0 %v2808_v28  ;;  %3934 = vmatprep.mubr.bf16.mxu1 %v2808_v28  ;;  %v2810_v57 = vpack.c.b16 %v2804_v33, %v2804_v33  ;;  %v4425_v1 = vld [vmem:[#allocation8 + $0x2e0] ss:$16 sps:$4 sm:$0xff]   ;;  %v4428_v48 = vld [vmem:[#allocation8 + $0x2e8] ss:$16 sps:$4 sm:$0xff]   ;;  %v4433_v44 = vld [vmem:[#allocation8 + $0x304] ss:$16 sps:$4 sm:$0xff]  }
 0x351   :  { %v2555_v32 = vpack.c.bf16 %v2423_v54, %v2423_v54  ;;  %3812 = vmatmul.mubr.bf16.vlgmr.msra.gmra.mrb[0].mxu0 %v2807_v63  ;;  %3935 = vmatmul.mubr.bf16.vlgmr.msra.gmra.mrb[0].mxu1 %v2807_v63  ;;  %v2561_v38 = vpack.c.bf16 %v2549_v23, %v2549_v23  ;;  %v2528_v6 = vadd.f32 %v2527_v59, %v9092_v41  ;;  %v4395_v41 = vld [vmem:[#allocation8 + $0x240] ss:$16 sps:$4 sm:$0xff]   ;;  %v4436_v45 = vld [vmem:[#allocation8 + $0x30c] ss:$16 sps:$4 sm:$0xff]   ;;  %v4434_v31 = vld [vmem:[#allocation8 + $0x308] ss:$16 sps:$4 sm:$0xff]  }
 0x352   :  { %v2554_v24 = vpack.c.bf16 %v2402_v43, %v2402_v43  ;;  %3821 = vmatpush1.bf16.msra.mxu0 %v4383_v37  ;;  %3944 = vmatpush1.bf16.msra.mxu1 %v4386_v49  ;;  %v4431_v7 = vld [vmem:[#allocation8 + $0x300] ss:$16 sps:$4 sm:$0xff]   ;;  %v4439_v47 = vld [vmem:[#allocation8 + $0x324] ss:$16 sps:$4 sm:$0xff]   ;;  %v4442_v15 = vld [vmem:[#allocation8 + $0x32c] ss:$16 sps:$4 sm:$0xff]  }
 0x353   :  { %v2793_v61 = vunpack.c.l.b16 %v2555_v32  ;;  %3852 = vmatprep.mubr.bf16.mxu0 %v2810_v57  ;;  %3975 = vmatprep.mubr.bf16.mxu1 %v2810_v57  ;;  %v2799_v16 = vunpack.c.l.b16 %v2561_v38  ;;  %v2560_v46 = vpack.c.bf16 %v2528_v6, %v2528_v6  ;;  %v4437_v11 = vld [vmem:[#allocation8 + $0x320] ss:$16 sps:$4 sm:$0xff]   ;;  %v4440_v58 = vld [vmem:[#allocation8 + $0x328] ss:$16 sps:$4 sm:$0xff]   ;;  %v4445_v25 = vld [vmem:[#allocation8 + $0x344] ss:$16 sps:$4 sm:$0xff]  }
 0x354   :  { %v2792_v2 = vunpack.c.l.b16 %v2554_v24  ;;  %3822 = vmatprep.subr.bf16.mxu0 %v4391_v4  ;;  %3945 = vmatprep.subr.bf16.mxu1 %v4394_v51  ;;  %v4448_v17 = vld [vmem:[#allocation8 + $0x34c] ss:$16 sps:$4 sm:$0xff]   ;;  %v4443_v30 = vld [vmem:[#allocation8 + $0x340] ss:$16 sps:$4 sm:$0xff]   ;;  %v4446_v13 = vld [vmem:[#allocation8 + $0x348] ss:$16 sps:$4 sm:$0xff]  }
 0x355   :  { %v9114_v40 = vsel %vm2800_vm1, %v2799_v16, %v2793_v61  ;;  %v2798_v53 = vunpack.c.l.b16 %v2560_v46  ;;  %v4451_v0 = vld [vmem:[#allocation8 + $0x364] ss:$16 sps:$4 sm:$0xff]   ;;  %v4454_v63 = vld [vmem:[#allocation8 + $0x36c] ss:$16 sps:$4 sm:$0xff]   ;;  %v4449_v34 = vld [vmem:[#allocation8 + $0x360] ss:$16 sps:$4 sm:$0xff]   ;;  %v2809_v16 = vpack.c.b16 %v9108_v20, %v9108_v20 }
 0x356   :  { %3823 = vmatpush1.bf16.msra.mxu0 %v4389_v60  ;;  %3946 = vmatpush1.bf16.msra.mxu1 %v4392_v52  ;;  %v4452_v28 = vld [vmem:[#allocation8 + $0x368] ss:$16 sps:$4 sm:$0xff]   ;;  %v4457_v37 = vld [vmem:[#allocation8 + $0x384] ss:$16 sps:$4 sm:$0xff]   ;;  %v4460_v49 = vld [vmem:[#allocation8 + $0x38c] ss:$16 sps:$4 sm:$0xff]  }
 0x357   :  { %3824 = vmatprep.subr.bf16.mxu0 %v4397_v8  ;;  %3947 = vmatprep.subr.bf16.mxu1 %v4400_v27  ;;  %v9117_v5 = vsel %vm2800_vm1, %v2798_v53, %v2792_v2  ;;  %v4455_v33 = vld [vmem:[#allocation8 + $0x380] ss:$16 sps:$4 sm:$0xff]   ;;  %v4458_v54 = vld [vmem:[#allocation8 + $0x388] ss:$16 sps:$4 sm:$0xff]   ;;  %v4463_v23 = vld [vmem:[#allocation8 + $0x3a4] ss:$16 sps:$4 sm:$0xff]   ;;  %v2812_v2 = vpack.c.b16 %v9114_v40, %v9114_v40 }
 0x358   :  { %v4466_v43 = vld [vmem:[#allocation8 + $0x3ac] ss:$16 sps:$4 sm:$0xff]   ;;  %v4461_v59 = vld [vmem:[#allocation8 + $0x3a0] ss:$16 sps:$4 sm:$0xff]   ;;  %v4464_v57 = vld [vmem:[#allocation8 + $0x3a8] ss:$16 sps:$4 sm:$0xff]  }
 0x359   :  { %v4469_v4 = vld [vmem:[#allocation8 + $0x3c4] ss:$16 sps:$4 sm:$0xff]   ;;  %v4472_v51 = vld [vmem:[#allocation8 + $0x3cc] ss:$16 sps:$4 sm:$0xff]   ;;  %v4467_v32 = vld [vmem:[#allocation8 + $0x3c0] ss:$16 sps:$4 sm:$0xff]  }
 0x35a   :  { %3825 = vmatpush1.bf16.msra.mxu0 %v4395_v41  ;;  %3948 = vmatpush1.bf16.msra.mxu1 %v4398_v39  ;;  %v4470_v38 = vld [vmem:[#allocation8 + $0x3c8] ss:$16 sps:$4 sm:$0xff]   ;;  %v4475_v6 = vld [vmem:[#allocation8 + $0x3e4] ss:$16 sps:$4 sm:$0xff]   ;;  %v4478_v24 = vld [vmem:[#allocation8 + $0x3ec] ss:$16 sps:$4 sm:$0xff]  }
 0x35b   :  { %3826 = vmatprep.subr.bf16.mxu0 %v4403_v35  ;;  %3949 = vmatprep.subr.bf16.mxu1 %v4406_v9  ;;  %v4473_v60 = vld [vmem:[#allocation8 + $0x3e0] ss:$16 sps:$4 sm:$0xff]   ;;  %v4476_v52 = vld [vmem:[#allocation8 + $0x3e8] ss:$16 sps:$4 sm:$0xff]   ;;  %v4481_v61 = vld [vmem:[#allocation8 + $0x404] ss:$16 sps:$4 sm:$0xff]  }
 0x35c   :  { %v4484_v8 = vld [vmem:[#allocation8 + $0x40c] ss:$16 sps:$4 sm:$0xff]   ;;  %v4479_v27 = vld [vmem:[#allocation8 + $0x400] ss:$16 sps:$4 sm:$0xff]   ;;  %v4482_v46 = vld [vmem:[#allocation8 + $0x408] ss:$16 sps:$4 sm:$0xff]  }
 0x35d   :  { %v4487_v53 = vld [vmem:[#allocation8 + $0x424] ss:$16 sps:$4 sm:$0xff]   ;;  %v4490_v41 = vld [vmem:[#allocation8 + $0x42c] ss:$16 sps:$4 sm:$0xff]   ;;  %v4485_v39 = vld [vmem:[#allocation8 + $0x420] ss:$16 sps:$4 sm:$0xff]  }
 0x35e   :  { %3827 = vmatpush1.bf16.msra.mxu0 %v4401_v42  ;;  %3950 = vmatpush1.bf16.msra.mxu1 %v4404_v36  ;;  %v4488_v35 = vld [vmem:[#allocation8 + $0x428] ss:$16 sps:$4 sm:$0xff]   ;;  %v4493_v9 = vld [vmem:[#allocation8 + $0x444] ss:$16 sps:$4 sm:$0xff]   ;;  %v4496_v20 = vld [vmem:[#allocation8 + $0x44c] ss:$16 sps:$4 sm:$0xff]  }
 0x35f   :  { %3828 = vmatprep.subr.bf16.mxu0 %v4409_v10  ;;  %3951 = vmatprep.subr.bf16.mxu1 %v4412_v56  ;;  %v4491_v42 = vld [vmem:[#allocation8 + $0x440] ss:$16 sps:$4 sm:$0xff]   ;;  %v4494_v36 = vld [vmem:[#allocation8 + $0x448] ss:$16 sps:$4 sm:$0xff]   ;;  %v4499_v40 = vld [vmem:[#allocation8 + $0x464] ss:$16 sps:$4 sm:$0xff]  }
 0x360   :  { %v4502_v10 = vld [vmem:[#allocation8 + $0x46c] ss:$16 sps:$4 sm:$0xff]   ;;  %v4497_v56 = vld [vmem:[#allocation8 + $0x460] ss:$16 sps:$4 sm:$0xff]  }
 0x362   :  { %3829 = vmatpush1.bf16.msra.mxu0 %v4407_v21  ;;  %3952 = vmatpush1.bf16.msra.mxu1 %v4410_v55  ;;  %v4500_v21 = vld [vmem:[#allocation8 + $0x468] ss:$16 sps:$4 sm:$0xff]   ;;  %v4505_v55 = vld [vmem:[#allocation8 + $0x484] ss:$16 sps:$4 sm:$0xff]  }
 0x363   :  { %3830 = vmatprep.subr.bf16.mxu0 %v4415_v62  ;;  %3953 = vmatprep.subr.bf16.mxu1 %v4418_v12  ;;  %v4508_v62 = vld [vmem:[#allocation8 + $0x48c] ss:$16 sps:$4 sm:$0xff]   ;;  %v4503_v12 = vld [vmem:[#allocation8 + $0x480] ss:$16 sps:$4 sm:$0xff]  }
 0x366   :  { %3831 = vmatpush1.bf16.msra.mxu0 %v4413_v29  ;;  %3954 = vmatpush1.bf16.msra.mxu1 %v4416_v18  ;;  %v4506_v29 = vld [vmem:[#allocation8 + $0x488] ss:$16 sps:$4 sm:$0xff]   ;;  %v4511_v18 = vld [vmem:[#allocation8 + $0x4a4] ss:$16 sps:$4 sm:$0xff]  }
 0x367   :  { %3832 = vmatprep.subr.bf16.mxu0 %v4421_v3  ;;  %3955 = vmatprep.subr.bf16.mxu1 %v4424_v14  ;;  %v4514_v3 = vld [vmem:[#allocation8 + $0x4ac] ss:$16 sps:$4 sm:$0xff]   ;;  %v4509_v14 = vld [vmem:[#allocation8 + $0x4a0] ss:$16 sps:$4 sm:$0xff]  }
 0x36a   :  { %3833 = vmatpush1.bf16.msra.mxu0 %v4419_v26  ;;  %3956 = vmatpush1.bf16.msra.mxu1 %v4422_v22  ;;  %v4512_v26 = vld [vmem:[#allocation8 + $0x4a8] ss:$16 sps:$4 sm:$0xff]   ;;  %v4517_v22 = vld [vmem:[#allocation8 + $0x4c4] ss:$16 sps:$4 sm:$0xff]  }
 0x36b   :  { %3834 = vmatprep.subr.bf16.mxu0 %v4427_v19  ;;  %3957 = vmatprep.subr.bf16.mxu1 %v4430_v50  ;;  %v4520_v19 = vld [vmem:[#allocation8 + $0x4cc] ss:$16 sps:$4 sm:$0xff]   ;;  %v4515_v50 = vld [vmem:[#allocation8 + $0x4c0] ss:$16 sps:$4 sm:$0xff]  }
 0x36e   :  { %3835 = vmatpush1.bf16.msra.mxu0 %v4425_v1  ;;  %3958 = vmatpush1.bf16.msra.mxu1 %v4428_v48  ;;  %v4518_v1 = vld [vmem:[#allocation8 + $0x4c8] ss:$16 sps:$4 sm:$0xff]   ;;  %v4523_v48 = vld [vmem:[#allocation8 + $0x4e4] ss:$16 sps:$4 sm:$0xff]  }
 0x36f   :  { %3836 = vmatprep.subr.bf16.mxu0 %v4433_v44  ;;  %3959 = vmatprep.subr.bf16.mxu1 %v4436_v45  ;;  %v4526_v44 = vld [vmem:[#allocation8 + $0x4ec] ss:$16 sps:$4 sm:$0xff]   ;;  %v4521_v45 = vld [vmem:[#allocation8 + $0x4e0] ss:$16 sps:$4 sm:$0xff]  }
 0x372   :  { %3837 = vmatpush1.bf16.msra.mxu0 %v4431_v7  ;;  %3960 = vmatpush1.bf16.msra.mxu1 %v4434_v31  ;;  %v4524_v7 = vld [vmem:[#allocation8 + $0x4e8] ss:$16 sps:$4 sm:$0xff]   ;;  %v4529_v31 = vld [vmem:[#allocation8 + $0x504] ss:$16 sps:$4 sm:$0xff]  }
 0x373   :  { %3838 = vmatprep.subr.bf16.mxu0 %v4439_v47  ;;  %3961 = vmatprep.subr.bf16.mxu1 %v4442_v15  ;;  %v4532_v47 = vld [vmem:[#allocation8 + $0x50c] ss:$16 sps:$4 sm:$0xff]   ;;  %v4527_v15 = vld [vmem:[#allocation8 + $0x500] ss:$16 sps:$4 sm:$0xff]  }
 0x376   :  { %3839 = vmatpush1.bf16.msra.mxu0 %v4437_v11  ;;  %3962 = vmatpush1.bf16.msra.mxu1 %v4440_v58  ;;  %v4530_v11 = vld [vmem:[#allocation8 + $0x508] ss:$16 sps:$4 sm:$0xff]   ;;  %v4535_v58 = vld [vmem:[#allocation8 + $0x524] ss:$16 sps:$4 sm:$0xff]  }
 0x377   :  { %3840 = vmatprep.subr.bf16.mxu0 %v4445_v25  ;;  %3963 = vmatprep.subr.bf16.mxu1 %v4448_v17  ;;  %v4538_v25 = vld [vmem:[#allocation8 + $0x52c] ss:$16 sps:$4 sm:$0xff]   ;;  %v4533_v17 = vld [vmem:[#allocation8 + $0x520] ss:$16 sps:$4 sm:$0xff]  }
 0x37a   :  { %3841 = vmatpush1.bf16.msra.mxu0 %v4443_v30  ;;  %3964 = vmatpush1.bf16.msra.mxu1 %v4446_v13  ;;  %v4536_v30 = vld [vmem:[#allocation8 + $0x528] ss:$16 sps:$4 sm:$0xff]   ;;  %v4541_v13 = vld [vmem:[#allocation8 + $0x544] ss:$16 sps:$4 sm:$0xff]  }
 0x37b   :  { %3842 = vmatprep.subr.bf16.mxu0 %v4451_v0  ;;  %3965 = vmatprep.subr.bf16.mxu1 %v4454_v63  ;;  %v4544_v0 = vld [vmem:[#allocation8 + $0x54c] ss:$16 sps:$4 sm:$0xff]   ;;  %v4539_v63 = vld [vmem:[#allocation8 + $0x540] ss:$16 sps:$4 sm:$0xff]  }
 0x37e   :  { %3843 = vmatpush1.bf16.msra.mxu0 %v4449_v34  ;;  %3966 = vmatpush1.bf16.msra.mxu1 %v4452_v28  ;;  %v4542_v34 = vld [vmem:[#allocation8 + $0x548] ss:$16 sps:$4 sm:$0xff]   ;;  %v4547_v28 = vld [vmem:[#allocation8 + $0x564] ss:$16 sps:$4 sm:$0xff]  }
 0x37f   :  { %3844 = vmatprep.subr.bf16.mxu0 %v4457_v37  ;;  %3967 = vmatprep.subr.bf16.mxu1 %v4460_v49  ;;  %v4550_v37 = vld [vmem:[#allocation8 + $0x56c] ss:$16 sps:$4 sm:$0xff]   ;;  %v4545_v49 = vld [vmem:[#allocation8 + $0x560] ss:$16 sps:$4 sm:$0xff]  }
 0x382   :  { %3845 = vmatpush1.bf16.msra.mxu0 %v4455_v33  ;;  %3968 = vmatpush1.bf16.msra.mxu1 %v4458_v54  ;;  %v4548_v33 = vld [vmem:[#allocation8 + $0x568] ss:$16 sps:$4 sm:$0xff]   ;;  %v4553_v54 = vld [vmem:[#allocation8 + $0x584] ss:$16 sps:$4 sm:$0xff]  }
 0x383   :  { %3846 = vmatprep.subr.bf16.mxu0 %v4463_v23  ;;  %3969 = vmatprep.subr.bf16.mxu1 %v4466_v43  ;;  %v4556_v23 = vld [vmem:[#allocation8 + $0x58c] ss:$16 sps:$4 sm:$0xff]   ;;  %v4551_v43 = vld [vmem:[#allocation8 + $0x580] ss:$16 sps:$4 sm:$0xff]  }
 0x386   :  { %3847 = vmatpush1.bf16.msra.mxu0 %v4461_v59  ;;  %3970 = vmatpush1.bf16.msra.mxu1 %v4464_v57  ;;  %v4554_v59 = vld [vmem:[#allocation8 + $0x588] ss:$16 sps:$4 sm:$0xff]   ;;  %v4559_v57 = vld [vmem:[#allocation8 + $0x5a4] ss:$16 sps:$4 sm:$0xff]  }
 0x387   :  { %3848 = vmatprep.subr.bf16.mxu0 %v4469_v4  ;;  %3971 = vmatprep.subr.bf16.mxu1 %v4472_v51  ;;  %v4562_v4 = vld [vmem:[#allocation8 + $0x5ac] ss:$16 sps:$4 sm:$0xff]   ;;  %v4557_v51 = vld [vmem:[#allocation8 + $0x5a0] ss:$16 sps:$4 sm:$0xff]  }
 0x38a   :  { %3849 = vmatpush1.bf16.msra.mxu0 %v4467_v32  ;;  %3972 = vmatpush1.bf16.msra.mxu1 %v4470_v38  ;;  %v4560_v32 = vld [vmem:[#allocation8 + $0x5a8] ss:$16 sps:$4 sm:$0xff]   ;;  %v4565_v38 = vld [vmem:[#allocation8 + $0x5c4] ss:$16 sps:$4 sm:$0xff]  }
 0x38b   :  { %3850 = vmatprep.subr.bf16.mxu0 %v4475_v6  ;;  %3973 = vmatprep.subr.bf16.mxu1 %v4478_v24  ;;  %v4568_v6 = vld [vmem:[#allocation8 + $0x5cc] ss:$16 sps:$4 sm:$0xff]   ;;  %v4563_v24 = vld [vmem:[#allocation8 + $0x5c0] ss:$16 sps:$4 sm:$0xff]  }
 0x38e   :  { %3851 = vmatpush1.bf16.msra.mxu0 %v4473_v60  ;;  %3974 = vmatpush1.bf16.msra.mxu1 %v4476_v52  ;;  %v4566_v60 = vld [vmem:[#allocation8 + $0x5c8] ss:$16 sps:$4 sm:$0xff]   ;;  %v4571_v52 = vld [vmem:[#allocation8 + $0x5e4] ss:$16 sps:$4 sm:$0xff]  }
 0x38f   :  { %3861 = vmatprep.subr.bf16.mxu0 %v4481_v61  ;;  %3984 = vmatprep.subr.bf16.mxu1 %v4484_v8  ;;  %v4574_v61 = vld [vmem:[#allocation8 + $0x5ec] ss:$16 sps:$4 sm:$0xff]   ;;  %v4569_v8 = vld [vmem:[#allocation8 + $0x5e0] ss:$16 sps:$4 sm:$0xff]  }
 0x391   :  { %3853 = vmatmul.mubr.bf16.vlgmr.msra.gmra.mrb[0].mxu0 %v2809_v16  ;;  %3976 = vmatmul.mubr.bf16.vlgmr.msra.gmra.mrb[0].mxu1 %v2809_v16  ;;  %v2811_v16 = vpack.c.b16 %v9117_v5, %v9117_v5 }
 0x392   :  { %3862 = vmatpush1.bf16.msra.mxu0 %v4479_v27  ;;  %3893 = vmatprep.mubr.bf16.mxu0 %v2812_v2  ;;  %v4572_v27 = vld [vmem:[#allocation8 + $0x5e8] ss:$16 sps:$4 sm:$0xff]  }
 0x393   :  { %3985 = vmatpush1.bf16.msra.mxu1 %v4482_v46  ;;  %4016 = vmatprep.mubr.bf16.mxu1 %v2812_v2  ;;  %v2754_v46 = vld [vmem:[%s9150_s5] sm:$0xf]  ;;  %v4767_v2 = vmov 1983009808   ;;  %s4768_s5 = smov [#allocation10]  }
 0x394   :  { %3863 = vmatprep.subr.bf16.mxu0 %v4487_v53  ;;  %3986 = vmatprep.subr.bf16.mxu1 %v4490_v41  ;;  %v4032_v53 = vunpack.c.l.s4 %v4767_v2  ;;  %v10758_v41 = vld [vmem:[#allocation93_spill] sm:$0xff]  ;;  %s4054_s23 = sshll.u32 %s4768_s5, 4  ;;  %s4055_s23 = int_to_ptr.vmem [resolvable:$true] %s4054_s23 }
 0x395   :  { %s4729_s25 = scalar_lea.vmem %s4055_s23, 128  ;;  %p4734_p5 = scmp.lt.s32.totalorder %s4055_s23, %s4055_s23 }
 0x396   :  { %3864 = vmatpush1.bf16.msra.mxu0 %v4485_v39  ;;  %v2759_v39 = vrot.slane %v2754_v46, %v10758_v41  ;;  %p4730_p4 = scmp.ne.s32.totalorder %s4055_s23, %s4729_s25  ;;  %p4735_p6 = scmp.lt.s32.totalorder %s4729_s25, %s4729_s25 }
 0x397   :  { %3987 = vmatpush1.bf16.msra.mxu1 %v4488_v35  ;;  %3865 = vmatprep.subr.bf16.mxu0 %v4493_v9  ;;  %v10759_v35 = vld [vmem:[#allocation223_spill] sm:$0xff] }
 0x398   :  { %3988 = vmatprep.subr.bf16.mxu1 %v4496_v20  ;;  %v2767_v9 = vrot.slane %v2754_v46, %v10759_v35  ;;  %v10760_v20 = vld [vmem:[#allocation95_spill] sm:$0xff]  ;;  %p4736_p7 = por %p4735_p6, %p4734_p5 }
 0x39a   :  { %3866 = vmatpush1.bf16.msra.mxu0 %v4491_v42  ;;  %v2763_v42 = vrot.slane %v2754_v46, %v10760_v20  ;;  %p4737_p8 = pnand %p4736_p7, %p4730_p4 }
 0x39b   :  { %3989 = vmatpush1.bf16.msra.mxu1 %v4494_v36  ;;  %3867 = vmatprep.subr.bf16.mxu0 %v4499_v40  ;;  %v4033_v36 = vunpack.c.0.s8 %v4032_v53  ;;  %v10761_v40 = vld [vmem:[#allocation224_spill] sm:$0xff] }
 0x39c   :  { %3990 = vmatprep.subr.bf16.mxu1 %v4502_v10  ;;  %v2771_v10 = vrot.slane %v2754_v46, %v10761_v40 }
 0x39e   :  { %3868 = vmatpush1.bf16.msra.mxu0 %v4497_v56 }
 0x39f   :  { %3991 = vmatpush1.bf16.msra.mxu1 %v4500_v21  ;;  %3869 = vmatprep.subr.bf16.mxu0 %v4505_v55 }
 0x3a0   :  { %3992 = vmatprep.subr.bf16.mxu1 %v4508_v62 }
 0x3a2   :  { %3870 = vmatpush1.bf16.msra.mxu0 %v4503_v12 }
 0x3a3   :  { %3993 = vmatpush1.bf16.msra.mxu1 %v4506_v29  ;;  %3871 = vmatprep.subr.bf16.mxu0 %v4511_v18  ;;  %v10762_v29 = vld [vmem:[#allocation85_spill] sm:$0xff] }
 0x3a4   :  { %3994 = vmatprep.subr.bf16.mxu1 %v4514_v3  ;;  %v4036_v18 = vsub.s32 %v4033_v36, %v10762_v29 }
 0x3a6   :  { %3872 = vmatpush1.bf16.msra.mxu0 %v4509_v14 }
 0x3a7   :  { %3995 = vmatpush1.bf16.msra.mxu1 %v4512_v26  ;;  %3873 = vmatprep.subr.bf16.mxu0 %v4517_v22 }
 0x3a8   :  { %3996 = vmatprep.subr.bf16.mxu1 %v4520_v19 }
 0x3aa   :  { %3874 = vmatpush1.bf16.msra.mxu0 %v4515_v50 }
 0x3ab   :  { %3997 = vmatpush1.bf16.msra.mxu1 %v4518_v1  ;;  %3875 = vmatprep.subr.bf16.mxu0 %v4523_v48 }
 0x3ac   :  { %3998 = vmatprep.subr.bf16.mxu1 %v4526_v44 }
 0x3ae   :  { %3876 = vmatpush1.bf16.msra.mxu0 %v4521_v45 }
 0x3af   :  { %3999 = vmatpush1.bf16.msra.mxu1 %v4524_v7  ;;  %3877 = vmatprep.subr.bf16.mxu0 %v4529_v31 }
 0x3b0   :  { %4000 = vmatprep.subr.bf16.mxu1 %v4532_v47 }
 0x3b2   :  { %3878 = vmatpush1.bf16.msra.mxu0 %v4527_v15 }
 0x3b3   :  { %4001 = vmatpush1.bf16.msra.mxu1 %v4530_v11  ;;  %3879 = vmatprep.subr.bf16.mxu0 %v4535_v58 }
 0x3b4   :  { %4002 = vmatprep.subr.bf16.mxu1 %v4538_v25 }
 0x3b6   :  { %3880 = vmatpush1.bf16.msra.mxu0 %v4533_v17 }
 0x3b7   :  { %4003 = vmatpush1.bf16.msra.mxu1 %v4536_v30  ;;  %3881 = vmatprep.subr.bf16.mxu0 %v4541_v13 }
 0x3b8   :  { %4004 = vmatprep.subr.bf16.mxu1 %v4544_v0 }
 0x3ba   :  { %3882 = vmatpush1.bf16.msra.mxu0 %v4539_v63 }
 0x3bb   :  { %4005 = vmatpush1.bf16.msra.mxu1 %v4542_v34  ;;  %3883 = vmatprep.subr.bf16.mxu0 %v4547_v28 }
 0x3bc   :  { %4006 = vmatprep.subr.bf16.mxu1 %v4550_v37 }
 0x3be   :  { %3884 = vmatpush1.bf16.msra.mxu0 %v4545_v49 }
 0x3bf   :  { %4007 = vmatpush1.bf16.msra.mxu1 %v4548_v33  ;;  %3885 = vmatprep.subr.bf16.mxu0 %v4553_v54 }
 0x3c0   :  { %4008 = vmatprep.subr.bf16.mxu1 %v4556_v23 }
 0x3c2   :  { %3886 = vmatpush1.bf16.msra.mxu0 %v4551_v43 }
 0x3c3   :  { %4009 = vmatpush1.bf16.msra.mxu1 %v4554_v59  ;;  %3887 = vmatprep.subr.bf16.mxu0 %v4559_v57 }
 0x3c4   :  { %4010 = vmatprep.subr.bf16.mxu1 %v4562_v4 }
 0x3c6   :  { %3888 = vmatpush1.bf16.msra.mxu0 %v4557_v51 }
 0x3c7   :  { %4011 = vmatpush1.bf16.msra.mxu1 %v4560_v32  ;;  %3889 = vmatprep.subr.bf16.mxu0 %v4565_v38 }
 0x3c8   :  { %4012 = vmatprep.subr.bf16.mxu1 %v4568_v6 }
 0x3ca   :  { %3890 = vmatpush1.bf16.msra.mxu0 %v4563_v24 }
 0x3cb   :  { %4013 = vmatpush1.bf16.msra.mxu1 %v4566_v60  ;;  %3891 = vmatprep.subr.bf16.mxu0 %v4571_v52 }
 0x3cc   :  { %4014 = vmatprep.subr.bf16.mxu1 %v4574_v61 }
 0x3ce   :  { %3892 = vmatpush1.bf16.msra.mxu0 %v4569_v8 }
 0x3cf   :  { %4015 = vmatpush1.bf16.msra.mxu1 %v4572_v27 }
 0x3d1   :  { %3894 = vmatmul.mubr.bf16.vlgmr.msra.gmra.mrb[0].mxu0 %v2811_v16 }
 0x3d2   :  { %4017 = vmatmul.mubr.bf16.vlgmr.msra.gmra.mrb[0].mxu1 %v2811_v16 }
 0x4a4   :  { %v3895_v56 = vpop.f32.mrb[0].mxu0 }
 0x4a5   :  { %v4257_v21 = vadd.f32 %v3895_v56, %v2759_v39  ;;  %v4018_v5 = vpop.f32.mrb[0].mxu1  ;;  %v3897_v55 = vpop.f32.mrb[1].mxu0 }
 0x4a6   :  { %v4259_v62 = vadd.f32 %v4018_v5, %v2767_v9  ;;  %v4258_v12 = vadd.f32 %v3897_v55, %v2763_v42  ;;  %v4020_v3 = vpop.f32.mrb[1].mxu1  ;;  %v3899_v14 = vpop.f32.mrb[2].mxu0 }
 0x4a7   :  { %v4260_v26 = vadd.f32 %v4020_v3, %v2771_v10  ;;  %v4022_v22 = vpop.f32.mrb[2].mxu1  ;;  %v3900_v19 = vpop.f32.mrb[3].mxu0 }
 0x4a8   :  { %v4029_v50 = vcombine.low %v4257_v21, %v4258_v12  ;;  %v4023_v1 = vpop.f32.mrb[3].mxu1 }
 0x4a9   :  { %v4030_v48 = vcombine.low %v4259_v62, %v4260_v26 }
 0x4aa   :  { %v4037_v44 = vrot.slane %v4029_v50, %v4036_v18 }
 0x4ab   :  { %v4044_v45 = vrot.slane %v4030_v48, %v4036_v18 }
 0x4ad   :  { %v4045_v7 = vcombine.low %v4037_v44, %v4044_v45 }
 0x4af   :  { %4047 = vst [vmem:[#allocation10] sm:$0xff] %v4045_v7 }
 0x4b0   :  { %4740 = shalt.err (!%p4737_p8)
}
 0x4b1   :  { %s4741_s28 = scalar_lea.hbm %s9151_s6, 128 }
 0x4b2   :  { %p4742_p9 = scmp.ne.s32.totalorder %s9151_s6, %s4741_s28  ;;  %p4745_p10 = scmp.lt.u32.totalorder %s4741_s28, %s9151_s6 }
 0x4b4   :  { %p4747_p11 = pnand %p4745_p10, %p4742_p9 }
 0x4b6   :  { %4750 = shalt.err (!%p4747_p11)
}
 0x4b7   :  { %4057 = dma.vmem_to_hbm [thread:$0]  %s4055_s23, 128, %s9151_s6, [#allocation4]  }
 0x4b8   :  { %4757 = dma.done.wait [#allocation4], 128  }
 0x4b9   :  { %4758 = vsyncadd [#allocation4], 4294967168 }
 0x4ba   :  { %4061 = vsyncpa [#allocation3], 1 }
 0x4bb   :  { %4062 = vsyncpa [#allocation6], 1 }
 0x4bc   :  { %4063 = vsyncpa [#allocation9], 1 }
 0x4bd   :  { %4064 = vsyncpa [#allocation4], 1 }

</bundles_post_ra>
